<compile_context>
chip_gen: v6e
topology: v6e:2x2x1
jax: 0.10.0
libtpu: 0.0.40
codegen_flags: <defaults>
</compile_context>

<pallas_src>
import functools

import jax
import jax.numpy as jnp
from jax import lax
from jax.experimental import pallas as pl
from jax.experimental.pallas import tpu as pltpu


def _unit_kernel(x_ref, w_ref, u_ref, a_ref, o_ref, acc_ref, *,
                 rb, d_total, td, mask_d):
    k = pl.program_id(2)

    @pl.when(k == 0)
    def _init():
        # (u * (x - w))^2 >= 0 everywhere, so 0.0 is a correct max-init.
        # NOTE: this invariant also makes zero-masking of padded D lanes safe.
        acc_ref[...] = jnp.zeros_like(acc_ref)

    tb = acc_ref.shape[0]
    nchunks = tb // rb

    if mask_d:
        # Only reached when no td dividing D was found; the mask is applied to
        # the small 2-D tiles (x/w/u), never to the (rb, to, td) hot tensor.
        limit = d_total - k * td                      # valid lanes this block
        lane_x = lax.broadcasted_iota(jnp.int32, (rb, x_ref.shape[1]), 1)
        lane_w = lax.broadcasted_iota(jnp.int32, w_ref.shape, 1)

    def chunk_body(c, carry):
        r0 = pl.multiple_of(c * rb, rb)
        xc = x_ref[pl.ds(r0, rb), :].astype(jnp.float32)   # (rb, td)
        w = w_ref[...].astype(jnp.float32)                 # (to, td)
        u = u_ref[...].astype(jnp.float32)                 # (to, td)
        if mask_d:
            # Zero all three operands in padded lanes -> contribution is exactly
            # 0 (NaN-proof) and can never win the running max.
            xc = jnp.where(lane_x < limit, xc, 0.0)
            w = jnp.where(lane_w < limit, w, 0.0)
            u = jnp.where(lane_w < limit, u, 0.0)

        t = u[None, :, :] * (xc[:, None, :] - w[None, :, :])   # (rb, to, td)
        sq = t * t
        part = jnp.max(sq, axis=-1)                            # (rb, to) XLU reduce
        cur = acc_ref[pl.ds(r0, rb), :]
        acc_ref[pl.ds(r0, rb), :] = jnp.maximum(cur, part)     # VPU fold, small acc
        return carry

    lax.fori_loop(0, nchunks, chunk_body, 0)

    @pl.when(k == pl.num_programs(2) - 1)
    def _finalize():
        z = acc_ref[...]                          # (tb, to), already lane-reduced
        y = jnp.exp(-z)                           # one EUP exp per output tile
        a = a_ref[...].astype(jnp.float32)        # (1, to), broadcast over tb
        out = y + a * (1.0 - 2.0 * y)
        o_ref[...] = out.astype(o_ref.dtype)


def _pick_td(D, cap=512):
    """Largest lane tile <= cap that divides D (multiple of 128 preferred)."""
    best = None
    m = 128
    while m <= min(D, cap):
        if D % m == 0:
            best = m
        m += 128
    if best is not None:
        return best, False
    if D <= cap:
        return D, False                      # full-extent block, no mask
    return min(cap, (D // 128) * 128), True  # fallback: masked last block


def _pick_to(O, cap=256):
    if O < 128:
        return O                             # full-extent block
    return min(cap, (O // 128) * 128)


def _pick_tb(B, cap=128):
    if B < 8:
        return B                             # full-extent block
    return min(cap, (B // 8) * 8)


def mwdnet_unit_forward(x, w, u, andor01, *, tb=None, to=None, td=None,
                        vmem_limit_bytes=32 * 1024 * 1024):
    """Forward pass of the MWDNet `unit` layer (modinf=True).

    The '*' (blend) mode is implemented; '^' / 'v' are obtained by passing
    andor01 of all zeros / all ones respectively.
    """
    assert x.ndim == 2 and w.ndim == 2 and u.ndim == 2
    B, D = x.shape
    O, D_w = w.shape
    assert D_w == D and u.shape == (O, D) and andor01.shape == (1, O)

    if to is None:
        to = _pick_to(O)
    if td is None:
        td, mask_d = _pick_td(D)
    else:
        mask_d = (D % td) != 0
    if tb is None:
        tb = _pick_tb(B)
        # v7x megacore: keep >= 2 tiles on the parallel axes for non-tiny
        # batches so both TensorCores are used (harmless extra step elsewhere).
        if B >= 32 and pl.cdiv(B, tb) * pl.cdiv(O, to) == 1:
            tb = max(8, ((tb // 2) // 8) * 8)

    # Batch-row chunk processed per inner-loop iteration (one sublane group).
    rb = 8 if (tb % 8 == 0) else tb
    assert tb % rb == 0

    grid = (pl.cdiv(B, tb), pl.cdiv(O, to), pl.cdiv(D, td))

    kernel = functools.partial(_unit_kernel, rb=rb, d_total=D, td=td,
                               mask_d=mask_d)

    return pl.pallas_call(
        kernel,
        out_shape=jax.ShapeDtypeStruct((B, O), x.dtype),
        grid_spec=pltpu.PrefetchScalarGridSpec(
            num_scalar_prefetch=0,
            grid=grid,
            in_specs=[
                pl.BlockSpec((tb, td), lambda b, o, k: (b, k)),   # x
                pl.BlockSpec((to, td), lambda b, o, k: (o, k)),   # w (no batch dep)
                pl.BlockSpec((to, td), lambda b, o, k: (o, k)),   # u (no batch dep)
                pl.BlockSpec((1, to), lambda b, o, k: (0, o)),    # andor01
            ],
            out_specs=pl.BlockSpec((tb, to), lambda b, o, k: (b, o)),
            scratch_shapes=[pltpu.VMEM((tb, to), jnp.float32)],   # small acc
        ),
        compiler_params=pltpu.CompilerParams(
            dimension_semantics=("parallel", "parallel", "arbitrary"),
            vmem_limit_bytes=vmem_limit_bytes,
        ),
    )(x, w, u, andor01)


if __name__ == "__main__":
    # Small shapes consistent with unit(in_features=384, out_features=128).
    B, D, O = 24, 384, 128
    key = jax.random.PRNGKey(0)
    kx, kw, ku, ka = jax.random.split(key, 4)
    x = jax.random.normal(kx, (B, D), dtype=jnp.float32)
    w = jax.random.uniform(kw, (O, D), dtype=jnp.float32, minval=-0.5, maxval=0.5)
    u = jax.random.uniform(ku, (O, D), dtype=jnp.float32, minval=0.2, maxval=0.7)
    andor01 = jax.random.bernoulli(ka, 0.5, (1, O)).astype(jnp.float32)

    out = jax.block_until_ready(mwdnet_unit_forward(x, w, u, andor01))

    # Pure-JAX reference (same math as the PyTorch forward).
    xuw = u[None, :, :] * (x[:, None, :] - w[None, :, :])
    z = jnp.max(xuw * xuw, axis=-1)
    y = jnp.exp(-z)
    ref = y + andor01 * (1.0 - 2.0 * y)

    if not jnp.allclose(out, ref, rtol=1e-5, atol=1e-5):
        max_err = float(jnp.max(jnp.abs(out - ref)))
        raise AssertionError(f"Pallas kernel mismatch vs reference, max abs err = {max_err}")
    print("KERNEL_OK")
</pallas_src>

<mosaic_0001>
module attributes {stable_mosaic.version = 11 : i64} {
  func.func @_unit_kernel(%arg0: i32, %arg1: i32, %arg2: i32, %arg3: memref<24x384xf32, #tpu.memory_space<vmem>>, %arg4: memref<128x384xf32, #tpu.memory_space<vmem>>, %arg5: memref<128x384xf32, #tpu.memory_space<vmem>>, %arg6: memref<1x128xf32, #tpu.memory_space<vmem>>, %arg7: memref<24x128xf32, #tpu.memory_space<vmem>>, %arg8: memref<24x128xf32, #tpu.memory_space<vmem>>) attributes {dimension_semantics = [#tpu.dimension_semantics<parallel>, #tpu.dimension_semantics<parallel>, #tpu.dimension_semantics<arbitrary>], iteration_bounds = array<i64: 1, 1, 1>, scalar_prefetch = 0 : i64, scratch_operands = 1 : i64, tpu.core_type = #tpu.core_type<tc>, window_params = [{transform_indices = @transform_0, window_bounds = array<i64: 24, 384>}, {transform_indices = @transform_1, window_bounds = array<i64: 128, 384>}, {transform_indices = @transform_2, window_bounds = array<i64: 128, 384>}, {transform_indices = @transform_3, window_bounds = array<i64: 1, 128>}, {transform_indices = @transform_4, window_bounds = array<i64: 24, 128>}]} {
    %c0_i32 = arith.constant 0 : i32
    %0 = arith.cmpi eq, %arg2, %c0_i32 : i32
    %1 = arith.extui %0 : i1 to i32
    %c0_i32_0 = arith.constant 0 : i32
    %2 = arith.cmpi ne, %1, %c0_i32_0 : i32
    scf.if %2 {
      %cst = arith.constant 0.000000e+00 : f32
      %7 = vector.broadcast %cst : f32 to vector<24x128xf32>
      %c0 = arith.constant 0 : index
      %c0_5 = arith.constant 0 : index
      %8 = vector.load %arg8[%c0, %c0_5] : memref<24x128xf32, #tpu.memory_space<vmem>>, vector<24x128xf32>
      tpu.vector_store %arg8[%c0, %c0_5], %7 {strides = array<i32>} : memref<24x128xf32, #tpu.memory_space<vmem>>, vector<24x128xf32>,
    } else {
    }
    %c0_i32_1 = arith.constant 0 : i32
    %c3_i32 = arith.constant 3 : i32
    %3 = arith.addi %c0_i32_1, %c3_i32 : i32
    %c1_i32 = arith.constant 1 : i32
    scf.for %arg9 = %c0_i32_1 to %3 step %c1_i32  : i32 {
      %c8_i32 = arith.constant 8 : i32
      %7 = arith.muli %arg9, %c8_i32 : i32
      %8 = tpu.assume_multiple %7, 8 : i32
      %9 = arith.index_cast %8 : i32 to index
      %c0 = arith.constant 0 : index
      %10 = vector.load %arg3[%9, %c0] : memref<24x384xf32, #tpu.memory_space<vmem>>, vector<8x384xf32>
      %c0_5 = arith.constant 0 : index
      %c0_6 = arith.constant 0 : index
      %11 = vector.load %arg4[%c0_5, %c0_6] : memref<128x384xf32, #tpu.memory_space<vmem>>, vector<128x384xf32>
      %c0_7 = arith.constant 0 : index
      %c0_8 = arith.constant 0 : index
      %12 = vector.load %arg5[%c0_7, %c0_8] : memref<128x384xf32, #tpu.memory_space<vmem>>, vector<128x384xf32>
      %13 = vector.shape_cast %12 : vector<128x384xf32> to vector<1x128x384xf32>
      %14 = vector.shape_cast %10 : vector<8x384xf32> to vector<8x1x384xf32>
      %15 = vector.shape_cast %11 : vector<128x384xf32> to vector<1x128x384xf32>
      %16 = vector.broadcast %14 : vector<8x1x384xf32> to vector<8x128x384xf32>
      %17 = vector.broadcast %15 : vector<1x128x384xf32> to vector<8x128x384xf32>
      %18 = arith.subf %16, %17 : vector<8x128x384xf32>
      %19 = vector.broadcast %13 : vector<1x128x384xf32> to vector<8x128x384xf32>
      %20 = arith.mulf %19, %18 : vector<8x128x384xf32>
      %21 = arith.mulf %20, %20 : vector<8x128x384xf32>
      %cst = arith.constant dense<0xFF800000> : vector<8x128xf32>
      %22 = vector.multi_reduction <maximumf>, %21, %cst [2] : vector<8x128x384xf32> to vector<8x128xf32>
      %23 = arith.index_cast %8 : i32 to index
      %c0_9 = arith.constant 0 : index
      %24 = vector.load %arg8[%23, %c0_9] : memref<24x128xf32, #tpu.memory_space<vmem>>, vector<8x128xf32>
      %25 = arith.maximumf %24, %22 : vector<8x128xf32>
      %26 = arith.index_cast %8 : i32 to index
      %c0_10 = arith.constant 0 : index
      %27 = vector.load %arg8[%26, %c0_10] : memref<24x128xf32, #tpu.memory_space<vmem>>, vector<8x128xf32>
      tpu.vector_store %arg8[%26, %c0_10], %25 {strides = array<i32>} : memref<24x128xf32, #tpu.memory_space<vmem>>, vector<8x128xf32>,
    }
    %c3_i32_2 = arith.constant 3 : i32
    %c0_i32_3 = arith.constant 0 : i32
    %4 = arith.cmpi eq, %arg2, %c0_i32_3 : i32
    %5 = arith.extui %4 : i1 to i32
    %c0_i32_4 = arith.constant 0 : i32
    %6 = arith.cmpi ne, %5, %c0_i32_4 : i32
    scf.if %6 {
      %c0 = arith.constant 0 : index
      %c0_5 = arith.constant 0 : index
      %7 = vector.load %arg8[%c0, %c0_5] : memref<24x128xf32, #tpu.memory_space<vmem>>, vector<24x128xf32>
      %cst = arith.constant 0.000000e+00 : f32
      %8 = vector.broadcast %cst : f32 to vector<24x128xf32>
      %9 = arith.subf %8, %7 : vector<24x128xf32>
      %10 = math.exp %9 : vector<24x128xf32>
      %c0_6 = arith.constant 0 : index
      %c0_7 = arith.constant 0 : index
      %11 = vector.load %arg6[%c0_6, %c0_7] : memref<1x128xf32, #tpu.memory_space<vmem>>, vector<1x128xf32>
      %cst_8 = arith.constant 2.000000e+00 : f32
      %12 = vector.broadcast %cst_8 : f32 to vector<24x128xf32>
      %13 = arith.mulf %12, %10 : vector<24x128xf32>
      %cst_9 = arith.constant 1.000000e+00 : f32
      %14 = vector.broadcast %cst_9 : f32 to vector<24x128xf32>
      %15 = arith.subf %14, %13 : vector<24x128xf32>
      %16 = vector.broadcast %11 : vector<1x128xf32> to vector<24x128xf32>
      %17 = arith.mulf %16, %15 : vector<24x128xf32>
      %18 = arith.addf %10, %17 : vector<24x128xf32>
      %c0_10 = arith.constant 0 : index
      %c0_11 = arith.constant 0 : index
      %19 = vector.load %arg7[%c0_10, %c0_11] : memref<24x128xf32, #tpu.memory_space<vmem>>, vector<24x128xf32>
      tpu.vector_store %arg7[%c0_10, %c0_11], %18 {strides = array<i32>} : memref<24x128xf32, #tpu.memory_space<vmem>>, vector<24x128xf32>,
    } else {
    }
    return
  }
  func.func @transform_0(%arg0: i32, %arg1: i32, %arg2: i32) -> (i32, i32) {
    %c0_i32 = arith.constant 0 : i32
    return %arg0, %arg2 : i32, i32
  }
  func.func @transform_1(%arg0: i32, %arg1: i32, %arg2: i32) -> (i32, i32) {
    %c0_i32 = arith.constant 0 : i32
    return %arg1, %arg2 : i32, i32
  }
  func.func @transform_2(%arg0: i32, %arg1: i32, %arg2: i32) -> (i32, i32) {
    %c0_i32 = arith.constant 0 : i32
    return %arg1, %arg2 : i32, i32
  }
  func.func @transform_3(%arg0: i32, %arg1: i32, %arg2: i32) -> (i32, i32) {
    %c0_i32 = arith.constant 0 : i32
    %c0_i32_0 = arith.constant 0 : i32
    return %c0_i32, %arg1 : i32, i32
  }
  func.func @transform_4(%arg0: i32, %arg1: i32, %arg2: i32) -> (i32, i32) {
    %c0_i32 = arith.constant 0 : i32
    return %arg0, %arg1 : i32, i32
  }
}

</mosaic_0001>

<bundles_post_ra>
// kernel: tpu_custom_call.1
= control target key start
LH: loop header
LB: loop body
LE: loop exit
PB: predicated region body
PF: predicated region fallthrough
CT: control target
= control target key end

     0   :  { %9 = vsyncpa [#allocation4], 0  ;;  %s5798_s0 = inlined_call_operand.hbm [shape: f32[24,384], index: 0, kind: input, shape index: {}]   ;;  %s5799_s1 = inlined_call_operand.hbm [shape: f32[128,384], index: 1, kind: input, shape index: {}]   ;;  %s5800_s2 = inlined_call_operand.hbm [shape: f32[128,384], index: 2, kind: input, shape index: {}]   ;;  %s5801_s3 = inlined_call_operand.vmem [shape: f32[1,128], index: 3, kind: input, shape index: {}]   ;;  %s5802_s4 = inlined_call_operand.hbm [shape: f32[24,128], index: 4, kind: output, shape index: {}]  }
   0x1   :  { %10 = vsyncpa [#allocation7], 0 }
   0x2   :  { %11 = vsyncpa [#allocation5], 0  ;;  %s3220_s15 = smov [#allocation6]   ;;  %s3221_s17 = smov [#allocation3]  }
   0x3   :  { %s29_s16 = sshll.u32 %s3220_s15, 4  ;;  %s17_s18 = sshll.u32 %s3221_s17, 4  ;;  %s30_s16 = int_to_ptr.vmem [resolvable:$true] %s29_s16  ;;  %s18_s18 = int_to_ptr.vmem [resolvable:$true] %s17_s18 }
   0x4   :  { %s3134_s19 = scalar_lea.vmem %s30_s16, 6144  ;;  %p3139_p1 = scmp.lt.s32.totalorder %s30_s16, %s30_s16 }
   0x5   :  { %p3135_p0 = scmp.ne.s32.totalorder %s30_s16, %s3134_s19  ;;  %p3140_p2 = scmp.lt.s32.totalorder %s3134_s19, %s3134_s19 }
   0x7   :  { %p3141_p3 = por %p3140_p2, %p3139_p1 }
   0x9   :  { %p3142_p4 = pnand %p3141_p3, %p3135_p0 }
   0xb   :  { %3145 = shalt.err (!%p3142_p4)
}
   0xc   :  { %s3222_s20 = smov 384   ;;  %s3223_s21 = smov 24  }
   0xd   :  { %35 = dma.hbm_to_vmem [thread:$0]  %s5799_s1, 6144, %s30_s16, [#allocation7], %s3222_s20, %s3222_s20, %s3223_s21  }
   0xe   :  { %s3154_s24 = scalar_lea.vmem %s18_s18, 1152  ;;  %p3159_p6 = scmp.lt.s32.totalorder %s18_s18, %s18_s18 }
   0xf   :  { %p3155_p5 = scmp.ne.s32.totalorder %s18_s18, %s3154_s24  ;;  %p3160_p7 = scmp.lt.s32.totalorder %s3154_s24, %s3154_s24 }
  0x11   :  { %p3161_p8 = por %p3160_p7, %p3159_p6 }
  0x13   :  { %p3162_p9 = pnand %p3161_p8, %p3155_p5 }
  0x15   :  { %3165 = shalt.err (!%p3162_p9)
}
  0x16   :  { %23 = dma.hbm_to_vmem [thread:$0]  %s5798_s0, 1152, %s18_s18, [#allocation4], %s3222_s20, %s3222_s20, %s3223_s21  }
  0x17   :  { %s3224_s27 = smov [#allocation8]  }
  0x18   :  { %s41_s28 = sshll.u32 %s3224_s27, 4  ;;  %s42_s28 = int_to_ptr.vmem [resolvable:$true] %s41_s28 }
  0x19   :  { %s3174_s29 = scalar_lea.vmem %s42_s28, 6144  ;;  %p3179_p11 = scmp.lt.s32.totalorder %s42_s28, %s42_s28 }
  0x1a   :  { %p3175_p10 = scmp.ne.s32.totalorder %s42_s28, %s3174_s29  ;;  %p3180_p12 = scmp.lt.s32.totalorder %s3174_s29, %s3174_s29 }
  0x1c   :  { %p3181_p13 = por %p3180_p12, %p3179_p11 }
  0x1e   :  { %p3182_p0 = pnand %p3181_p13, %p3175_p10 }
  0x20   :  { %3185 = shalt.err (!%p3182_p0)
}
  0x21   :  { %47 = dma.hbm_to_vmem [thread:$0]  %s5800_s2, 6144, %s42_s28, [#allocation7], %s3222_s20, %s3222_s20, %s3223_s21  }
  0x22   :  { %3210 = dma.done.wait [#allocation4], 1152  }
  0x23   :  { %3211 = vsyncadd [#allocation4], 4294966144 }
  0x24   :  { %3212 = dma.done.wait [#allocation7], 12288  }
  0x25   :  { %3213 = vsyncadd [#allocation7], 4294955008  ;;  %v3225_v0 = vmov 0.0   ;;  %s3264_s0 = smov 0  }
  0x26   :  { %63 = vst [vmem:[#allocation2] sm:$0xff] %v3225_v0  ;;  %64 = vst [vmem:[#allocation2 + $0x8] sm:$0xff] %v3225_v0 }
  0x27   :  { %65 = vst [vmem:[#allocation2 + $0x10] sm:$0xff] %v3225_v0 }
  0x28 LB: > { %v5803_v1 = vlaneseq  ;;  %v3226_v2 = vmov 1966171168   ;;  %s2906_s2 = sshll.u32 %s3218_s0, 3  ;;  %v3296_v16 = vld [vmem:[#allocation6 + $0x30] sm:$0xff]  ;;  %v3298_v17 = vld [vmem:[#allocation6 + $0x38] sm:$0xff]  ;;  %v3300_v18 = vld [vmem:[#allocation6 + $0x40] sm:$0xff]  ;;  %s3218_s0 = sphi %s3264_s0, %s71_s0  }
  0x29   : > { %v184_v3 = vunpack.c.l.s4 %v3226_v2  ;;  %s73_s5 = sshra.s32 %s2906_s2, 3  ;;  %v3306_v21 = vld [vmem:[#allocation8 + $0x30] sm:$0xff]  ;;  %v3308_v22 = vld [vmem:[#allocation8 + $0x38] sm:$0xff]  ;;  %v3310_v23 = vld [vmem:[#allocation6] sm:$0xff]  ;;  %vm2172_vm0 = vcmask 130112   ;;  %vm2179_vm1 = vcmask 195712  }
  0x2a   : > { %v3271_v4 = vshrl.u32 %v5803_v1, 7  ;;  %s2909_s6 = smul.u32 24, %s73_s5  ;;  %v3312_v24 = vld [vmem:[#allocation6 + $0x8] sm:$0xff]  ;;  %v3325_v29 = vld [vmem:[#allocation6 + $0x10] sm:$0xff]  ;;  %v3331_v32 = vld [vmem:[#allocation8 + $0x40] sm:$0xff]  ;;  %vm2186_vm2 = vcmask 261312  }
  0x2b   : > { %v185_v5 = vunpack.c.0.s8 %v184_v3  ;;  %v3327_v30 = vld [vmem:[#allocation6 + $0x48] sm:$0xff]  ;;  %v3329_v31 = vld [vmem:[#allocation6 + $0x50] sm:$0xff]  ;;  %v3333_v33 = vld [vmem:[#allocation8] sm:$0xff]  ;;  %vm2193_vm3 = vcmask 326912   ;;  %vm2200_vm4 = vcmask 392512   ;;  %vm2207_vm5 = vcmask 458112  }
  0x2c   : > { %6010 = vst [vmem:[#allocation13_spill] sm:$0xff] %v3271_v4  ;;  %s3278_s7 = scalar_lea.vmem [#allocation3], %s2909_s6  ;;  %v3288_v11 = vsub.s32 0, %v3271_v4  ;;  %v3291_v13 = vsub.s32 1, %v3271_v4  ;;  %v3294_v14 = vsub.s32 2, %v3271_v4  ;;  %v3335_v34 = vld [vmem:[#allocation8 + $0x8] sm:$0xff] }
  0x2d   : > { %v3276_v6 = vsub.s32 %v185_v5, %v3271_v4  ;;  %v3281_v7 = vld [vmem:[%s3278_s7 + $0x10] sm:$0xff]  ;;  %v2928_v8 = vld [vmem:[%s3278_s7] ss:$8 sps:$4 sm:$0xff]   ;;  %v3361_v44 = vld [vmem:[#allocation6 + $0x58] sm:$0xff]  ;;  %vm2214_vm6 = vcmask 523712   ;;  %vm2221_vm7 = vcmask 589312  }
  0x2e   : > { %6012 = vst [vmem:[#allocation15_spill] sm:$0xff] %v3281_v7  ;;  %6013 = vst [vmem:[#allocation16_spill] sm:$0xff] %v3288_v11  ;;  %v3357_v42 = vld [vmem:[#allocation8 + $0x10] sm:$0xff]  ;;  %v3363_v45 = vld [vmem:[#allocation8 + $0x48] sm:$0xff]  ;;  %vm2228_vm8 = vcmask 654912   ;;  %vm2235_vm9 = vcmask 720512  }
  0x2f   : > { %6011 = vst [vmem:[#allocation14_spill] sm:$0xff] %v3276_v6  ;;  %v203_v9 = vrot.slane %v3281_v7, %v3276_v6  ;;  %v189_v10 = vrot.slane %v2928_v8, %v3276_v6  ;;  %6014 = vst [vmem:[#allocation17_spill] sm:$0xff] %v3291_v13  ;;  %v3377_v54 = vld [vmem:[#allocation8 + $0x50] sm:$0xff]  ;;  %v3379_v55 = vld [vmem:[#allocation8 + $0x58] sm:$0xff]  ;;  %vm6009_vm10 = vcmask 786112   ;;  %vm6008_vm11 = vcmask 851712  }
  0x30   : > { %6015 = vst [vmem:[#allocation18_spill] sm:$0xff] %v3294_v14  ;;  %v3386_v60 = vld [vmem:[#allocation6 + $0x18] sm:$0xff]  ;;  %v3388_v61 = vld [vmem:[#allocation6 + $0x20] sm:$0xff]  ;;  %v3390_v3 = vld [vmem:[#allocation6 + $0x28] sm:$0xff]  ;;  %vm2256_vm12 = vcmask 917312   ;;  %vm2263_vm13 = vcmask 982912  }
  0x31   : > { %v211_v12 = vcombine.low %v189_v10, %v203_v9  ;;  %v212_v15 = vcombine.high %v189_v10, %v203_v9  ;;  %v3432_v4 = vld [vmem:[#allocation6 + $0x70] sm:$0xff]  ;;  %v3439_v7 = vld [vmem:[#allocation8 + $0x68] sm:$0xff]  ;;  %vm2270_vm14 = vcmask 1048512   ;;  %vm2825_vm15 = vcmask 1041409   ;;  %s2031_s8 = scalar_lea.vmem [#allocation2], %s2906_s2  ;;  %s71_s0 = sadd.s32 1, %s3218_s0  }
  0x32   : > { %6020 = vst [vmem:[#allocation23_spill] sm:$0xff] %v3432_v4  ;;  %6023 = vst [vmem:[#allocation26_spill] sm:$0xff] %v3439_v7  ;;  %p68_p1 = scmp.ge.s32.totalorder %s71_s0, 3  }
  0x33   : > { %v221_v19 = vrot.slane %v211_v12, %v3276_v6  ;;  %v3304_v20 = vrot.slane %v212_v15, %v3276_v6  ;;  %v3394_v12 = vld [vmem:[#allocation8 + $0x18] sm:$0xff]  ;;  %v3396_v15 = vld [vmem:[#allocation8 + $0x20] sm:$0xff]  ;;  %s3227_s11 = smov (%p68_p1), [#allocation9]  }
  0x34   :  { %s2884_s12 = sshll.u32 (%p68_p1), %s3227_s11, 4  ;;  %s2885_s12 = int_to_ptr.vmem [resolvable:$true] %s2884_s12 }
  0x35   : > { %6016 = vst [vmem:[#allocation19_spill] sm:$0xff] %v3304_v20  ;;  %v3317_v26 = vrot.slane %v221_v19, %v3288_v11  ;;  %v3320_v27 = vrot.slane %v221_v19, %v3291_v13  ;;  %v3323_v28 = vrot.slane %v221_v19, %v3294_v14  ;;  %v3339_v35 = vrot.slane %v3304_v20, %v3288_v11  ;;  %s3186_s13 = scalar_lea.vmem (%p68_p1), %s2885_s12, 384  ;;  %p3191_p3 = scmp.lt.s32.totalorder (%p68_p1), %s2885_s12, %s2885_s12 }
  0x36   : > { %v3343_v36 = vrot.slane %v3304_v20, %v3291_v13  ;;  %v3347_v37 = vrot.slane %v3304_v20, %v3294_v14  ;;  %v3349_v38 = vcombine.high %v221_v19, %v221_v19  ;;  %v3398_v19 = vld [vmem:[#allocation6 + $0x78] sm:$0xff]  ;;  %v3446_v20 = vld [vmem:[#allocation8 + $0x70] sm:$0xff]  ;;  %v3455_v14 = vld [vmem:[#allocation8 + $0xa8] sm:$0xff]  ;;  %p3187_p2 = scmp.ne.s32.totalorder (%p68_p1), %s2885_s12, %s3186_s13  ;;  %p3192_p4 = scmp.lt.s32.totalorder (%p68_p1), %s3186_s13, %s3186_s13 }
  0x37   : > { %v373_v39 = vsub.f32 %v3317_v26, %v3296_v16  ;;  %v374_v40 = vsub.f32 %v3320_v27, %v3298_v17  ;;  %v375_v41 = vsub.f32 %v3323_v28, %v3300_v18  ;;  %v367_v43 = vsub.f32 %v3317_v26, %v3310_v23  ;;  %6025 = vst [vmem:[#allocation28_spill] sm:$0xff] %v3446_v20  ;;  %v3457_v13 = vld [vmem:[#allocation8 + $0xb0] sm:$0xff] }
  0x38   : > { %6017 = vst [vmem:[#allocation20_spill] sm:$0xff] %v3349_v38  ;;  %v368_v46 = vsub.f32 %v3320_v27, %v3312_v24  ;;  %v369_v47 = vsub.f32 %v3323_v28, %v3325_v29  ;;  %v376_v48 = vsub.f32 %v3317_v26, %v3327_v30  ;;  %v377_v49 = vsub.f32 %v3320_v27, %v3329_v31  ;;  %p3193_p5 = por (%p68_p1), %p3192_p4, %p3191_p3 }
  0x39   : > { %v757_v50 = vmul.f32 %v373_v39, %v3306_v21  ;;  %v758_v51 = vmul.f32 %v374_v40, %v3308_v22  ;;  %v759_v52 = vmul.f32 %v375_v41, %v3331_v32  ;;  %v751_v53 = vmul.f32 %v367_v43, %v3333_v33  ;;  %v3400_v41 = vld [vmem:[#allocation8 + $0x28] sm:$0xff]  ;;  %6027 = vst [vmem:[#allocation30_spill] sm:$0xff] %v3455_v14 }
  0x3a   : > { %v752_v56 = vmul.f32 %v368_v46, %v3335_v34  ;;  %v753_v57 = vmul.f32 %v369_v47, %v3357_v42  ;;  %v378_v58 = vsub.f32 %v3323_v28, %v3361_v44  ;;  %v760_v59 = vmul.f32 %v376_v48, %v3363_v45  ;;  %v3406_v47 = vld [vmem:[#allocation6 + $0x80] sm:$0xff]  ;;  %6028 = vst [vmem:[#allocation31_spill] sm:$0xff] %v3457_v13  ;;  %p3194_p6 = pnand (%p68_p1), %p3193_p5, %p3187_p2 }
  0x3b   : > { %v1141_v62 = vmul.f32 %v757_v50, %v757_v50  ;;  %v1142_v63 = vmul.f32 %v758_v51, %v758_v51  ;;  %v1143_v0 = vmul.f32 %v759_v52, %v759_v52  ;;  %v1135_v2 = vmul.f32 %v751_v53, %v751_v53  ;;  %v3410_v52 = vld [vmem:[#allocation6 + $0x88] sm:$0xff]  ;;  %v3412_v53 = vld [vmem:[#allocation8 + $0x78] sm:$0xff] }
  0x3c   : > { %v1136_v5 = vmul.f32 %v752_v56, %v752_v56  ;;  %v1137_v8 = vmul.f32 %v753_v57, %v753_v57  ;;  %v761_v9 = vmul.f32 %v377_v49, %v3377_v54  ;;  %v762_v10 = vmul.f32 %v378_v58, %v3379_v55 }
  0x3d   : > { %v1527_v39 = vmax.f32 %v1141_v62, %v1142_v63  ;;  %v1144_v40 = vmul.f32 %v760_v59, %v760_v59  ;;  %v370_v43 = vsub.f32 %v3317_v26, %v3386_v60  ;;  %v371_v46 = vsub.f32 %v3320_v27, %v3388_v61  ;;  %v3416_v59 = vld [vmem:[#allocation8 + $0x80] sm:$0xff] }
  0x3e   : > { %v1519_v48 = vmax.f32 %v1135_v2, %v1136_v5  ;;  %v1145_v49 = vmul.f32 %v761_v9, %v761_v9  ;;  %v1146_v50 = vmul.f32 %v762_v10, %v762_v10  ;;  %v372_v51 = vsub.f32 %v3323_v28, %v3390_v3  ;;  %v3420_v63 = vld [vmem:[#allocation6 + $0x60] sm:$0xff]  ;;  %v3423_v10 = vld [vmem:[#allocation8 + $0x88] sm:$0xff] }
  0x3f   : > { %v1528_v56 = vmax.f32 %v1527_v39, %v1143_v0  ;;  %v754_v57 = vmul.f32 %v370_v43, %v3394_v12  ;;  %v755_v58 = vmul.f32 %v371_v46, %v3396_v15  ;;  %v382_v62 = vsub.f32 %v3317_v26, %v3398_v19  ;;  %6018 = vst [vmem:[#allocation21_spill] sm:$0xff] %v3423_v10  ;;  %v3427_v39 = vld [vmem:[#allocation6 + $0x68] sm:$0xff] }
  0x40   : > { %v1520_v2 = vmax.f32 %v1519_v48, %v1137_v8  ;;  %v1531_v5 = vmax.f32 %v1144_v40, %v1145_v49  ;;  %v756_v9 = vmul.f32 %v372_v51, %v3400_v41  ;;  %v383_v0 = vsub.f32 %v3320_v27, %v3406_v47  ;;  %6019 = vst [vmem:[#allocation22_spill] sm:$0xff] %v3427_v39  ;;  %v3434_v8 = vld [vmem:[#allocation8 + $0x60] sm:$0xff]  ;;  %v3436_v40 = vld [vmem:[#allocation6 + $0xa8] sm:$0xff] }
  0x41   : > { %1529 = vmax.xlane.f32.xlu1 %v1528_v56  ;;  %v1138_v43 = vmul.f32 %v754_v57, %v754_v57  ;;  %v1139_v46 = vmul.f32 %v755_v58, %v755_v58  ;;  %v384_v1 = vsub.f32 %v3323_v28, %v3410_v52  ;;  %v766_v25 = vmul.f32 %v382_v62, %v3412_v53  ;;  %v3443_v57 = vld [vmem:[#allocation6 + $0xb0] sm:$0xff] }
  0x42   : > { %6021 = vst [vmem:[#allocation24_spill] sm:$0xff] %v3434_v8  ;;  %6022 = vst [vmem:[#allocation25_spill] sm:$0xff] %v3436_v40  ;;  %1521 = vmax.xlane.f32.xlu0 %v1520_v2  ;;  %v1532_v48 = vmax.f32 %v1531_v5, %v1146_v50  ;;  %v1140_v49 = vmul.f32 %v756_v9, %v756_v9  ;;  %v767_v51 = vmul.f32 %v383_v0, %v3416_v59  ;;  %v3450_v50 = vld [vmem:[#allocation6 + $0xb8] sm:$0xff] }
  0x43   : > { %v379_v56 = vsub.f32 %v3317_v26, %v3420_v63  ;;  %6024 = vst [vmem:[#allocation27_spill] sm:$0xff] %v3443_v57  ;;  %v1523_v58 = vmax.f32 %v1138_v43, %v1139_v46  ;;  %v768_v62 = vmul.f32 %v384_v1, %v3423_v10  ;;  %v1150_v6 = vmul.f32 %v766_v25, %v766_v25  ;;  %v3461_v25 = vld [vmem:[#allocation6 + $0x90] sm:$0xff]  ;;  %v3473_v10 = vld [vmem:[#allocation6 + $0xa0] sm:$0xff] }
  0x44   : > { %v380_v2 = vsub.f32 %v3320_v27, %v3427_v39  ;;  %6026 = vst [vmem:[#allocation29_spill] sm:$0xff] %v3450_v50  ;;  %v1151_v5 = vmul.f32 %v767_v51, %v767_v51  ;;  %v381_v9 = vsub.f32 %v3323_v28, %v3432_v4  ;;  %v388_v1 = vsub.f32 %v3317_v26, %v3436_v40  ;;  %v3464_v51 = vld [vmem:[#allocation8 + $0xb8] sm:$0xff] }
  0x45   : > { %v763_v0 = vmul.f32 %v379_v56, %v3434_v8  ;;  %6029 = vst [vmem:[#allocation32_spill] sm:$0xff] %v3461_v25  ;;  %1533 = vmax.xlane.f32.xlu1 %v1532_v48  ;;  %v1524_v43 = vmax.f32 %v1523_v58, %v1140_v49  ;;  %v1152_v46 = vmul.f32 %v768_v62, %v768_v62  ;;  %6030 = vst [vmem:[#allocation33_spill] sm:$0xff] %v3464_v51  ;;  %v3468_v56 = vld [vmem:[#allocation6 + $0x98] sm:$0xff]  ;;  %v3477_v62 = vld [vmem:[#allocation8 + $0x90] sm:$0xff] }
  0x46   : > { %v764_v38 = vmul.f32 %v380_v2, %v3439_v7  ;;  %v389_v11 = vsub.f32 %v3320_v27, %v3443_v57  ;;  %6031 = vst [vmem:[#allocation34_spill] sm:$0xff] %v3468_v56  ;;  %v1539_v8 = vmax.f32 %v1150_v6, %v1151_v5  ;;  %v765_v4 = vmul.f32 %v381_v9, %v3446_v20  ;;  %v3479_v2 = vld [vmem:[#allocation8 + $0x98] sm:$0xff]  ;;  %v3486_v20 = vld [vmem:[#allocation8 + $0xa0] sm:$0xff] }
  0x47   : > { %v1147_v39 = vmul.f32 %v763_v0, %v763_v0  ;;  %v390_v40 = vsub.f32 %v3323_v28, %v3450_v50  ;;  %6032 = vst [vmem:[#allocation35_spill] sm:$0xff] %v3473_v10  ;;  %1525 = vmax.xlane.f32.xlu0 %v1524_v43  ;;  %v772_v49 = vmul.f32 %v388_v1, %v3455_v14  ;;  %6033 = vst [vmem:[#allocation36_spill] sm:$0xff] %v3477_v62  ;;  %v3483_v5 = vld [vmem:[#allocation6 + $0xd8] sm:$0xff]  ;;  %v3490_v1 = vld [vmem:[#allocation6 + $0xe0] sm:$0xff] }
  0x48   : > { %v1148_v48 = vmul.f32 %v764_v38, %v764_v38  ;;  %v773_v58 = vmul.f32 %v389_v11, %v3457_v13  ;;  %6034 = vst [vmem:[#allocation37_spill] sm:$0xff] %v3479_v2  ;;  %v385_v6 = vsub.f32 %v3317_v26, %v3461_v25  ;;  %6035 = vst [vmem:[#allocation38_spill] sm:$0xff] %v3483_v5  ;;  %v3494_v25 = vld [vmem:[#allocation6 + $0xe8] sm:$0xff]  ;;  %v3496_v57 = vld [vmem:[#allocation8 + $0xd8] sm:$0xff] }
  0x49   : > { %v1540_v9 = vmax.f32 %v1539_v8, %v1152_v46  ;;  %v1149_v0 = vmul.f32 %v765_v4, %v765_v4  ;;  %v774_v50 = vmul.f32 %v390_v40, %v3464_v51  ;;  %6036 = vst [vmem:[#allocation39_spill] sm:$0xff] %v3486_v20  ;;  %v386_v38 = vsub.f32 %v3320_v27, %v3468_v56  ;;  %v3500_v46 = vld [vmem:[#allocation8 + $0xe0] sm:$0xff]  ;;  %v3507_v56 = vld [vmem:[#allocation8 + $0xe8] sm:$0xff] }
  0x4a   : > { %6037 = vst [vmem:[#allocation40_spill] sm:$0xff] %v3490_v1  ;;  %v1535_v11 = vmax.f32 %v1147_v39, %v1148_v48  ;;  %v1156_v43 = vmul.f32 %v772_v49, %v772_v49  ;;  %v1157_v13 = vmul.f32 %v773_v58, %v773_v58  ;;  %v387_v14 = vsub.f32 %v3323_v28, %v3473_v10  ;;  %v3504_v48 = vld [vmem:[#allocation6 + $0xc0] sm:$0xff] }
  0x4b   : > { %6038 = vst [vmem:[#allocation41_spill] sm:$0xff] %v3494_v25  ;;  %6039 = vst [vmem:[#allocation42_spill] sm:$0xff] %v3496_v57  ;;  %1541 = vmax.xlane.f32.xlu1 %v1540_v9  ;;  %v1158_v4 = vmul.f32 %v774_v50, %v774_v50  ;;  %v769_v8 = vmul.f32 %v385_v6, %v3477_v62  ;;  %v770_v40 = vmul.f32 %v386_v38, %v3479_v2  ;;  %v3511_v9 = vld [vmem:[#allocation6 + $0xc8] sm:$0xff]  ;;  %v3516_v62 = vld [vmem:[#allocation6 + $0xd0] sm:$0xff] }
  0x4c   : > { %6040 = vst [vmem:[#allocation43_spill] sm:$0xff] %v3500_v46  ;;  %v394_v39 = vsub.f32 %v3317_v26, %v3483_v5  ;;  %6041 = vst [vmem:[#allocation44_spill] sm:$0xff] %v3504_v48  ;;  %v1536_v49 = vmax.f32 %v1535_v11, %v1149_v0  ;;  %v1547_v58 = vmax.f32 %v1156_v43, %v1157_v13  ;;  %v3518_v0 = vld [vmem:[#allocation8 + $0xc0] sm:$0xff]  ;;  %v3520_v13 = vld [vmem:[#allocation6 + $0x108] sm:$0xff] }
  0x4d   : > { %v771_v10 = vmul.f32 %v387_v14, %v3486_v20  ;;  %6042 = vst [vmem:[#allocation45_spill] sm:$0xff] %v3507_v56  ;;  %v395_v50 = vsub.f32 %v3320_v27, %v3490_v1  ;;  %6043 = vst [vmem:[#allocation46_spill] sm:$0xff] %v3511_v9  ;;  %v1153_v6 = vmul.f32 %v769_v8, %v769_v8  ;;  %v3523_v1 = vld [vmem:[#allocation8 + $0xc8] sm:$0xff]  ;;  %v3530_v20 = vld [vmem:[#allocation8 + $0xd0] sm:$0xff] }
  0x4e   : > { %v1154_v38 = vmul.f32 %v770_v40, %v770_v40  ;;  %v396_v2 = vsub.f32 %v3323_v28, %v3494_v25  ;;  %v778_v5 = vmul.f32 %v394_v39, %v3496_v57  ;;  %6044 = vst [vmem:[#allocation47_spill] sm:$0xff] %v3516_v62  ;;  %6045 = vst [vmem:[#allocation48_spill] sm:$0xff] %v3518_v0  ;;  %1537 = vmax.xlane.f32.xlu0 %v1536_v49  ;;  %v3527_v40 = vld [vmem:[#allocation6 + $0x110] sm:$0xff]  ;;  %v3557_v51 = vld [vmem:[#allocation6 + $0x100] sm:$0xff] }
  0x4f   : > { %6046 = vst [vmem:[#allocation49_spill] sm:$0xff] %v3520_v13  ;;  %v1548_v14 = vmax.f32 %v1547_v58, %v1158_v4  ;;  %v1155_v11 = vmul.f32 %v771_v10, %v771_v10  ;;  %v779_v43 = vmul.f32 %v395_v50, %v3500_v46  ;;  %6047 = vst [vmem:[#allocation50_spill] sm:$0xff] %v3523_v1  ;;  %v3534_v4 = vld [vmem:[#allocation6 + $0x118] sm:$0xff] }
  0x50   : > { %v391_v8 = vsub.f32 %v3317_v26, %v3504_v48  ;;  %6048 = vst [vmem:[#allocation51_spill] sm:$0xff] %v3527_v40  ;;  %v1543_v25 = vmax.f32 %v1153_v6, %v1154_v38  ;;  %v780_v39 = vmul.f32 %v396_v2, %v3507_v56  ;;  %v1162_v57 = vmul.f32 %v778_v5, %v778_v5  ;;  %v3539_v48 = vld [vmem:[#allocation8 + $0x108] sm:$0xff]  ;;  %v3541_v6 = vld [vmem:[#allocation8 + $0x110] sm:$0xff] }
  0x51   : > { %6049 = vst [vmem:[#allocation52_spill] sm:$0xff] %v3530_v20  ;;  %v392_v49 = vsub.f32 %v3320_v27, %v3511_v9  ;;  %6050 = vst [vmem:[#allocation53_spill] sm:$0xff] %v3534_v4  ;;  %1549 = vmax.xlane.f32.xlu1 %v1548_v14  ;;  %v1163_v10 = vmul.f32 %v779_v43, %v779_v43  ;;  %v393_v58 = vsub.f32 %v3323_v28, %v3516_v62  ;;  %v3545_v5 = vld [vmem:[#allocation6 + $0xf0] sm:$0xff]  ;;  %v3548_v14 = vld [vmem:[#allocation8 + $0x118] sm:$0xff] }
  0x52   : > { %v775_v50 = vmul.f32 %v391_v8, %v3518_v0  ;;  %6051 = vst [vmem:[#allocation54_spill] sm:$0xff] %v3539_v48  ;;  %6052 = vst [vmem:[#allocation55_spill] sm:$0xff] %v3541_v6  ;;  %v400_v2 = vsub.f32 %v3317_v26, %v3520_v13  ;;  %v1544_v38 = vmax.f32 %v1543_v25, %v1155_v11  ;;  %v3552_v62 = vld [vmem:[#allocation6 + $0xf8] sm:$0xff] }
  0x53   : > { %6053 = vst [vmem:[#allocation56_spill] sm:$0xff] %v3545_v5  ;;  %v1164_v9 = vmul.f32 %v780_v39, %v780_v39  ;;  %v776_v56 = vmul.f32 %v392_v49, %v3523_v1  ;;  %6054 = vst [vmem:[#allocation57_spill] sm:$0xff] %v3548_v14  ;;  %v401_v43 = vsub.f32 %v3320_v27, %v3527_v40  ;;  %v3561_v49 = vld [vmem:[#allocation8 + $0xf0] sm:$0xff]  ;;  %v3563_v40 = vld [vmem:[#allocation8 + $0xf8] sm:$0xff] }
  0x54   : > { %6055 = vst [vmem:[#allocation58_spill] sm:$0xff] %v3552_v62  ;;  %v1555_v8 = vmax.f32 %v1162_v57, %v1163_v10  ;;  %v777_v0 = vmul.f32 %v393_v58, %v3530_v20  ;;  %v1159_v46 = vmul.f32 %v775_v50, %v775_v50  ;;  %v402_v13 = vsub.f32 %v3323_v28, %v3534_v4  ;;  %v3567_v10 = vld [vmem:[#allocation6 + $0x138] sm:$0xff]  ;;  %v3570_v20 = vld [vmem:[#allocation8 + $0x100] sm:$0xff] }
  0x55   : > { %6056 = vst [vmem:[#allocation59_spill] sm:$0xff] %v3557_v51  ;;  %1545 = vmax.xlane.f32.xlu0 %v1544_v38  ;;  %v1160_v25 = vmul.f32 %v776_v56, %v776_v56  ;;  %v784_v11 = vmul.f32 %v400_v2, %v3539_v48  ;;  %v785_v39 = vmul.f32 %v401_v43, %v3541_v6  ;;  %6057 = vst [vmem:[#allocation60_spill] sm:$0xff] %v3561_v49  ;;  %v3574_v2 = vld [vmem:[#allocation6 + $0x140] sm:$0xff]  ;;  %v3580_v1 = vld [vmem:[#allocation8 + $0x138] sm:$0xff] }
  0x56   : > { %6058 = vst [vmem:[#allocation61_spill] sm:$0xff] %v3563_v40  ;;  %v397_v57 = vsub.f32 %v3317_v26, %v3545_v5  ;;  %6059 = vst [vmem:[#allocation62_spill] sm:$0xff] %v3567_v10  ;;  %v1556_v58 = vmax.f32 %v1555_v8, %v1164_v9  ;;  %v1161_v50 = vmul.f32 %v777_v0, %v777_v0  ;;  %v3578_v5 = vld [vmem:[#allocation6 + $0x148] sm:$0xff]  ;;  %v3584_v8 = vld [vmem:[#allocation8 + $0x140] sm:$0xff] }
  0x57   : > { %v786_v4 = vmul.f32 %v402_v13, %v3548_v14  ;;  %6060 = vst [vmem:[#allocation63_spill] sm:$0xff] %v3570_v20  ;;  %v398_v56 = vsub.f32 %v3320_v27, %v3552_v62  ;;  %6061 = vst [vmem:[#allocation64_spill] sm:$0xff] %v3574_v2  ;;  %v1551_v38 = vmax.f32 %v1159_v46, %v1160_v25  ;;  %v3588_v25 = vld [vmem:[#allocation6 + $0x120] sm:$0xff]  ;;  %v3591_v62 = vld [vmem:[#allocation8 + $0x148] sm:$0xff] }
  0x58   : > { %v1168_v43 = vmul.f32 %v784_v11, %v784_v11  ;;  %v1169_v6 = vmul.f32 %v785_v39, %v785_v39  ;;  %v399_v48 = vsub.f32 %v3323_v28, %v3557_v51  ;;  %6062 = vst [vmem:[#allocation65_spill] sm:$0xff] %v3578_v5  ;;  %6063 = vst [vmem:[#allocation66_spill] sm:$0xff] %v3580_v1  ;;  %1557 = vmax.xlane.f32.xlu1 %v1556_v58  ;;  %v3595_v58 = vld [vmem:[#allocation6 + $0x128] sm:$0xff]  ;;  %v3641_v14 = vld [vmem:[#allocation6 + $0x160] sm:$0xff] }
  0x59   : > { %v1170_v9 = vmul.f32 %v786_v4, %v786_v4  ;;  %v781_v0 = vmul.f32 %v397_v57, %v3561_v49  ;;  %v782_v13 = vmul.f32 %v398_v56, %v3563_v40  ;;  %6064 = vst [vmem:[#allocation67_spill] sm:$0xff] %v3584_v8  ;;  %v406_v46 = vsub.f32 %v3317_v26, %v3567_v10  ;;  %v3600_v49 = vld [vmem:[#allocation6 + $0x130] sm:$0xff] }
  0x5a   : > { %6065 = vst [vmem:[#allocation68_spill] sm:$0xff] %v3588_v25  ;;  %v1552_v11 = vmax.f32 %v1551_v38, %v1161_v50  ;;  %v1563_v39 = vmax.f32 %v1168_v43, %v1169_v6  ;;  %v783_v51 = vmul.f32 %v399_v48, %v3570_v20  ;;  %6066 = vst [vmem:[#allocation69_spill] sm:$0xff] %v3591_v62  ;;  %v3602_v50 = vld [vmem:[#allocation8 + $0x120] sm:$0xff]  ;;  %v3604_v6 = vld [vmem:[#allocation6 + $0x168] sm:$0xff] }
  0x5b   : > { %v407_v4 = vsub.f32 %v3320_v27, %v3574_v2  ;;  %6067 = vst [vmem:[#allocation70_spill] sm:$0xff] %v3595_v58  ;;  %v1165_v57 = vmul.f32 %v781_v0, %v781_v0  ;;  %v1166_v56 = vmul.f32 %v782_v13, %v782_v13  ;;  %v408_v40 = vsub.f32 %v3323_v28, %v3578_v5  ;;  %v3607_v2 = vld [vmem:[#allocation8 + $0x128] sm:$0xff]  ;;  %v3611_v13 = vld [vmem:[#allocation6 + $0x170] sm:$0xff] }
  0x5c   : > { %v790_v10 = vmul.f32 %v406_v46, %v3580_v1  ;;  %6068 = vst [vmem:[#allocation71_spill] sm:$0xff] %v3600_v49  ;;  %6069 = vst [vmem:[#allocation72_spill] sm:$0xff] %v3602_v50  ;;  %1553 = vmax.xlane.f32.xlu0 %v1552_v11  ;;  %v1564_v48 = vmax.f32 %v1563_v39, %v1170_v9  ;;  %v1167_v38 = vmul.f32 %v783_v51, %v783_v51  ;;  %v3614_v20 = vld [vmem:[#allocation8 + $0x130] sm:$0xff]  ;;  %v3618_v9 = vld [vmem:[#allocation6 + $0x178] sm:$0xff] }
  0x5d   : > { %6070 = vst [vmem:[#allocation73_spill] sm:$0xff] %v3604_v6  ;;  %v791_v43 = vmul.f32 %v407_v4, %v3584_v8  ;;  %v403_v0 = vsub.f32 %v3317_v26, %v3588_v25  ;;  %6071 = vst [vmem:[#allocation74_spill] sm:$0xff] %v3611_v13  ;;  %v1559_v5 = vmax.f32 %v1165_v57, %v1166_v56  ;;  %v3623_v25 = vld [vmem:[#allocation8 + $0x168] sm:$0xff]  ;;  %v3625_v57 = vld [vmem:[#allocation8 + $0x170] sm:$0xff] }
  0x5e   : > { %v792_v46 = vmul.f32 %v408_v40, %v3591_v62  ;;  %v1174_v1 = vmul.f32 %v790_v10, %v790_v10  ;;  %6072 = vst [vmem:[#allocation75_spill] sm:$0xff] %v3614_v20  ;;  %v404_v11 = vsub.f32 %v3320_v27, %v3595_v58  ;;  %6073 = vst [vmem:[#allocation76_spill] sm:$0xff] %v3618_v9  ;;  %1565 = vmax.xlane.f32.xlu1 %v1564_v48  ;;  %v3629_v10 = vld [vmem:[#allocation6 + $0x150] sm:$0xff]  ;;  %v3632_v48 = vld [vmem:[#allocation8 + $0x178] sm:$0xff] }
  0x5f   : > { %v1175_v51 = vmul.f32 %v791_v43, %v791_v43  ;;  %v405_v39 = vsub.f32 %v3323_v28, %v3600_v49  ;;  %v787_v4 = vmul.f32 %v403_v0, %v3602_v50  ;;  %6074 = vst [vmem:[#allocation77_spill] sm:$0xff] %v3623_v25  ;;  %6075 = vst [vmem:[#allocation78_spill] sm:$0xff] %v3625_v57  ;;  %v3636_v49 = vld [vmem:[#allocation6 + $0x158] sm:$0xff] }
  0x60   : > { %v412_v40 = vsub.f32 %v3317_v26, %v3604_v6  ;;  %v1560_v56 = vmax.f32 %v1559_v5, %v1167_v38  ;;  %v1176_v58 = vmul.f32 %v792_v46, %v792_v46  ;;  %v788_v62 = vmul.f32 %v404_v11, %v3607_v2  ;;  %v3645_v11 = vld [vmem:[#allocation8 + $0x150] sm:$0xff] }
  0x61   : > { %v413_v43 = vsub.f32 %v3320_v27, %v3611_v13  ;;  %v1571_v0 = vmax.f32 %v1174_v1, %v1175_v51  ;;  %v789_v50 = vmul.f32 %v405_v39, %v3614_v20  ;;  %v1171_v8 = vmul.f32 %v787_v4, %v787_v4  ;;  %v3647_v13 = vld [vmem:[#allocation8 + $0x158] sm:$0xff] }
  0x62   : > { %v414_v6 = vsub.f32 %v3323_v28, %v3618_v9  ;;  %1561 = vmax.xlane.f32.xlu0 %v1560_v56  ;;  %v1172_v5 = vmul.f32 %v788_v62, %v788_v62  ;;  %v796_v38 = vmul.f32 %v412_v40, %v3623_v25  ;;  %v409_v1 = vsub.f32 %v3317_v26, %v3629_v10  ;;  %v3652_v9 = vld [vmem:[#allocation8 + $0x160] sm:$0xff] }
  0x63   : > { %v797_v46 = vmul.f32 %v413_v43, %v3625_v57  ;;  %v1572_v51 = vmax.f32 %v1571_v0, %v1176_v58  ;;  %v1173_v39 = vmul.f32 %v789_v50, %v789_v50  ;;  %v410_v62 = vsub.f32 %v3320_v27, %v3636_v49 }
  0x64   : > { %v798_v4 = vmul.f32 %v414_v6, %v3632_v48  ;;  %v1567_v56 = vmax.f32 %v1171_v8, %v1172_v5  ;;  %v1180_v40 = vmul.f32 %v796_v38, %v796_v38  ;;  %v411_v43 = vsub.f32 %v3323_v28, %v3641_v14 }
  0x65   : > { %v1181_v25 = vmul.f32 %v797_v46, %v797_v46  ;;  %1573 = vmax.xlane.f32.xlu1 %v1572_v51  ;;  %v793_v20 = vmul.f32 %v409_v1, %v3645_v11  ;;  %v794_v26 = vmul.f32 %v410_v62, %v3647_v13  ;;  %v418_v58 = vsub.f32 %v3339_v35, %v3386_v60 }
  0x66   : > { %v1182_v57 = vmul.f32 %v798_v4, %v798_v4  ;;  %v1568_v50 = vmax.f32 %v1567_v56, %v1173_v39  ;;  %v795_v0 = vmul.f32 %v411_v43, %v3652_v9  ;;  %v419_v27 = vsub.f32 %v3343_v36, %v3388_v61 }
  0x67   : > { %v1579_v6 = vmax.f32 %v1180_v40, %v1181_v25  ;;  %v1177_v8 = vmul.f32 %v793_v20, %v793_v20  ;;  %v1178_v5 = vmul.f32 %v794_v26, %v794_v26  ;;  %v420_v28 = vsub.f32 %v3347_v37, %v3390_v3 }
  0x68   : > { %v802_v38 = vmul.f32 %v418_v58, %v3394_v12  ;;  %1569 = vmax.xlane.f32.xlu0 %v1568_v50  ;;  %v1179_v1 = vmul.f32 %v795_v0, %v795_v0  ;;  %v803_v51 = vmul.f32 %v419_v27, %v3396_v15  ;;  %v415_v25 = vsub.f32 %v3339_v35, %v3310_v23 }
  0x69   : > { %v1580_v46 = vmax.f32 %v1579_v6, %v1182_v57  ;;  %v1575_v39 = vmax.f32 %v1177_v8, %v1178_v5  ;;  %v804_v4 = vmul.f32 %v420_v28, %v3400_v41  ;;  %v416_v20 = vsub.f32 %v3343_v36, %v3312_v24 }
  0x6a   : > { %v1186_v62 = vmul.f32 %v802_v38, %v802_v38  ;;  %v1187_v56 = vmul.f32 %v803_v51, %v803_v51  ;;  %v417_v40 = vsub.f32 %v3347_v37, %v3325_v29  ;;  %v799_v57 = vmul.f32 %v415_v25, %v3333_v33 }
  0x6b   : > { %1581 = vmax.xlane.f32.xlu1 %v1580_v46  ;;  %v424_v43 = vsub.f32 %v3339_v35, %v3327_v30  ;;  %v1576_v26 = vmax.f32 %v1575_v39, %v1179_v1  ;;  %v1188_v58 = vmul.f32 %v804_v4, %v804_v4  ;;  %v800_v50 = vmul.f32 %v416_v20, %v3335_v34 }
  0x6c   : > { %v425_v6 = vsub.f32 %v3343_v36, %v3329_v31  ;;  %v1587_v0 = vmax.f32 %v1186_v62, %v1187_v56  ;;  %v801_v27 = vmul.f32 %v417_v40, %v3357_v42  ;;  %v1183_v8 = vmul.f32 %v799_v57, %v799_v57 }
  0x6d   : > { %v426_v5 = vsub.f32 %v3347_v37, %v3361_v44  ;;  %1577 = vmax.xlane.f32.xlu0 %v1576_v26  ;;  %v1184_v28 = vmul.f32 %v800_v50, %v800_v50  ;;  %v808_v38 = vmul.f32 %v424_v43, %v3363_v45  ;;  %v421_v1 = vsub.f32 %v3339_v35, %v3296_v16 }
  0x6e   : > { %v809_v46 = vmul.f32 %v425_v6, %v3377_v54  ;;  %v1588_v51 = vmax.f32 %v1587_v0, %v1188_v58  ;;  %v1185_v25 = vmul.f32 %v801_v27, %v801_v27  ;;  %v422_v4 = vsub.f32 %v3343_v36, %v3298_v17 }
  0x6f   : > { %v810_v39 = vmul.f32 %v426_v5, %v3379_v55  ;;  %v1583_v62 = vmax.f32 %v1183_v8, %v1184_v28  ;;  %v1192_v20 = vmul.f32 %v808_v38, %v808_v38  ;;  %v423_v40 = vsub.f32 %v3347_v37, %v3300_v18 }
  0x70   : > { %v1193_v56 = vmul.f32 %v809_v46, %v809_v46  ;;  %1589 = vmax.xlane.f32.xlu1 %v1588_v51  ;;  %v805_v43 = vmul.f32 %v421_v1, %v3306_v21  ;;  %v806_v26 = vmul.f32 %v422_v4, %v3308_v22  ;;  %v430_v16 = vsub.f32 %v3339_v35, %v3398_v19  ;;  %v6077_v51 = vld [vmem:[#allocation22_spill] sm:$0xff]  ;;  %v6078_v4 = vld [vmem:[#allocation23_spill] sm:$0xff] }
  0x71   : > { %v1194_v57 = vmul.f32 %v810_v39, %v810_v39  ;;  %v1584_v58 = vmax.f32 %v1583_v62, %v1185_v25  ;;  %v807_v6 = vmul.f32 %v423_v40, %v3331_v32  ;;  %v431_v17 = vsub.f32 %v3343_v36, %v3406_v47  ;;  %v6076_v32 = vld [vmem:[#allocation21_spill] sm:$0xff] }
  0x72   : > { %v1595_v50 = vmax.f32 %v1192_v20, %v1193_v56  ;;  %v1189_v0 = vmul.f32 %v805_v43, %v805_v43  ;;  %v1190_v27 = vmul.f32 %v806_v26, %v806_v26  ;;  %v432_v18 = vsub.f32 %v3347_v37, %v3410_v52  ;;  %v6079_v20 = vld [vmem:[#allocation24_spill] sm:$0xff]  ;;  %v6080_v40 = vld [vmem:[#allocation25_spill] sm:$0xff] }
  0x73   : > { %v814_v8 = vmul.f32 %v430_v16, %v3412_v53  ;;  %1585 = vmax.xlane.f32.xlu0 %v1584_v58  ;;  %v1191_v22 = vmul.f32 %v807_v6, %v807_v6  ;;  %v815_v5 = vmul.f32 %v431_v17, %v3416_v59  ;;  %v427_v28 = vsub.f32 %v3339_v35, %v3420_v63  ;;  %v6081_v58 = vld [vmem:[#allocation27_spill] sm:$0xff]  ;;  %v6082_v17 = vld [vmem:[#allocation28_spill] sm:$0xff] }
  0x74   : > { %v1596_v21 = vmax.f32 %v1595_v50, %v1194_v57  ;;  %v1591_v38 = vmax.f32 %v1189_v0, %v1190_v27  ;;  %v816_v46 = vmul.f32 %v432_v18, %v6076_v32  ;;  %v428_v25 = vsub.f32 %v3343_v36, %v6077_v51  ;;  %v6083_v18 = vld [vmem:[#allocation29_spill] sm:$0xff] }
  0x75   : > { %v1198_v1 = vmul.f32 %v814_v8, %v814_v8  ;;  %v1199_v39 = vmul.f32 %v815_v5, %v815_v5  ;;  %v429_v62 = vsub.f32 %v3347_v37, %v6078_v4  ;;  %v811_v56 = vmul.f32 %v427_v28, %v6079_v20  ;;  %v6084_v5 = vld [vmem:[#allocation30_spill] sm:$0xff]  ;;  %v6085_v20 = vld [vmem:[#allocation31_spill] sm:$0xff] }
  0x76   : > { %1597 = vmax.xlane.f32.xlu1 %v1596_v21  ;;  %v436_v57 = vsub.f32 %v3339_v35, %v6080_v40  ;;  %v1592_v43 = vmax.f32 %v1591_v38, %v1191_v22  ;;  %v1200_v26 = vmul.f32 %v816_v46, %v816_v46  ;;  %v812_v16 = vmul.f32 %v428_v25, %v3439_v7  ;;  %v6086_v22 = vld [vmem:[#allocation32_spill] sm:$0xff]  ;;  %v6087_v7 = vld [vmem:[#allocation33_spill] sm:$0xff] }
  0x77   : > { %v437_v50 = vsub.f32 %v3343_v36, %v6081_v58  ;;  %v1603_v6 = vmax.f32 %v1198_v1, %v1199_v39  ;;  %v813_v0 = vmul.f32 %v429_v62, %v6082_v17  ;;  %v1195_v27 = vmul.f32 %v811_v56, %v811_v56  ;;  %v6088_v1 = vld [vmem:[#allocation34_spill] sm:$0xff] }
  0x78   : > { %v438_v8 = vsub.f32 %v3347_v37, %v6083_v18  ;;  %1593 = vmax.xlane.f32.xlu0 %v1592_v43  ;;  %v1196_v21 = vmul.f32 %v812_v16, %v812_v16  ;;  %v820_v28 = vmul.f32 %v436_v57, %v6084_v5  ;;  %v433_v38 = vsub.f32 %v3339_v35, %v6086_v22  ;;  %v6089_v18 = vld [vmem:[#allocation35_spill] sm:$0xff]  ;;  %v6090_v16 = vld [vmem:[#allocation36_spill] sm:$0xff]  ;;  %v6092_v22 = vld [vmem:[#allocation38_spill] sm:$0xff] }
  0x79   : > { %v821_v40 = vmul.f32 %v437_v50, %v6085_v20  ;;  %v1604_v46 = vmax.f32 %v1603_v6, %v1200_v26  ;;  %v1197_v25 = vmul.f32 %v813_v0, %v813_v0  ;;  %v434_v39 = vsub.f32 %v3343_v36, %v6088_v1  ;;  %v6091_v20 = vld [vmem:[#allocation37_spill] sm:$0xff]  ;;  %v6094_v1 = vld [vmem:[#allocation40_spill] sm:$0xff] }
  0x7a   : > { %v822_v58 = vmul.f32 %v438_v8, %v6087_v7  ;;  %v1599_v62 = vmax.f32 %v1195_v27, %v1196_v21  ;;  %v1204_v56 = vmul.f32 %v820_v28, %v820_v28  ;;  %v435_v43 = vsub.f32 %v3347_v37, %v6089_v18  ;;  %v6093_v8 = vld [vmem:[#allocation39_spill] sm:$0xff]  ;;  %v6095_v28 = vld [vmem:[#allocation41_spill] sm:$0xff] }
  0x7b   : > { %v1205_v17 = vmul.f32 %v821_v40, %v821_v40  ;;  %1605 = vmax.xlane.f32.xlu1 %v1604_v46  ;;  %v817_v50 = vmul.f32 %v433_v38, %v6090_v16  ;;  %v818_v5 = vmul.f32 %v434_v39, %v6091_v20  ;;  %v442_v26 = vsub.f32 %v3339_v35, %v6092_v22  ;;  %v6097_v20 = vld [vmem:[#allocation43_spill] sm:$0xff]  ;;  %v6098_v22 = vld [vmem:[#allocation44_spill] sm:$0xff] }
  0x7c   : > { %v1206_v57 = vmul.f32 %v822_v58, %v822_v58  ;;  %v1600_v6 = vmax.f32 %v1599_v62, %v1197_v25  ;;  %v819_v7 = vmul.f32 %v435_v43, %v6093_v8  ;;  %v443_v27 = vsub.f32 %v3343_v36, %v6094_v1  ;;  %v6096_v58 = vld [vmem:[#allocation42_spill] sm:$0xff]  ;;  %v6099_v62 = vld [vmem:[#allocation45_spill] sm:$0xff]  ;;  %v6109_v8 = vld [vmem:[#allocation55_spill] sm:$0xff] }
  0x7d   : > { %v1611_v0 = vmax.f32 %v1204_v56, %v1205_v17  ;;  %v1201_v40 = vmul.f32 %v817_v50, %v817_v50  ;;  %v1202_v21 = vmul.f32 %v818_v5, %v818_v5  ;;  %v444_v46 = vsub.f32 %v3347_v37, %v6095_v28  ;;  %v6100_v1 = vld [vmem:[#allocation46_spill] sm:$0xff]  ;;  %v6101_v28 = vld [vmem:[#allocation47_spill] sm:$0xff] }
  0x7e   : > { %v826_v18 = vmul.f32 %v442_v26, %v6096_v58  ;;  %1601 = vmax.xlane.f32.xlu0 %v1600_v6  ;;  %v1203_v39 = vmul.f32 %v819_v7, %v819_v7  ;;  %v827_v16 = vmul.f32 %v443_v27, %v6097_v20  ;;  %v439_v17 = vsub.f32 %v3339_v35, %v6098_v22  ;;  %v6102_v6 = vld [vmem:[#allocation48_spill] sm:$0xff]  ;;  %v6103_v7 = vld [vmem:[#allocation49_spill] sm:$0xff]  ;;  %v6104_v22 = vld [vmem:[#allocation50_spill] sm:$0xff] }
  0x7f   : > { %v1612_v38 = vmax.f32 %v1611_v0, %v1206_v57  ;;  %v1607_v25 = vmax.f32 %v1201_v40, %v1202_v21  ;;  %v828_v56 = vmul.f32 %v444_v46, %v6099_v62  ;;  %v440_v5 = vsub.f32 %v3343_v36, %v6100_v1  ;;  %v6105_v21 = vld [vmem:[#allocation51_spill] sm:$0xff]  ;;  %v6106_v62 = vld [vmem:[#allocation52_spill] sm:$0xff] }
  0x80   : > { %v1210_v43 = vmul.f32 %v826_v18, %v826_v18  ;;  %v1211_v50 = vmul.f32 %v827_v16, %v827_v16  ;;  %v441_v26 = vsub.f32 %v3347_v37, %v6101_v28  ;;  %v823_v57 = vmul.f32 %v439_v17, %v6102_v6  ;;  %v6107_v16 = vld [vmem:[#allocation53_spill] sm:$0xff]  ;;  %v6108_v17 = vld [vmem:[#allocation54_spill] sm:$0xff] }
  0x81   : > { %1613 = vmax.xlane.f32.xlu1 %v1612_v38  ;;  %v448_v0 = vsub.f32 %v3339_v35, %v6103_v7  ;;  %v1608_v27 = vmax.f32 %v1607_v25, %v1203_v39  ;;  %v1212_v20 = vmul.f32 %v828_v56, %v828_v56  ;;  %v824_v40 = vmul.f32 %v440_v5, %v6104_v22  ;;  %v6110_v39 = vld [vmem:[#allocation56_spill] sm:$0xff]  ;;  %v6111_v22 = vld [vmem:[#allocation57_spill] sm:$0xff] }
  0x82   : > { %v449_v18 = vsub.f32 %v3343_v36, %v6105_v21  ;;  %v1619_v46 = vmax.f32 %v1210_v43, %v1211_v50  ;;  %v825_v1 = vmul.f32 %v441_v26, %v6106_v62  ;;  %v1207_v38 = vmul.f32 %v823_v57, %v823_v57  ;;  %v6112_v43 = vld [vmem:[#allocation58_spill] sm:$0xff] }
  0x83   : > { %v450_v58 = vsub.f32 %v3347_v37, %v6107_v16  ;;  %1609 = vmax.xlane.f32.xlu0 %v1608_v27  ;;  %v1208_v28 = vmul.f32 %v824_v40, %v824_v40  ;;  %v832_v6 = vmul.f32 %v448_v0, %v6108_v17  ;;  %v445_v25 = vsub.f32 %v3339_v35, %v6110_v39  ;;  %v6113_v16 = vld [vmem:[#allocation59_spill] sm:$0xff]  ;;  %v6114_v40 = vld [vmem:[#allocation60_spill] sm:$0xff]  ;;  %v6116_v39 = vld [vmem:[#allocation62_spill] sm:$0xff] }
  0x84   : > { %v833_v7 = vmul.f32 %v449_v18, %v6109_v8  ;;  %v1620_v56 = vmax.f32 %v1619_v46, %v1212_v20  ;;  %v1209_v5 = vmul.f32 %v825_v1, %v825_v1  ;;  %v446_v50 = vsub.f32 %v3343_v36, %v6112_v43  ;;  %v6115_v8 = vld [vmem:[#allocation61_spill] sm:$0xff]  ;;  %v6117_v46 = vld [vmem:[#allocation63_spill] sm:$0xff]  ;;  %v6118_v43 = vld [vmem:[#allocation64_spill] sm:$0xff] }
  0x85   : > { %v834_v21 = vmul.f32 %v450_v58, %v6111_v22  ;;  %v1615_v26 = vmax.f32 %v1207_v38, %v1208_v28  ;;  %v1216_v57 = vmul.f32 %v832_v6, %v832_v6  ;;  %v447_v27 = vsub.f32 %v3347_v37, %v6113_v16  ;;  %v6119_v38 = vld [vmem:[#allocation65_spill] sm:$0xff] }
  0x86   : > { %v1217_v62 = vmul.f32 %v833_v7, %v833_v7  ;;  %1621 = vmax.xlane.f32.xlu1 %v1620_v56  ;;  %v829_v18 = vmul.f32 %v445_v25, %v6114_v40  ;;  %v830_v17 = vmul.f32 %v446_v50, %v6115_v8  ;;  %v454_v20 = vsub.f32 %v3339_v35, %v6116_v39  ;;  %v6121_v8 = vld [vmem:[#allocation67_spill] sm:$0xff]  ;;  %v6122_v39 = vld [vmem:[#allocation68_spill] sm:$0xff] }
  0x87   : > { %v1218_v0 = vmul.f32 %v834_v21, %v834_v21  ;;  %v1616_v1 = vmax.f32 %v1615_v26, %v1209_v5  ;;  %v831_v22 = vmul.f32 %v447_v27, %v6117_v46  ;;  %v455_v28 = vsub.f32 %v3343_v36, %v6118_v43  ;;  %v6120_v21 = vld [vmem:[#allocation66_spill] sm:$0xff]  ;;  %v6123_v26 = vld [vmem:[#allocation69_spill] sm:$0xff] }
  0x88   : > { %v1627_v58 = vmax.f32 %v1216_v57, %v1217_v62  ;;  %v1213_v6 = vmul.f32 %v829_v18, %v829_v18  ;;  %v1214_v7 = vmul.f32 %v830_v17, %v830_v17  ;;  %v456_v56 = vsub.f32 %v3347_v37, %v6119_v38  ;;  %v6124_v43 = vld [vmem:[#allocation70_spill] sm:$0xff]  ;;  %v6125_v38 = vld [vmem:[#allocation71_spill] sm:$0xff] }
  0x89   : > { %v838_v16 = vmul.f32 %v454_v20, %v6120_v21  ;;  %1617 = vmax.xlane.f32.xlu0 %v1616_v1  ;;  %v1215_v50 = vmul.f32 %v831_v22, %v831_v22  ;;  %v839_v40 = vmul.f32 %v455_v28, %v6121_v8  ;;  %v451_v62 = vsub.f32 %v3339_v35, %v6122_v39  ;;  %v6126_v1 = vld [vmem:[#allocation72_spill] sm:$0xff]  ;;  %v6127_v22 = vld [vmem:[#allocation73_spill] sm:$0xff]  ;;  %v6132_v21 = vld [vmem:[#allocation78_spill] sm:$0xff] }
  0x8a   : > { %v1628_v25 = vmax.f32 %v1627_v58, %v1218_v0  ;;  %v1623_v5 = vmax.f32 %v1213_v6, %v1214_v7  ;;  %v840_v57 = vmul.f32 %v456_v56, %v6123_v26  ;;  %v452_v17 = vsub.f32 %v3343_v36, %v6124_v43  ;;  %v6128_v7 = vld [vmem:[#allocation74_spill] sm:$0xff]  ;;  %v6129_v26 = vld [vmem:[#allocation75_spill] sm:$0xff] }
  0x8b   : > { %v1222_v27 = vmul.f32 %v838_v16, %v838_v16  ;;  %v1223_v18 = vmul.f32 %v839_v40, %v839_v40  ;;  %v453_v20 = vsub.f32 %v3347_v37, %v6125_v38  ;;  %v835_v0 = vmul.f32 %v451_v62, %v6126_v1  ;;  %v6130_v40 = vld [vmem:[#allocation76_spill] sm:$0xff]  ;;  %v6131_v62 = vld [vmem:[#allocation77_spill] sm:$0xff] }
  0x8c   : > { %1629 = vmax.xlane.f32.xlu1 %v1628_v25  ;;  %v460_v58 = vsub.f32 %v3339_v35, %v6127_v22  ;;  %v1624_v28 = vmax.f32 %v1623_v5, %v1215_v50  ;;  %v1224_v8 = vmul.f32 %v840_v57, %v840_v57  ;;  %v836_v6 = vmul.f32 %v452_v17, %v3607_v2 }
  0x8d   : > { %v461_v16 = vsub.f32 %v3343_v36, %v6128_v7  ;;  %v1635_v56 = vmax.f32 %v1222_v27, %v1223_v18  ;;  %v837_v43 = vmul.f32 %v453_v20, %v6129_v26  ;;  %v1219_v25 = vmul.f32 %v835_v0, %v835_v0 }
  0x8e   : > { %v462_v39 = vsub.f32 %v3347_v37, %v6130_v40  ;;  %1625 = vmax.xlane.f32.xlu0 %v1624_v28  ;;  %v1220_v38 = vmul.f32 %v836_v6, %v836_v6  ;;  %v844_v1 = vmul.f32 %v460_v58, %v6131_v62  ;;  %v457_v50 = vsub.f32 %v3339_v35, %v3629_v10  ;;  %v6133_v35 = vld [vmem:[#allocation16_spill] sm:$0xff] }
  0x8f   : > { %v845_v22 = vmul.f32 %v461_v16, %v6132_v21  ;;  %v1636_v5 = vmax.f32 %v1635_v56, %v1224_v8  ;;  %v1221_v57 = vmul.f32 %v837_v43, %v837_v43  ;;  %v458_v27 = vsub.f32 %v3343_v36, %v3636_v49  ;;  %v6134_v8 = vld [vmem:[#allocation20_spill] sm:$0xff] }
  0x90   : > { %v846_v17 = vmul.f32 %v462_v39, %v3632_v48  ;;  %v1631_v18 = vmax.f32 %v1219_v25, %v1220_v38  ;;  %v1228_v20 = vmul.f32 %v844_v1, %v844_v1  ;;  %v459_v28 = vsub.f32 %v3347_v37, %v3641_v14  ;;  %v6135_v38 = vld [vmem:[#allocation17_spill] sm:$0xff]  ;;  %v6136_v25 = vld [vmem:[#allocation18_spill] sm:$0xff] }
  0x91   : > { %v1229_v0 = vmul.f32 %v845_v22, %v845_v22  ;;  %1637 = vmax.xlane.f32.xlu1 %v1636_v5  ;;  %v841_v6 = vmul.f32 %v457_v50, %v3645_v11  ;;  %v842_v16 = vmul.f32 %v458_v27, %v3647_v13  ;;  %v3806_v43 = vrot.slane %v6134_v8, %v6133_v35 }
  0x92   : > { %v1230_v58 = vmul.f32 %v846_v17, %v846_v17  ;;  %v1632_v39 = vmax.f32 %v1631_v18, %v1221_v57  ;;  %v843_v36 = vmul.f32 %v459_v28, %v3652_v9  ;;  %v3811_v1 = vrot.slane %v6134_v8, %v6135_v38 }
  0x93   : > { %v1643_v56 = vmax.f32 %v1228_v20, %v1229_v0  ;;  %v1225_v22 = vmul.f32 %v841_v6, %v841_v6  ;;  %v1226_v37 = vmul.f32 %v842_v16, %v842_v16  ;;  %v3815_v5 = vrot.slane %v6134_v8, %v6136_v25 }
  0x94   : > { %v466_v50 = vsub.f32 %v3806_v43, %v3386_v60  ;;  %1633 = vmax.xlane.f32.xlu0 %v1632_v39  ;;  %v1227_v27 = vmul.f32 %v843_v36, %v843_v36  ;;  %v467_v57 = vsub.f32 %v3811_v1, %v3388_v61  ;;  %v463_v18 = vsub.f32 %v3806_v43, %v3310_v23 }
  0x95   : > { %v1644_v17 = vmax.f32 %v1643_v56, %v1230_v58  ;;  %v1639_v20 = vmax.f32 %v1225_v22, %v1226_v37  ;;  %v468_v0 = vsub.f32 %v3815_v5, %v3390_v3  ;;  %v464_v6 = vsub.f32 %v3811_v1, %v3312_v24 }
  0x96   : > { %v850_v28 = vmul.f32 %v466_v50, %v3394_v12  ;;  %v851_v60 = vmul.f32 %v467_v57, %v3396_v15  ;;  %v465_v58 = vsub.f32 %v3815_v5, %v3325_v29  ;;  %v847_v61 = vmul.f32 %v463_v18, %v3333_v33  ;;  %v3852_v18 = vld [vmem:[#allocation6 + $0x40] sm:$0xff] }
  0x97   : > { %1645 = vmax.xlane.f32.xlu1 %v1644_v17  ;;  %v472_v23 = vsub.f32 %v3806_v43, %v3327_v30  ;;  %v1640_v16 = vmax.f32 %v1639_v20, %v1227_v27  ;;  %v852_v8 = vmul.f32 %v468_v0, %v3400_v41  ;;  %v848_v12 = vmul.f32 %v464_v6, %v3335_v34  ;;  %v3843_v34 = vld [vmem:[#allocation6 + $0x30] sm:$0xff]  ;;  %v3848_v27 = vld [vmem:[#allocation6 + $0x38] sm:$0xff] }
  0x98   : > { %v1234_v3 = vmul.f32 %v850_v28, %v850_v28  ;;  %v1235_v39 = vmul.f32 %v851_v60, %v851_v60  ;;  %v849_v24 = vmul.f32 %v465_v58, %v3357_v42  ;;  %v1231_v56 = vmul.f32 %v847_v61, %v847_v61  ;;  %v3856_v20 = vld [vmem:[#allocation8 + $0x30] sm:$0xff] }
  0x99   : > { %v473_v15 = vsub.f32 %v3811_v1, %v3329_v31  ;;  %1641 = vmax.xlane.f32.xlu0 %v1640_v16  ;;  %v1236_v29 = vmul.f32 %v852_v8, %v852_v8  ;;  %v1232_v36 = vmul.f32 %v848_v12, %v848_v12  ;;  %v474_v33 = vsub.f32 %v3815_v5, %v3361_v44 }
  0x9a   : > { %v856_v30 = vmul.f32 %v472_v23, %v3363_v45  ;;  %v1651_v22 = vmax.f32 %v1234_v3, %v1235_v39  ;;  %v1233_v41 = vmul.f32 %v849_v24, %v849_v24  ;;  %v469_v42 = vsub.f32 %v3806_v43, %v3843_v34  ;;  %v3864_v23 = vld [vmem:[#allocation8 + $0x40] sm:$0xff] }
  0x9b   : > { %v857_v37 = vmul.f32 %v473_v15, %v3377_v54  ;;  %v1647_v50 = vmax.f32 %v1231_v56, %v1232_v36  ;;  %v858_v31 = vmul.f32 %v474_v33, %v3379_v55  ;;  %v470_v44 = vsub.f32 %v3811_v1, %v3848_v27  ;;  %v3859_v55 = vld [vmem:[#allocation8 + $0x38] sm:$0xff] }
  0x9c   : > { %v1240_v17 = vmul.f32 %v856_v30, %v856_v30  ;;  %v1652_v57 = vmax.f32 %v1651_v22, %v1236_v29  ;;  %v471_v54 = vsub.f32 %v3815_v5, %v3852_v18  ;;  %v853_v0 = vmul.f32 %v3856_v20, %v469_v42  ;;  %v6139_v42 = vld [vmem:[#allocation25_spill] sm:$0xff] }
  0x9d   : > { %v1241_v45 = vmul.f32 %v857_v37, %v857_v37  ;;  %v1648_v28 = vmax.f32 %v1647_v50, %v1233_v41  ;;  %v1242_v6 = vmul.f32 %v858_v31, %v858_v31  ;;  %v854_v60 = vmul.f32 %v3859_v55, %v470_v44  ;;  %v6138_v37 = vld [vmem:[#allocation26_spill] sm:$0xff]  ;;  %v6141_v44 = vld [vmem:[#allocation27_spill] sm:$0xff] }
  0x9e   : > { %v478_v58 = vsub.f32 %v3806_v43, %v3398_v19  ;;  %1653 = vmax.xlane.f32.xlu1 %v1652_v57  ;;  %v855_v16 = vmul.f32 %v3864_v23, %v471_v54  ;;  %v1237_v8 = vmul.f32 %v853_v0, %v853_v0  ;;  %v479_v3 = vsub.f32 %v3811_v1, %v3406_v47 }
  0x9f   : > { %v1659_v61 = vmax.f32 %v1240_v17, %v1241_v45  ;;  %1649 = vmax.xlane.f32.xlu0 %v1648_v28  ;;  %v1238_v12 = vmul.f32 %v854_v60, %v854_v60  ;;  %v480_v39 = vsub.f32 %v3815_v5, %v3410_v52  ;;  %v475_v19 = vsub.f32 %v3806_v43, %v3420_v63  ;;  %v6140_v17 = vld [vmem:[#allocation28_spill] sm:$0xff] }
  0xa0   : > { %v862_v24 = vmul.f32 %v478_v58, %v3412_v53  ;;  %v1239_v15 = vmul.f32 %v855_v16, %v855_v16  ;;  %v863_v29 = vmul.f32 %v479_v3, %v3416_v59  ;;  %v476_v36 = vsub.f32 %v3811_v1, %v6077_v51  ;;  %v6137_v53 = vld [vmem:[#allocation24_spill] sm:$0xff]  ;;  %v6144_v58 = vld [vmem:[#allocation31_spill] sm:$0xff] }
  0xa1   : > { %v1660_v56 = vmax.f32 %v1659_v61, %v1242_v6  ;;  %v1655_v33 = vmax.f32 %v1237_v8, %v1238_v12  ;;  %v864_v47 = vmul.f32 %v480_v39, %v6076_v32  ;;  %v477_v22 = vsub.f32 %v3815_v5, %v6078_v4  ;;  %v6142_v4 = vld [vmem:[#allocation29_spill] sm:$0xff]  ;;  %v6143_v6 = vld [vmem:[#allocation30_spill] sm:$0xff]  ;;  %v6145_v16 = vld [vmem:[#allocation32_spill] sm:$0xff] }
  0xa2   : > { %v1246_v30 = vmul.f32 %v862_v24, %v862_v24  ;;  %v1247_v52 = vmul.f32 %v863_v29, %v863_v29  ;;  %v859_v41 = vmul.f32 %v475_v19, %v6137_v53  ;;  %v860_v63 = vmul.f32 %v476_v36, %v6138_v37  ;;  %v6146_v39 = vld [vmem:[#allocation33_spill] sm:$0xff]  ;;  %v6147_v19 = vld [vmem:[#allocation34_spill] sm:$0xff]  ;;  %v6148_v36 = vld [vmem:[#allocation35_spill] sm:$0xff] }
  0xa3   : > { %1661 = vmax.xlane.f32.xlu1 %v1660_v56  ;;  %v484_v50 = vsub.f32 %v3806_v43, %v6139_v42  ;;  %v1656_v59 = vmax.f32 %v1655_v33, %v1239_v15  ;;  %v1248_v31 = vmul.f32 %v864_v47, %v864_v47  ;;  %v861_v51 = vmul.f32 %v477_v22, %v6140_v17  ;;  %v6149_v47 = vld [vmem:[#allocation36_spill] sm:$0xff]  ;;  %v6150_v53 = vld [vmem:[#allocation37_spill] sm:$0xff]  ;;  %v6151_v37 = vld [vmem:[#allocation38_spill] sm:$0xff] }
  0xa4   : > { %v485_v32 = vsub.f32 %v3811_v1, %v6141_v44  ;;  %v1667_v57 = vmax.f32 %v1246_v30, %v1247_v52  ;;  %v1243_v45 = vmul.f32 %v859_v41, %v859_v41  ;;  %v1244_v54 = vmul.f32 %v860_v63, %v860_v63  ;;  %v6153_v17 = vld [vmem:[#allocation40_spill] sm:$0xff] }
  0xa5   : > { %v486_v0 = vsub.f32 %v3815_v5, %v6142_v4  ;;  %1657 = vmax.xlane.f32.xlu0 %v1656_v59  ;;  %v1245_v28 = vmul.f32 %v861_v51, %v861_v51  ;;  %v868_v60 = vmul.f32 %v484_v50, %v6143_v6  ;;  %v481_v8 = vsub.f32 %v3806_v43, %v6145_v16  ;;  %v6152_v50 = vld [vmem:[#allocation39_spill] sm:$0xff]  ;;  %v6156_v4 = vld [vmem:[#allocation44_spill] sm:$0xff] }
  0xa6   : > { %v869_v61 = vmul.f32 %v485_v32, %v6144_v58  ;;  %v1668_v3 = vmax.f32 %v1667_v57, %v1248_v31  ;;  %v1663_v12 = vmax.f32 %v1243_v45, %v1244_v54  ;;  %v482_v56 = vsub.f32 %v3811_v1, %v6147_v19  ;;  %v6154_v32 = vld [vmem:[#allocation41_spill] sm:$0xff]  ;;  %v6155_v45 = vld [vmem:[#allocation42_spill] sm:$0xff] }
  0xa7   : > { %v870_v24 = vmul.f32 %v486_v0, %v6146_v39  ;;  %v1252_v15 = vmul.f32 %v868_v60, %v868_v60  ;;  %v483_v33 = vsub.f32 %v3815_v5, %v6148_v36  ;;  %v865_v30 = vmul.f32 %v481_v8, %v6149_v47  ;;  %v6157_v60 = vld [vmem:[#allocation43_spill] sm:$0xff]  ;;  %v6162_v36 = vld [vmem:[#allocation50_spill] sm:$0xff]  ;;  %v6163_v47 = vld [vmem:[#allocation49_spill] sm:$0xff] }
  0xa8   : > { %v1253_v29 = vmul.f32 %v869_v61, %v869_v61  ;;  %1669 = vmax.xlane.f32.xlu1 %v1668_v3  ;;  %v1664_v22 = vmax.f32 %v1663_v12, %v1245_v28  ;;  %v866_v41 = vmul.f32 %v482_v56, %v6150_v53  ;;  %v490_v63 = vsub.f32 %v3806_v43, %v6151_v37  ;;  %v6158_v61 = vld [vmem:[#allocation46_spill] sm:$0xff]  ;;  %v6159_v3 = vld [vmem:[#allocation45_spill] sm:$0xff]  ;;  %v6164_v53 = vld [vmem:[#allocation52_spill] sm:$0xff] }
  0xa9   : > { %v1254_v52 = vmul.f32 %v870_v24, %v870_v24  ;;  %v867_v59 = vmul.f32 %v483_v33, %v6152_v50  ;;  %v1249_v31 = vmul.f32 %v865_v30, %v865_v30  ;;  %v491_v51 = vsub.f32 %v3811_v1, %v6153_v17  ;;  %v6160_v24 = vld [vmem:[#allocation47_spill] sm:$0xff] }
  0xaa   : > { %v1675_v42 = vmax.f32 %v1252_v15, %v1253_v29  ;;  %1665 = vmax.xlane.f32.xlu0 %v1664_v22  ;;  %v1250_v44 = vmul.f32 %v866_v41, %v866_v41  ;;  %v492_v57 = vsub.f32 %v3815_v5, %v6154_v32  ;;  %v874_v54 = vmul.f32 %v490_v63, %v6155_v45  ;;  %v6161_v15 = vld [vmem:[#allocation48_spill] sm:$0xff]  ;;  %v6165_v37 = vld [vmem:[#allocation51_spill] sm:$0xff] }
  0xab   : > { %v487_v0 = vsub.f32 %v3806_v43, %v6156_v4  ;;  %v1251_v6 = vmul.f32 %v867_v59, %v867_v59  ;;  %v875_v58 = vmul.f32 %v491_v51, %v6157_v60  ;;  %v488_v16 = vsub.f32 %v3811_v1, %v6158_v61 }
  0xac   : > { %v1676_v28 = vmax.f32 %v1675_v42, %v1254_v52  ;;  %v1671_v8 = vmax.f32 %v1249_v31, %v1250_v44  ;;  %v876_v12 = vmul.f32 %v492_v57, %v6159_v3  ;;  %v1258_v39 = vmul.f32 %v874_v54, %v874_v54  ;;  %v6166_v31 = vld [vmem:[#allocation53_spill] sm:$0xff]  ;;  %v6167_v44 = vld [vmem:[#allocation54_spill] sm:$0xff]  ;;  %v6168_v57 = vld [vmem:[#allocation55_spill] sm:$0xff] }
  0xad   : > { %v489_v19 = vsub.f32 %v3815_v5, %v6160_v24  ;;  %v1259_v56 = vmul.f32 %v875_v58, %v875_v58  ;;  %v871_v29 = vmul.f32 %v487_v0, %v6161_v15  ;;  %v872_v33 = vmul.f32 %v488_v16, %v6162_v36  ;;  %v6169_v54 = vld [vmem:[#allocation56_spill] sm:$0xff]  ;;  %v6171_v58 = vld [vmem:[#allocation58_spill] sm:$0xff]  ;;  %v6172_v3 = vld [vmem:[#allocation59_spill] sm:$0xff] }
  0xae   : > { %1677 = vmax.xlane.f32.xlu1 %v1676_v28  ;;  %v496_v30 = vsub.f32 %v3806_v43, %v6163_v47  ;;  %v1672_v22 = vmax.f32 %v1671_v8, %v1251_v6  ;;  %v1260_v52 = vmul.f32 %v876_v12, %v876_v12  ;;  %v497_v63 = vsub.f32 %v3811_v1, %v6165_v37  ;;  %v6170_v6 = vld [vmem:[#allocation57_spill] sm:$0xff]  ;;  %v6175_v36 = vld [vmem:[#allocation62_spill] sm:$0xff] }
  0xaf   : > { %v873_v41 = vmul.f32 %v489_v19, %v6164_v53  ;;  %v1683_v42 = vmax.f32 %v1258_v39, %v1259_v56  ;;  %v1255_v50 = vmul.f32 %v871_v29, %v871_v29  ;;  %v1256_v59 = vmul.f32 %v872_v33, %v872_v33  ;;  %v6173_v39 = vld [vmem:[#allocation60_spill] sm:$0xff]  ;;  %v6174_v15 = vld [vmem:[#allocation61_spill] sm:$0xff] }
  0xb0   : > { %v498_v17 = vsub.f32 %v3815_v5, %v6166_v31  ;;  %1673 = vmax.xlane.f32.xlu0 %v1672_v22  ;;  %v880_v32 = vmul.f32 %v496_v30, %v6167_v44  ;;  %v881_v45 = vmul.f32 %v497_v63, %v6168_v57  ;;  %v493_v4 = vsub.f32 %v3806_v43, %v6169_v54  ;;  %v6177_v37 = vld [vmem:[#allocation65_spill] sm:$0xff]  ;;  %v6180_v44 = vld [vmem:[#allocation67_spill] sm:$0xff]  ;;  %v6181_v57 = vld [vmem:[#allocation70_spill] sm:$0xff] }
  0xb1   : > { %v1257_v51 = vmul.f32 %v873_v41, %v873_v41  ;;  %v1684_v0 = vmax.f32 %v1683_v42, %v1260_v52  ;;  %v1679_v28 = vmax.f32 %v1255_v50, %v1256_v59  ;;  %v494_v61 = vsub.f32 %v3811_v1, %v6171_v58  ;;  %v6176_v52 = vld [vmem:[#allocation64_spill] sm:$0xff]  ;;  %v6178_v42 = vld [vmem:[#allocation66_spill] sm:$0xff]  ;;  %v6182_v54 = vld [vmem:[#allocation69_spill] sm:$0xff] }
  0xb2   : > { %v882_v60 = vmul.f32 %v498_v17, %v6170_v6  ;;  %v1264_v16 = vmul.f32 %v880_v32, %v880_v32  ;;  %v1265_v8 = vmul.f32 %v881_v45, %v881_v45  ;;  %v495_v12 = vsub.f32 %v3815_v5, %v6172_v3  ;;  %v6179_v59 = vld [vmem:[#allocation68_spill] sm:$0xff] }
  0xb3   : > { %v877_v24 = vmul.f32 %v493_v4, %v6173_v39  ;;  %1685 = vmax.xlane.f32.xlu1 %v1684_v0  ;;  %v1680_v19 = vmax.f32 %v1679_v28, %v1257_v51  ;;  %v878_v29 = vmul.f32 %v494_v61, %v6174_v15  ;;  %v502_v33 = vsub.f32 %v3806_v43, %v6175_v36  ;;  %v6183_v28 = vld [vmem:[#allocation71_spill] sm:$0xff]  ;;  %v6184_v58 = vld [vmem:[#allocation72_spill] sm:$0xff] }
  0xb4   : > { %v1266_v56 = vmul.f32 %v882_v60, %v882_v60  ;;  %v1691_v47 = vmax.f32 %v1264_v16, %v1265_v8  ;;  %v879_v30 = vmul.f32 %v495_v12, %v6117_v46  ;;  %v503_v53 = vsub.f32 %v3811_v1, %v6176_v52  ;;  %v6185_v8 = vld [vmem:[#allocation73_spill] sm:$0xff] }
  0xb5   : > { %v1261_v22 = vmul.f32 %v877_v24, %v877_v24  ;;  %1681 = vmax.xlane.f32.xlu0 %v1680_v19  ;;  %v1262_v41 = vmul.f32 %v878_v29, %v878_v29  ;;  %v504_v63 = vsub.f32 %v3815_v5, %v6177_v37  ;;  %v886_v50 = vmul.f32 %v502_v33, %v6178_v42 }
  0xb6   : > { %v499_v31 = vsub.f32 %v3806_v43, %v6179_v59  ;;  %v1692_v17 = vmax.f32 %v1691_v47, %v1266_v56  ;;  %v1263_v51 = vmul.f32 %v879_v30, %v879_v30  ;;  %v887_v32 = vmul.f32 %v503_v53, %v6180_v44 }
  0xb7   : > { %v500_v46 = vsub.f32 %v3811_v1, %v6181_v57  ;;  %v1687_v45 = vmax.f32 %v1261_v22, %v1262_v41  ;;  %v888_v4 = vmul.f32 %v504_v63, %v6182_v54  ;;  %v1270_v0 = vmul.f32 %v886_v50, %v886_v50  ;;  %v3994_v57 = vld [vmem:[#allocation6 + $0x18] sm:$0xff] }
  0xb8   : > { %v501_v6 = vsub.f32 %v3815_v5, %v6183_v28  ;;  %1693 = vmax.xlane.f32.xlu1 %v1692_v17  ;;  %v1271_v60 = vmul.f32 %v887_v32, %v887_v32  ;;  %v883_v61 = vmul.f32 %v499_v31, %v6184_v58  ;;  %v508_v3 = vsub.f32 %v3806_v43, %v6185_v8  ;;  %v6187_v31 = vld [vmem:[#allocation14_spill] sm:$0xff]  ;;  %v4018_v8 = vld [vmem:[#allocation6 + $0x48] sm:$0xff] }
  0xb9   : > { %v884_v16 = vmul.f32 %v500_v46, %v3607_v2  ;;  %v1688_v12 = vmax.f32 %v1687_v45, %v1263_v51  ;;  %v1272_v39 = vmul.f32 %v888_v4, %v888_v4  ;;  %v509_v19 = vsub.f32 %v3811_v1, %v6128_v7  ;;  %v6189_v51 = vld [vmem:[#allocation15_spill] sm:$0xff]  ;;  %v3998_v45 = vld [vmem:[#allocation6 + $0x20] sm:$0xff]  ;;  %6192 = vst [vmem:[#allocation23_spill] sm:$0xff] %v4018_v8 }
  0xba   : > { %v885_v24 = vmul.f32 %v501_v6, %v6129_v26  ;;  %v1699_v56 = vmax.f32 %v1270_v0, %v1271_v60  ;;  %v1267_v15 = vmul.f32 %v883_v61, %v883_v61  ;;  %v510_v36 = vsub.f32 %v3815_v5, %v6130_v40  ;;  %v4002_v4 = vld [vmem:[#allocation6 + $0x28] sm:$0xff]  ;;  %v4006_v28 = vld [vmem:[#allocation6] sm:$0xff]  ;;  %v4014_v61 = vld [vmem:[#allocation6 + $0x10] sm:$0xff] }
  0xbb   : > { %v1268_v29 = vmul.f32 %v884_v16, %v884_v16  ;;  %1689 = vmax.xlane.f32.xlu0 %v1688_v12  ;;  %v892_v2 = vmul.f32 %v508_v3, %v6131_v62  ;;  %v893_v47 = vmul.f32 %v509_v19, %v6132_v21  ;;  %v505_v30 = vsub.f32 %v3806_v43, %v3629_v10  ;;  %v2931_v62 = vld [vmem:[%s3278_s7 + $0x4] ss:$8 sps:$4 sm:$0xff]  }
  0xbc   : > { %v1269_v33 = vmul.f32 %v885_v24, %v885_v24  ;;  %v1700_v26 = vmax.f32 %v1699_v56, %v1272_v39  ;;  %v894_v7 = vmul.f32 %v510_v36, %v3632_v48  ;;  %v506_v52 = vsub.f32 %v3811_v1, %v3636_v49  ;;  %v6186_v43 = vld [vmem:[#allocation19_spill] sm:$0xff]  ;;  %6191 = vst [vmem:[#allocation22_spill] sm:$0xff] %v4014_v61  ;;  %v4022_v39 = vld [vmem:[#allocation8 + $0x18] sm:$0xff]  ;;  %v4025_v19 = vld [vmem:[#allocation8 + $0x20] sm:$0xff] }
  0xbd   : > { %v1695_v22 = vmax.f32 %v1267_v15, %v1268_v29  ;;  %v1276_v53 = vmul.f32 %v892_v2, %v892_v2  ;;  %v1277_v41 = vmul.f32 %v893_v47, %v893_v47  ;;  %v507_v40 = vsub.f32 %v3815_v5, %v3641_v14  ;;  %v4010_v60 = vld [vmem:[#allocation6 + $0x8] sm:$0xff]  ;;  %6193 = vst [vmem:[#allocation63_spill] sm:$0xff] %v4022_v39  ;;  %v4031_v36 = vld [vmem:[#allocation8] sm:$0xff] }
  0xbe   : > { %v889_v37 = vmul.f32 %v505_v30, %v3645_v11  ;;  %1701 = vmax.xlane.f32.xlu1 %v1700_v26  ;;  %v1278_v63 = vmul.f32 %v894_v7, %v894_v7  ;;  %v890_v10 = vmul.f32 %v506_v52, %v3647_v13  ;;  %v245_v42 = vcombine.high %v6186_v43, %v6186_v43  ;;  %v4028_v15 = vld [vmem:[#allocation8 + $0x28] sm:$0xff]  ;;  %v4037_v30 = vld [vmem:[#allocation8 + $0x10] sm:$0xff] }
  0xbf   : > { %v1696_v21 = vmax.f32 %v1695_v22, %v1269_v33  ;;  %v1707_v48 = vmax.f32 %v1276_v53, %v1277_v41  ;;  %v891_v50 = vmul.f32 %v507_v40, %v3652_v9  ;;  %v3986_v17 = vrot.slane %v2931_v62, %v6187_v31  ;;  %6194 = vst [vmem:[#allocation74_spill] sm:$0xff] %v4025_v19  ;;  %v4034_v2 = vld [vmem:[#allocation8 + $0x8] sm:$0xff]  ;;  %v4040_v22 = vld [vmem:[#allocation6 + $0x50] sm:$0xff]  ;;  %v4044_v40 = vld [vmem:[#allocation6 + $0x58] sm:$0xff] }
  0xc0   : > { %v1273_v49 = vmul.f32 %v889_v37, %v889_v37  ;;  %v1274_v1 = vmul.f32 %v890_v10, %v890_v10  ;;  %v3977_v59 = vrot.slane %v245_v42, %v6133_v35  ;;  %v3980_v14 = vrot.slane %v245_v42, %v6135_v38  ;;  %6195 = vst [vmem:[#allocation75_spill] sm:$0xff] %v4031_v36  ;;  %v4048_v10 = vld [vmem:[#allocation8 + $0x48] sm:$0xff] }
  0xc1   : > { %1697 = vmax.xlane.f32.xlu0 %v1696_v21  ;;  %v3983_v11 = vrot.slane %v245_v42, %v6136_v25  ;;  %v1708_v5 = vmax.f32 %v1707_v48, %v1278_v63  ;;  %v1275_v13 = vmul.f32 %v891_v50, %v891_v50  ;;  %6188 = vst [vmem:[#allocation21_spill] sm:$0xff] %v3986_v17  ;;  %6196 = vst [vmem:[#allocation76_spill] sm:$0xff] %v4034_v2  ;;  %v4051_v48 = vld [vmem:[#allocation8 + $0x50] sm:$0xff] }
  0xc2   : > { %v6190_v9 = vcombine.high %v6189_v51, %v6189_v51  ;;  %v1703_v32 = vmax.f32 %v1273_v49, %v1274_v1  ;;  %v514_v46 = vsub.f32 %v3977_v59, %v3994_v57  ;;  %v515_v54 = vsub.f32 %v3980_v14, %v3998_v45  ;;  %6197 = vst [vmem:[#allocation77_spill] sm:$0xff] %v4037_v30  ;;  %v4054_v49 = vld [vmem:[#allocation8 + $0x58] sm:$0xff] }
  0xc3   : > { %v516_v0 = vsub.f32 %v3983_v11, %v4002_v4  ;;  %1709 = vmax.xlane.f32.xlu1 %v1708_v5  ;;  %v511_v6 = vsub.f32 %v3977_v59, %v4006_v28  ;;  %v512_v58 = vsub.f32 %v3980_v14, %v4010_v60  ;;  %v513_v16 = vsub.f32 %v3983_v11, %v4014_v61 }
  0xc4   : > { %v3992_v44 = vrot.slane %v6190_v9, %v6187_v31  ;;  %v520_v3 = vsub.f32 %v3977_v59, %v4018_v8  ;;  %v1704_v12 = vmax.f32 %v1703_v32, %v1275_v13  ;;  %v898_v24 = vmul.f32 %v4022_v39, %v514_v46  ;;  %6198 = vst [vmem:[#allocation78_spill] sm:$0xff] %v4040_v22 }
  0xc5   : > { %v899_v56 = vmul.f32 %v4025_v19, %v515_v54  ;;  %v900_v29 = vmul.f32 %v4028_v15, %v516_v0  ;;  %v895_v33 = vmul.f32 %v4031_v36, %v511_v6  ;;  %v896_v47 = vmul.f32 %v4034_v2, %v512_v58  ;;  %6199 = vst [vmem:[#allocation16_spill] sm:$0xff] %v4044_v40 }
  0xc6   : > { %v897_v26 = vmul.f32 %v4037_v30, %v513_v16  ;;  %v521_v7 = vsub.f32 %v3980_v14, %v4040_v22  ;;  %1705 = vmax.xlane.f32.xlu0 %v1704_v12  ;;  %v1282_v52 = vmul.f32 %v898_v24, %v898_v24  ;;  %v522_v37 = vsub.f32 %v3983_v11, %v4044_v40  ;;  %v4066_v12 = vld [vmem:[#allocation6 + $0x78] sm:$0xff] }
  0xc7   : > { %v1283_v53 = vmul.f32 %v899_v56, %v899_v56  ;;  %v1284_v41 = vmul.f32 %v900_v29, %v900_v29  ;;  %v1279_v62 = vmul.f32 %v895_v33, %v895_v33  ;;  %v1280_v21 = vmul.f32 %v896_v47, %v896_v47  ;;  %v4070_v33 = vld [vmem:[#allocation6 + $0x80] sm:$0xff] }
  0xc8   : > { %v1281_v63 = vmul.f32 %v897_v26, %v897_v26  ;;  %v904_v43 = vmul.f32 %v4048_v10, %v520_v3  ;;  %v905_v50 = vmul.f32 %v4051_v48, %v521_v7  ;;  %v906_v1 = vmul.f32 %v4054_v49, %v522_v37  ;;  %v4074_v26 = vld [vmem:[#allocation6 + $0x88] sm:$0xff] }
  0xc9   : > { %v1715_v42 = vmax.f32 %v1282_v52, %v1283_v53  ;;  %v517_v5 = vsub.f32 %v3977_v59, %v3843_v34  ;;  %v1711_v13 = vmax.f32 %v1279_v62, %v1280_v21  ;;  %v518_v9 = vsub.f32 %v3980_v14, %v3848_v27  ;;  %v4081_v62 = vld [vmem:[#allocation6 + $0x60] sm:$0xff] }
  0xca   : > { %v1288_v51 = vmul.f32 %v904_v43, %v904_v43  ;;  %v519_v32 = vsub.f32 %v3983_v11, %v3852_v18  ;;  %v1289_v54 = vmul.f32 %v905_v50, %v905_v50  ;;  %v1290_v0 = vmul.f32 %v906_v1, %v906_v1  ;;  %v4085_v43 = vld [vmem:[#allocation8 + $0x80] sm:$0xff]  ;;  %v4088_v50 = vld [vmem:[#allocation8 + $0x88] sm:$0xff] }
  0xcb   : > { %v1716_v46 = vmax.f32 %v1715_v42, %v1284_v41  ;;  %v901_v6 = vmul.f32 %v3856_v20, %v517_v5  ;;  %v1712_v58 = vmax.f32 %v1711_v13, %v1281_v63  ;;  %v902_v16 = vmul.f32 %v3859_v55, %v518_v9  ;;  %v4078_v41 = vld [vmem:[#allocation8 + $0x78] sm:$0xff]  ;;  %v4091_v5 = vld [vmem:[#allocation6 + $0x68] sm:$0xff] }
  0xcc   : > { %v903_v3 = vmul.f32 %v3864_v23, %v519_v32  ;;  %v526_v24 = vsub.f32 %v3977_v59, %v4066_v12  ;;  %v1723_v56 = vmax.f32 %v1288_v51, %v1289_v54  ;;  %v527_v47 = vsub.f32 %v3980_v14, %v4070_v33  ;;  %v4095_v32 = vld [vmem:[#allocation6 + $0x70] sm:$0xff]  ;;  %v4099_v54 = vld [vmem:[#allocation8 + $0x60] sm:$0xff] }
  0xcd   : > { %1717 = vmax.xlane.f32.xlu1 %v1716_v46  ;;  %v1285_v29 = vmul.f32 %v901_v6, %v901_v6  ;;  %v528_v7 = vsub.f32 %v3983_v11, %v4074_v26  ;;  %1713 = vmax.xlane.f32.xlu0 %v1712_v58  ;;  %v1286_v52 = vmul.f32 %v902_v16, %v902_v16  ;;  %v4102_v16 = vld [vmem:[#allocation8 + $0x68] sm:$0xff] }
  0xce   : > { %v1287_v53 = vmul.f32 %v903_v3, %v903_v3  ;;  %v910_v37 = vmul.f32 %v4078_v41, %v526_v24  ;;  %v523_v21 = vsub.f32 %v3977_v59, %v4081_v62  ;;  %v1724_v63 = vmax.f32 %v1723_v56, %v1290_v0  ;;  %6200 = vst [vmem:[#allocation20_spill] sm:$0xff] %v4099_v54  ;;  %v4105_v24 = vld [vmem:[#allocation6 + $0xa8] sm:$0xff] }
  0xcf   : > { %v911_v42 = vmul.f32 %v4085_v43, %v527_v47  ;;  %v912_v1 = vmul.f32 %v4088_v50, %v528_v7  ;;  %v524_v13 = vsub.f32 %v3980_v14, %v4091_v5  ;;  %v1719_v51 = vmax.f32 %v1285_v29, %v1286_v52  ;;  %6201 = vst [vmem:[#allocation17_spill] sm:$0xff] %v4102_v16  ;;  %v4109_v47 = vld [vmem:[#allocation8 + $0x70] sm:$0xff] }
  0xd0   : > { %v1294_v9 = vmul.f32 %v910_v37, %v910_v37  ;;  %v525_v46 = vsub.f32 %v3983_v11, %v4095_v32  ;;  %v907_v0 = vmul.f32 %v4099_v54, %v523_v21  ;;  %6202 = vst [vmem:[#allocation18_spill] sm:$0xff] %v4105_v24  ;;  %v532_v56 = vsub.f32 %v3977_v59, %v4105_v24  ;;  %v4112_v37 = vld [vmem:[#allocation6 + $0xb0] sm:$0xff]  ;;  %v4134_v54 = vld [vmem:[#allocation8 + $0xb8] sm:$0xff] }
  0xd1   : > { %1725 = vmax.xlane.f32.xlu1 %v1724_v63  ;;  %v1295_v6 = vmul.f32 %v911_v42, %v911_v42  ;;  %v1296_v58 = vmul.f32 %v912_v1, %v912_v1  ;;  %v908_v3 = vmul.f32 %v4102_v16, %v524_v13  ;;  %v1720_v29 = vmax.f32 %v1719_v51, %v1287_v53  ;;  %v4116_v1 = vld [vmem:[#allocation6 + $0xb8] sm:$0xff]  ;;  %v4120_v16 = vld [vmem:[#allocation8 + $0xa8] sm:$0xff] }
  0xd2   : > { %6203 = vst [vmem:[#allocation24_spill] sm:$0xff] %v4109_v47  ;;  %v909_v7 = vmul.f32 %v4109_v47, %v525_v46  ;;  %v1291_v52 = vmul.f32 %v907_v0, %v907_v0  ;;  %6204 = vst [vmem:[#allocation26_spill] sm:$0xff] %v4112_v37  ;;  %v533_v21 = vsub.f32 %v3980_v14, %v4112_v37  ;;  %v4123_v46 = vld [vmem:[#allocation8 + $0xb0] sm:$0xff] }
  0xd3   : > { %v1731_v63 = vmax.f32 %v1294_v9, %v1295_v6  ;;  %v1292_v42 = vmul.f32 %v908_v3, %v908_v3  ;;  %6205 = vst [vmem:[#allocation25_spill] sm:$0xff] %v4116_v1  ;;  %v534_v13 = vsub.f32 %v3983_v11, %v4116_v1  ;;  %6206 = vst [vmem:[#allocation28_spill] sm:$0xff] %v4120_v16  ;;  %1721 = vmax.xlane.f32.xlu0 %v1720_v29  ;;  %v4126_v47 = vld [vmem:[#allocation6 + $0x90] sm:$0xff]  ;;  %v4130_v6 = vld [vmem:[#allocation6 + $0x98] sm:$0xff] }
  0xd4   : > { %v916_v53 = vmul.f32 %v4120_v16, %v532_v56  ;;  %v1293_v51 = vmul.f32 %v909_v7, %v909_v7  ;;  %6207 = vst [vmem:[#allocation27_spill] sm:$0xff] %v4123_v46  ;;  %v917_v0 = vmul.f32 %v4123_v46, %v533_v21  ;;  %6208 = vst [vmem:[#allocation29_spill] sm:$0xff] %v4126_v47  ;;  %v4137_v7 = vpop.xlane.xlu0 %1521  ;;  %v4139_v46 = vld [vmem:[#allocation6 + $0xa0] sm:$0xff]  ;;  %v4143_v16 = vld [vmem:[#allocation8 + $0x90] sm:$0xff] }
  0xd5   : > { %v529_v9 = vsub.f32 %v3977_v59, %v4126_v47  ;;  %6209 = vst [vmem:[#allocation30_spill] sm:$0xff] %v4130_v6  ;;  %v530_v3 = vsub.f32 %v3980_v14, %v4130_v6  ;;  %v1732_v1 = vmax.f32 %v1731_v63, %v1296_v58  ;;  %v1727_v37 = vmax.f32 %v1291_v52, %v1292_v42  ;;  %v4146_v6 = vld [vmem:[#allocation8 + $0x98] sm:$0xff] }
  0xd6   : > { %v918_v56 = vmul.f32 %v4134_v54, %v534_v13  ;;  %v1300_v29 = vmul.f32 %v916_v53, %v916_v53  ;;  %6210 = vst [vmem:[#allocation31_spill] sm:$0xff] %v4137_v7  ;;  %v1301_v21 = vmul.f32 %v917_v0, %v917_v0  ;;  %6211 = vst [vmem:[#allocation32_spill] sm:$0xff] %v4139_v46  ;;  %v4149_v42 = vld [vmem:[#allocation6 + $0xd8] sm:$0xff]  ;;  %v4153_v53 = vld [vmem:[#allocation6 + $0xe0] sm:$0xff]  ;;  %v4157_v7 = vpop.xlane.xlu1 %1529 }
  0xd7   : > { %v531_v47 = vsub.f32 %v3983_v11, %v4139_v46  ;;  %6212 = vst [vmem:[#allocation33_spill] sm:$0xff] %v4143_v16  ;;  %v913_v24 = vmul.f32 %v4143_v16, %v529_v9  ;;  %6213 = vst [vmem:[#allocation34_spill] sm:$0xff] %v4146_v6  ;;  %v914_v58 = vmul.f32 %v4146_v6, %v530_v3  ;;  %1733 = vmax.xlane.f32.xlu1 %v1732_v1  ;;  %v4159_v16 = vld [vmem:[#allocation8 + $0xa0] sm:$0xff] }
  0xd8   : > { %v1728_v52 = vmax.f32 %v1727_v37, %v1293_v51  ;;  %v1302_v63 = vmul.f32 %v918_v56, %v918_v56  ;;  %6214 = vst [vmem:[#allocation35_spill] sm:$0xff] %v4149_v42  ;;  %v538_v13 = vsub.f32 %v3977_v59, %v4149_v42  ;;  %6215 = vst [vmem:[#allocation36_spill] sm:$0xff] %v4153_v53  ;;  %v4162_v51 = vld [vmem:[#allocation6 + $0xe8] sm:$0xff]  ;;  %v4166_v42 = vld [vmem:[#allocation8 + $0xd8] sm:$0xff] }
  0xd9   : > { %v539_v0 = vsub.f32 %v3980_v14, %v4153_v53  ;;  %6216 = vst [vmem:[#allocation37_spill] sm:$0xff] %v4157_v7  ;;  %v1739_v9 = vmax.f32 %v1300_v29, %v1301_v21  ;;  %6217 = vst [vmem:[#allocation38_spill] sm:$0xff] %v4159_v16  ;;  %v915_v3 = vmul.f32 %v4159_v16, %v531_v47  ;;  %v4169_v53 = vld [vmem:[#allocation8 + $0xe0] sm:$0xff]  ;;  %v4176_v7 = vld [vmem:[#allocation6 + $0xc8] sm:$0xff] }
  0xda   : > { %v1297_v1 = vmul.f32 %v913_v24, %v913_v24  ;;  %v1298_v37 = vmul.f32 %v914_v58, %v914_v58  ;;  %1729 = vmax.xlane.f32.xlu0 %v1728_v52  ;;  %6218 = vst [vmem:[#allocation39_spill] sm:$0xff] %v4162_v51  ;;  %v540_v56 = vsub.f32 %v3983_v11, %v4162_v51  ;;  %6219 = vst [vmem:[#allocation40_spill] sm:$0xff] %v4166_v42  ;;  %v4172_v21 = vld [vmem:[#allocation6 + $0xc0] sm:$0xff]  ;;  %v4180_v16 = vld [vmem:[#allocation8 + $0xe8] sm:$0xff] }
  0xdb   : > { %v922_v6 = vmul.f32 %v4166_v42, %v538_v13  ;;  %6220 = vst [vmem:[#allocation41_spill] sm:$0xff] %v4169_v53  ;;  %v923_v29 = vmul.f32 %v4169_v53, %v539_v0  ;;  %6221 = vst [vmem:[#allocation42_spill] sm:$0xff] %v4172_v21  ;;  %v535_v24 = vsub.f32 %v3977_v59, %v4172_v21  ;;  %v4183_v0 = vld [vmem:[#allocation6 + $0xd0] sm:$0xff]  ;;  %v4187_v21 = vpop.xlane.xlu0 %1525 }
  0xdc   : > { %v1740_v47 = vmax.f32 %v1739_v9, %v1302_v63  ;;  %v1299_v58 = vmul.f32 %v915_v3, %v915_v3  ;;  %v1735_v52 = vmax.f32 %v1297_v1, %v1298_v37  ;;  %6222 = vst [vmem:[#allocation44_spill] sm:$0xff] %v4176_v7  ;;  %v536_v51 = vsub.f32 %v3980_v14, %v4176_v7  ;;  %v4189_v9 = vld [vmem:[#allocation8 + $0xc0] sm:$0xff]  ;;  %v4192_v1 = vld [vmem:[#allocation8 + $0xc8] sm:$0xff]  ;;  %v4225_v7 = vld [vmem:[#allocation6 + $0xf8] sm:$0xff] }
  0xdd   : > { %6223 = vst [vmem:[#allocation43_spill] sm:$0xff] %v4180_v16  ;;  %v924_v13 = vmul.f32 %v4180_v16, %v540_v56  ;;  %v1306_v42 = vmul.f32 %v922_v6, %v922_v6  ;;  %v1307_v46 = vmul.f32 %v923_v29, %v923_v29  ;;  %6224 = vst [vmem:[#allocation46_spill] sm:$0xff] %v4183_v0  ;;  %v4195_v56 = vld [vmem:[#allocation6 + $0x108] sm:$0xff] }
  0xde   : > { %v537_v53 = vsub.f32 %v3983_v11, %v4183_v0  ;;  %6225 = vst [vmem:[#allocation45_spill] sm:$0xff] %v4187_v21  ;;  %1741 = vmax.xlane.f32.xlu1 %v1740_v47  ;;  %v1736_v63 = vmax.f32 %v1735_v52, %v1299_v58  ;;  %6226 = vst [vmem:[#allocation47_spill] sm:$0xff] %v4189_v9  ;;  %v919_v3 = vmul.f32 %v4189_v9, %v535_v24  ;;  %v4199_v0 = vld [vmem:[#allocation8 + $0xd0] sm:$0xff]  ;;  %v4206_v52 = vpop.xlane.xlu1 %1533 }
  0xdf   : > { %6227 = vst [vmem:[#allocation48_spill] sm:$0xff] %v4192_v1  ;;  %v920_v37 = vmul.f32 %v4192_v1, %v536_v51  ;;  %6228 = vst [vmem:[#allocation50_spill] sm:$0xff] %v4195_v56  ;;  %v544_v6 = vsub.f32 %v3977_v59, %v4195_v56  ;;  %v1308_v29 = vmul.f32 %v924_v13, %v924_v13  ;;  %v4202_v58 = vld [vmem:[#allocation6 + $0x110] sm:$0xff]  ;;  %v4208_v1 = vld [vmem:[#allocation6 + $0x118] sm:$0xff] }
  0xe0   : > { %v1747_v16 = vmax.f32 %v1306_v42, %v1307_v46  ;;  %6229 = vst [vmem:[#allocation49_spill] sm:$0xff] %v4199_v0  ;;  %v921_v47 = vmul.f32 %v4199_v0, %v537_v53  ;;  %6230 = vst [vmem:[#allocation52_spill] sm:$0xff] %v4202_v58  ;;  %v545_v24 = vsub.f32 %v3980_v14, %v4202_v58  ;;  %1737 = vmax.xlane.f32.xlu0 %v1736_v63  ;;  %v4212_v46 = vld [vmem:[#allocation8 + $0x108] sm:$0xff]  ;;  %v4215_v0 = vld [vmem:[#allocation8 + $0x110] sm:$0xff] }
  0xe1   : > { %6231 = vst [vmem:[#allocation51_spill] sm:$0xff] %v4206_v52  ;;  %v1303_v51 = vmul.f32 %v919_v3, %v919_v3  ;;  %v1304_v21 = vmul.f32 %v920_v37, %v920_v37  ;;  %6232 = vst [vmem:[#allocation53_spill] sm:$0xff] %v4208_v1  ;;  %v546_v13 = vsub.f32 %v3983_v11, %v4208_v1  ;;  %v4218_v9 = vld [vmem:[#allocation6 + $0xf0] sm:$0xff]  ;;  %v4222_v37 = vld [vmem:[#allocation8 + $0x118] sm:$0xff] }
  0xe2   : > { %6233 = vst [vmem:[#allocation54_spill] sm:$0xff] %v4212_v46  ;;  %v928_v42 = vmul.f32 %v4212_v46, %v544_v6  ;;  %v1748_v53 = vmax.f32 %v1747_v16, %v1308_v29  ;;  %v1305_v56 = vmul.f32 %v921_v47, %v921_v47  ;;  %6234 = vst [vmem:[#allocation55_spill] sm:$0xff] %v4215_v0  ;;  %v4229_v29 = vld [vmem:[#allocation6 + $0x100] sm:$0xff] }
  0xe3   : > { %v929_v58 = vmul.f32 %v4215_v0, %v545_v24  ;;  %6235 = vst [vmem:[#allocation56_spill] sm:$0xff] %v4218_v9  ;;  %v541_v63 = vsub.f32 %v3977_v59, %v4218_v9  ;;  %v1743_v3 = vmax.f32 %v1303_v51, %v1304_v21  ;;  %6236 = vst [vmem:[#allocation57_spill] sm:$0xff] %v4222_v37  ;;  %v4233_v24 = vld [vmem:[#allocation8 + $0xf0] sm:$0xff]  ;;  %v4236_v51 = vld [vmem:[#allocation6 + $0x138] sm:$0xff] }
  0xe4   : > { %v930_v52 = vmul.f32 %v4222_v37, %v546_v13  ;;  %v1312_v1 = vmul.f32 %v928_v42, %v928_v42  ;;  %6237 = vst [vmem:[#allocation58_spill] sm:$0xff] %v4225_v7  ;;  %v542_v16 = vsub.f32 %v3980_v14, %v4225_v7  ;;  %1749 = vmax.xlane.f32.xlu1 %v1748_v53  ;;  %6238 = vst [vmem:[#allocation59_spill] sm:$0xff] %v4229_v29  ;;  %v4240_v42 = vpop.xlane.xlu0 %1537  ;;  %v4242_v53 = vld [vmem:[#allocation8 + $0xf8] sm:$0xff]  ;;  %v4245_v0 = vld [vmem:[#allocation6 + $0x140] sm:$0xff] }
  0xe5   : > { %v1313_v6 = vmul.f32 %v929_v58, %v929_v58  ;;  %v543_v47 = vsub.f32 %v3983_v11, %v4229_v29  ;;  %6239 = vst [vmem:[#allocation60_spill] sm:$0xff] %v4233_v24  ;;  %v925_v21 = vmul.f32 %v4233_v24, %v541_v63  ;;  %6240 = vst [vmem:[#allocation61_spill] sm:$0xff] %v4236_v51  ;;  %v4249_v63 = vld [vmem:[#allocation8 + $0x100] sm:$0xff] }
  0xe6   : > { %v550_v13 = vsub.f32 %v3977_v59, %v4236_v51  ;;  %6241 = vst [vmem:[#allocation62_spill] sm:$0xff] %v4240_v42  ;;  %v1744_v37 = vmax.f32 %v1743_v3, %v1305_v56  ;;  %v1314_v7 = vmul.f32 %v930_v52, %v930_v52  ;;  %6242 = vst [vmem:[#allocation64_spill] sm:$0xff] %v4242_v53  ;;  %v4252_v51 = vld [vmem:[#allocation6 + $0x148] sm:$0xff]  ;;  %v4256_v52 = vpop.xlane.xlu1 %1541 }
  0xe7   : > { %v926_v58 = vmul.f32 %v4242_v53, %v542_v16  ;;  %6243 = vst [vmem:[#allocation65_spill] sm:$0xff] %v4245_v0  ;;  %v551_v29 = vsub.f32 %v3980_v14, %v4245_v0  ;;  %v1755_v9 = vmax.f32 %v1312_v1, %v1313_v6  ;;  %6244 = vst [vmem:[#allocation66_spill] sm:$0xff] %v4249_v63  ;;  %v4258_v16 = vld [vmem:[#allocation8 + $0x138] sm:$0xff]  ;;  %v4261_v0 = vld [vmem:[#allocation8 + $0x140] sm:$0xff] }
  0xe8   : > { %v927_v24 = vmul.f32 %v4249_v63, %v543_v47  ;;  %v1309_v46 = vmul.f32 %v925_v21, %v925_v21  ;;  %6245 = vst [vmem:[#allocation68_spill] sm:$0xff] %v4252_v51  ;;  %v552_v56 = vsub.f32 %v3983_v11, %v4252_v51  ;;  %6246 = vst [vmem:[#allocation67_spill] sm:$0xff] %v4256_v52  ;;  %1745 = vmax.xlane.f32.xlu0 %v1744_v37  ;;  %v4264_v6 = vld [vmem:[#allocation6 + $0x120] sm:$0xff]  ;;  %v4268_v51 = vld [vmem:[#allocation8 + $0x148] sm:$0xff] }
  0xe9   : > { %v1310_v3 = vmul.f32 %v926_v58, %v926_v58  ;;  %6247 = vst [vmem:[#allocation70_spill] sm:$0xff] %v4258_v16  ;;  %v934_v42 = vmul.f32 %v4258_v16, %v550_v13  ;;  %6248 = vst [vmem:[#allocation69_spill] sm:$0xff] %v4261_v0  ;;  %v935_v1 = vmul.f32 %v4261_v0, %v551_v29  ;;  %v4271_v58 = vld [vmem:[#allocation6 + $0x128] sm:$0xff]  ;;  %v4275_v29 = vld [vmem:[#allocation6 + $0x130] sm:$0xff] }
  0xea   : > { %6249 = vst [vmem:[#allocation71_spill] sm:$0xff] %v4264_v6  ;;  %v547_v47 = vsub.f32 %v3977_v59, %v4264_v6  ;;  %v1756_v21 = vmax.f32 %v1755_v9, %v1314_v7  ;;  %v1311_v63 = vmul.f32 %v927_v24, %v927_v24  ;;  %6250 = vst [vmem:[#allocation72_spill] sm:$0xff] %v4268_v51  ;;  %v4279_v9 = vld [vmem:[#allocation8 + $0x120] sm:$0xff]  ;;  %v4285_v6 = vld [vmem:[#allocation6 + $0x168] sm:$0xff] }
  0xeb   : > { %v936_v37 = vmul.f32 %v4268_v51, %v552_v56  ;;  %6251 = vst [vmem:[#allocation73_spill] sm:$0xff] %v4271_v58  ;;  %v548_v13 = vsub.f32 %v3980_v14, %v4271_v58  ;;  %v1751_v52 = vmax.f32 %v1309_v46, %v1310_v3  ;;  %v1318_v16 = vmul.f32 %v934_v42, %v934_v42  ;;  %v4282_v56 = vld [vmem:[#allocation8 + $0x128] sm:$0xff]  ;;  %v4289_v42 = vpop.xlane.xlu0 %1545 }
  0xec   : > { %v1319_v53 = vmul.f32 %v935_v1, %v935_v1  ;;  %6252 = vst [vmem:[#allocation19_spill] sm:$0xff] %v4275_v29  ;;  %v549_v0 = vsub.f32 %v3983_v11, %v4275_v29  ;;  %1757 = vmax.xlane.f32.xlu1 %v1756_v21  ;;  %6253 = vst [vmem:[#allocation14_spill] sm:$0xff] %v4279_v9  ;;  %v931_v24 = vmul.f32 %v4279_v9, %v547_v47  ;;  %v4291_v29 = vld [vmem:[#allocation8 + $0x130] sm:$0xff]  ;;  %v4302_v58 = vld [vmem:[#allocation8 + $0x168] sm:$0xff] }
  0xed   : > { %v1320_v7 = vmul.f32 %v936_v37, %v936_v37  ;;  %6254 = vst [vmem:[#allocation15_spill] sm:$0xff] %v4282_v56  ;;  %v932_v51 = vmul.f32 %v4282_v56, %v548_v13  ;;  %6255 = vst [vmem:[#allocation79_spill] sm:$0xff] %v4285_v6  ;;  %v556_v46 = vsub.f32 %v3977_v59, %v4285_v6  ;;  %v4294_v37 = vld [vmem:[#allocation6 + $0x170] sm:$0xff]  ;;  %v4298_v56 = vld [vmem:[#allocation6 + $0x178] sm:$0xff] }
  0xee   : > { %6256 = vst [vmem:[#allocation80_spill] sm:$0xff] %v4289_v42  ;;  %v1752_v3 = vmax.f32 %v1751_v52, %v1311_v63  ;;  %v1763_v1 = vmax.f32 %v1318_v16, %v1319_v53  ;;  %6257 = vst [vmem:[#allocation81_spill] sm:$0xff] %v4291_v29  ;;  %v933_v21 = vmul.f32 %v4291_v29, %v549_v0  ;;  %v4305_v63 = vpop.xlane.xlu1 %1549  ;;  %v4307_v16 = vld [vmem:[#allocation8 + $0x170] sm:$0xff] }
  0xef   : > { %6258 = vst [vmem:[#allocation82_spill] sm:$0xff] %v4294_v37  ;;  %v557_v47 = vsub.f32 %v3980_v14, %v4294_v37  ;;  %v1315_v9 = vmul.f32 %v931_v24, %v931_v24  ;;  %v1316_v13 = vmul.f32 %v932_v51, %v932_v51  ;;  %6259 = vst [vmem:[#allocation83_spill] sm:$0xff] %v4298_v56  ;;  %v4310_v24 = vld [vmem:[#allocation6 + $0x150] sm:$0xff] }
  0xf0   : > { %v558_v6 = vsub.f32 %v3983_v11, %v4298_v56  ;;  %6260 = vst [vmem:[#allocation84_spill] sm:$0xff] %v4302_v58  ;;  %v940_v53 = vmul.f32 %v4302_v58, %v556_v46  ;;  %6261 = vst [vmem:[#allocation85_spill] sm:$0xff] %v4305_v63  ;;  %1753 = vmax.xlane.f32.xlu0 %v1752_v3  ;;  %v1764_v0 = vmax.f32 %v1763_v1, %v1320_v7  ;;  %v4314_v56 = vld [vmem:[#allocation8 + $0x178] sm:$0xff]  ;;  %v4321_v1 = vld [vmem:[#allocation6 + $0x160] sm:$0xff] }
  0xf1   : > { %v1317_v52 = vmul.f32 %v933_v21, %v933_v21  ;;  %v941_v42 = vmul.f32 %v4307_v16, %v557_v47  ;;  %v553_v51 = vsub.f32 %v3977_v59, %v4310_v24  ;;  %v1759_v37 = vmax.f32 %v1315_v9, %v1316_v13  ;;  %6262 = vst [vmem:[#allocation86_spill] sm:$0xff] %v4314_v56  ;;  %v4317_v58 = vld [vmem:[#allocation6 + $0x158] sm:$0xff]  ;;  %v4325_v47 = vld [vmem:[#allocation8 + $0x150] sm:$0xff]  ;;  %v4335_v63 = vld [vmem:[#allocation8 + $0x160] sm:$0xff] }
  0xf2   : > { %v942_v29 = vmul.f32 %v4314_v56, %v558_v6  ;;  %v1324_v46 = vmul.f32 %v940_v53, %v940_v53  ;;  %v554_v7 = vsub.f32 %v3980_v14, %v4317_v58  ;;  %1765 = vmax.xlane.f32.xlu1 %v1764_v0  ;;  %6263 = vst [vmem:[#allocation87_spill] sm:$0xff] %v4321_v1  ;;  %v4330_v53 = vld [vmem:[#allocation8 + $0x158] sm:$0xff]  ;;  %v4333_v0 = vpop.xlane.xlu0 %1553 }
  0xf3   : > { %v1325_v3 = vmul.f32 %v941_v42, %v941_v42  ;;  %v555_v21 = vsub.f32 %v3983_v11, %v4321_v1  ;;  %v937_v59 = vmul.f32 %v4325_v47, %v553_v51  ;;  %v213_v6 = vcombine.low %v3986_v17, %v3992_v44  ;;  %6264 = vst [vmem:[#allocation88_spill] sm:$0xff] %v4333_v0  ;;  %v4341_v17 = vpop.xlane.xlu1 %1557 }
  0xf4   : > { %v1760_v9 = vmax.f32 %v1759_v37, %v1317_v52  ;;  %v1326_v13 = vmul.f32 %v942_v29, %v942_v29  ;;  %v938_v14 = vmul.f32 %v4330_v53, %v554_v7  ;;  %6265 = vst [vmem:[#allocation89_spill] sm:$0xff] %v4341_v17 }
  0xf5   : > { %v1771_v42 = vmax.f32 %v1324_v46, %v1325_v3  ;;  %v939_v11 = vmul.f32 %v4335_v63, %v555_v21  ;;  %v1321_v56 = vmul.f32 %v937_v59, %v937_v59  ;;  %v4339_v1 = vrot.slane %v213_v6, %v6187_v31 }
  0xf6   : > { %1761 = vmax.xlane.f32.xlu0 %v1760_v9  ;;  %v1322_v51 = vmul.f32 %v938_v14, %v938_v14 }
  0xf7   : > { %v1772_v29 = vmax.f32 %v1771_v42, %v1326_v13  ;;  %v1323_v37 = vmul.f32 %v939_v11, %v939_v11  ;;  %v4345_v52 = vrot.slane %v4339_v1, %v6133_v35  ;;  %v4349_v46 = vrot.slane %v4339_v1, %v6135_v38  ;;  %v4369_v11 = vpop.xlane.xlu0 %1561 }
  0xf8   : > { %v1767_v7 = vmax.f32 %v1321_v56, %v1322_v51  ;;  %v4353_v3 = vrot.slane %v4339_v1, %v6136_v25  ;;  %6266 = vst [vmem:[#allocation90_spill] sm:$0xff] %v4369_v11  ;;  %v4381_v11 = vpop.xlane.xlu1 %1565 }
  0xf9   : > { %1773 = vmax.xlane.f32.xlu1 %v1772_v29  ;;  %v562_v21 = vsub.f32 %v4345_v52, %v3994_v57  ;;  %v563_v59 = vsub.f32 %v4349_v46, %v3998_v45  ;;  %v559_v6 = vsub.f32 %v4345_v52, %v4006_v28  ;;  %v560_v9 = vsub.f32 %v4349_v46, %v4010_v60 }
  0xfa   : > { %v1768_v13 = vmax.f32 %v1767_v7, %v1323_v37  ;;  %v564_v56 = vsub.f32 %v4353_v3, %v4002_v4  ;;  %v561_v14 = vsub.f32 %v4353_v3, %v4014_v61  ;;  %v568_v42 = vsub.f32 %v4345_v52, %v4018_v8  ;;  %6267 = vst [vmem:[#allocation91_spill] sm:$0xff] %v4381_v11 }
  0xfb   : > { %v946_v51 = vmul.f32 %v4022_v39, %v562_v21  ;;  %v947_v29 = vmul.f32 %v4025_v19, %v563_v59  ;;  %v943_v17 = vmul.f32 %v4031_v36, %v559_v6  ;;  %v944_v0 = vmul.f32 %v4034_v2, %v560_v9 }
  0xfc   : > { %1769 = vmax.xlane.f32.xlu0 %v1768_v13  ;;  %v948_v37 = vmul.f32 %v4028_v15, %v564_v56  ;;  %v945_v7 = vmul.f32 %v4037_v30, %v561_v14  ;;  %v569_v61 = vsub.f32 %v4349_v46, %v4040_v22  ;;  %v570_v8 = vsub.f32 %v4353_v3, %v4044_v40 }
  0xfd   : > { %v1330_v21 = vmul.f32 %v946_v51, %v946_v51  ;;  %v1331_v39 = vmul.f32 %v947_v29, %v947_v29  ;;  %v1327_v59 = vmul.f32 %v943_v17, %v943_v17  ;;  %v1328_v19 = vmul.f32 %v944_v0, %v944_v0  ;;  %v4392_v0 = vpop.xlane.xlu0 %1569 }
  0xfe   : > { %v1332_v6 = vmul.f32 %v948_v37, %v948_v37  ;;  %v1329_v36 = vmul.f32 %v945_v7, %v945_v7  ;;  %v952_v9 = vmul.f32 %v4048_v10, %v568_v42  ;;  %v953_v13 = vmul.f32 %v4051_v48, %v569_v61  ;;  %6268 = vst [vmem:[#allocation92_spill] sm:$0xff] %v4392_v0  ;;  %v4399_v7 = vpop.xlane.xlu1 %1573 }
  0xff   : > { %v1779_v56 = vmax.f32 %v1330_v21, %v1331_v39  ;;  %v1775_v14 = vmax.f32 %v1327_v59, %v1328_v19  ;;  %v954_v30 = vmul.f32 %v4054_v49, %v570_v8  ;;  %v565_v22 = vsub.f32 %v4345_v52, %v3843_v34  ;;  %6269 = vst [vmem:[#allocation93_spill] sm:$0xff] %v4399_v7  ;;  %v6270_v59 = vld [vmem:[#allocation18_spill] sm:$0xff] }
 0x100   : > { %v1336_v40 = vmul.f32 %v952_v9, %v952_v9  ;;  %v1337_v2 = vmul.f32 %v953_v13, %v953_v13  ;;  %v566_v51 = vsub.f32 %v4349_v46, %v3848_v27  ;;  %v567_v17 = vsub.f32 %v4353_v3, %v3852_v18 }
 0x101   : > { %v1780_v42 = vmax.f32 %v1779_v56, %v1332_v6  ;;  %v1776_v29 = vmax.f32 %v1775_v14, %v1329_v36  ;;  %v1338_v61 = vmul.f32 %v954_v30, %v954_v30  ;;  %v949_v39 = vmul.f32 %v3856_v20, %v565_v22  ;;  %v4416_v9 = vpop.xlane.xlu0 %1577  ;;  %v6273_v56 = vld [vmem:[#allocation17_spill] sm:$0xff] }
 0x102   : > { %v1787_v19 = vmax.f32 %v1336_v40, %v1337_v2  ;;  %v950_v8 = vmul.f32 %v3859_v55, %v566_v51  ;;  %v951_v34 = vmul.f32 %v3864_v23, %v567_v17  ;;  %v574_v37 = vsub.f32 %v4345_v52, %v4066_v12  ;;  %6271 = vst [vmem:[#allocation18_spill] sm:$0xff] %v4416_v9  ;;  %v6274_v17 = vld [vmem:[#allocation24_spill] sm:$0xff] }
 0x103   : > { %1781 = vmax.xlane.f32.xlu1 %v1780_v42  ;;  %1777 = vmax.xlane.f32.xlu0 %v1776_v29  ;;  %v1333_v27 = vmul.f32 %v949_v39, %v949_v39  ;;  %v575_v18 = vsub.f32 %v4349_v46, %v4070_v33  ;;  %v576_v36 = vsub.f32 %v4353_v3, %v4074_v26  ;;  %v6275_v29 = vld [vmem:[#allocation26_spill] sm:$0xff]  ;;  %v6276_v39 = vld [vmem:[#allocation25_spill] sm:$0xff] }
 0x104   : > { %v1788_v20 = vmax.f32 %v1787_v19, %v1338_v61  ;;  %v1334_v2 = vmul.f32 %v950_v8, %v950_v8  ;;  %v1335_v30 = vmul.f32 %v951_v34, %v951_v34  ;;  %v958_v55 = vmul.f32 %v4078_v41, %v574_v37  ;;  %v4425_v8 = vpop.xlane.xlu1 %1581 }
 0x105   : > { %v959_v23 = vmul.f32 %v4085_v43, %v575_v18  ;;  %v960_v22 = vmul.f32 %v4088_v50, %v576_v36  ;;  %v571_v40 = vsub.f32 %v4345_v52, %v4081_v62  ;;  %v572_v12 = vsub.f32 %v4349_v46, %v4091_v5  ;;  %v6272_v50 = vld [vmem:[#allocation20_spill] sm:$0xff] }
 0x106   : > { %v1783_v21 = vmax.f32 %v1333_v27, %v1334_v2  ;;  %v1342_v33 = vmul.f32 %v958_v55, %v958_v55  ;;  %v573_v26 = vsub.f32 %v4353_v3, %v4095_v32  ;;  %v580_v6 = vsub.f32 %v4345_v52, %v6270_v59  ;;  %6277 = vst [vmem:[#allocation20_spill] sm:$0xff] %v4425_v8  ;;  %v6278_v18 = vld [vmem:[#allocation28_spill] sm:$0xff]  ;;  %v6279_v2 = vld [vmem:[#allocation27_spill] sm:$0xff] }
 0x107   : > { %1789 = vmax.xlane.f32.xlu1 %v1788_v20  ;;  %v1343_v41 = vmul.f32 %v959_v23, %v959_v23  ;;  %v1344_v43 = vmul.f32 %v960_v22, %v960_v22  ;;  %v955_v13 = vmul.f32 %v6272_v50, %v571_v40  ;;  %v956_v14 = vmul.f32 %v6273_v56, %v572_v12  ;;  %v6280_v23 = vld [vmem:[#allocation29_spill] sm:$0xff] }
 0x108   : > { %v1784_v51 = vmax.f32 %v1783_v21, %v1335_v30  ;;  %v957_v42 = vmul.f32 %v6274_v17, %v573_v26  ;;  %v581_v61 = vsub.f32 %v4349_v46, %v6275_v29  ;;  %v582_v19 = vsub.f32 %v4353_v3, %v6276_v39  ;;  %v6281_v26 = vld [vmem:[#allocation30_spill] sm:$0xff] }
 0x109   : > { %v1795_v34 = vmax.f32 %v1342_v33, %v1343_v41  ;;  %v1339_v37 = vmul.f32 %v955_v13, %v955_v13  ;;  %v1340_v27 = vmul.f32 %v956_v14, %v956_v14  ;;  %v964_v36 = vmul.f32 %v6278_v18, %v580_v6  ;;  %v6282_v13 = vld [vmem:[#allocation32_spill] sm:$0xff]  ;;  %v6283_v14 = vld [vmem:[#allocation33_spill] sm:$0xff]  ;;  %v6285_v29 = vld [vmem:[#allocation34_spill] sm:$0xff] }
 0x10a   : > { %1785 = vmax.xlane.f32.xlu0 %v1784_v51  ;;  %v1341_v20 = vmul.f32 %v957_v42, %v957_v42  ;;  %v965_v55 = vmul.f32 %v6279_v2, %v581_v61  ;;  %v966_v30 = vmul.f32 %v4134_v54, %v582_v19  ;;  %v577_v22 = vsub.f32 %v4345_v52, %v6280_v23  ;;  %v4437_v42 = vpop.xlane.xlu0 %1585  ;;  %v6287_v2 = vld [vmem:[#allocation35_spill] sm:$0xff] }
 0x10b   : > { %v1796_v40 = vmax.f32 %v1795_v34, %v1344_v43  ;;  %v1791_v12 = vmax.f32 %v1339_v37, %v1340_v27  ;;  %v1348_v21 = vmul.f32 %v964_v36, %v964_v36  ;;  %v578_v59 = vsub.f32 %v4349_v46, %v6281_v26  ;;  %6284 = vst [vmem:[#allocation17_spill] sm:$0xff] %v4437_v42  ;;  %v6286_v43 = vld [vmem:[#allocation38_spill] sm:$0xff]  ;;  %v4441_v37 = vpop.xlane.xlu1 %1589  ;;  %v6291_v26 = vld [vmem:[#allocation40_spill] sm:$0xff] }
 0x10c   : > { %v1349_v33 = vmul.f32 %v965_v55, %v965_v55  ;;  %v1350_v41 = vmul.f32 %v966_v30, %v966_v30  ;;  %v579_v6 = vsub.f32 %v4353_v3, %v6282_v13  ;;  %v961_v51 = vmul.f32 %v6283_v14, %v577_v22  ;;  %v6288_v30 = vld [vmem:[#allocation36_spill] sm:$0xff] }
 0x10d   : > { %1797 = vmax.xlane.f32.xlu1 %v1796_v40  ;;  %v1792_v54 = vmax.f32 %v1791_v12, %v1341_v20  ;;  %v962_v61 = vmul.f32 %v6285_v29, %v578_v59  ;;  %v586_v55 = vsub.f32 %v4345_v52, %v6287_v2  ;;  %v587_v23 = vsub.f32 %v4349_v46, %v6288_v30  ;;  %v6289_v20 = vld [vmem:[#allocation39_spill] sm:$0xff]  ;;  %v6290_v12 = vld [vmem:[#allocation42_spill] sm:$0xff] }
 0x10e   : > { %v1803_v39 = vmax.f32 %v1348_v21, %v1349_v33  ;;  %v963_v19 = vmul.f32 %v6286_v43, %v579_v6  ;;  %v1345_v34 = vmul.f32 %v961_v51, %v961_v51  ;;  %v588_v40 = vsub.f32 %v4353_v3, %v6289_v20  ;;  %v6292_v33 = vld [vmem:[#allocation41_spill] sm:$0xff]  ;;  %v4455_v14 = vpop.xlane.xlu0 %1593  ;;  %v6297_v43 = vld [vmem:[#allocation47_spill] sm:$0xff] }
 0x10f   : > { %1793 = vmax.xlane.f32.xlu0 %v1792_v54  ;;  %v1346_v27 = vmul.f32 %v962_v61, %v962_v61  ;;  %v583_v21 = vsub.f32 %v4345_v52, %v6290_v12  ;;  %v970_v59 = vmul.f32 %v6291_v26, %v586_v55  ;;  %v971_v13 = vmul.f32 %v6292_v33, %v587_v23  ;;  %v6295_v54 = vld [vmem:[#allocation43_spill] sm:$0xff]  ;;  %v6296_v61 = vld [vmem:[#allocation46_spill] sm:$0xff]  ;;  %v4462_v55 = vpop.xlane.xlu1 %1597  ;;  %v6300_v23 = vld [vmem:[#allocation49_spill] sm:$0xff] }
 0x110   : > { %v1804_v18 = vmax.f32 %v1803_v39, %v1350_v41  ;;  %v1347_v36 = vmul.f32 %v963_v19, %v963_v19  ;;  %v6293_v41 = vld [vmem:[#allocation44_spill] sm:$0xff]  ;;  %6294 = vst [vmem:[#allocation24_spill] sm:$0xff] %v4455_v14  ;;  %v972_v29 = vmul.f32 %v6295_v54, %v588_v40  ;;  %v585_v39 = vsub.f32 %v4353_v3, %v6296_v61  ;;  %v6301_v40 = vld [vmem:[#allocation50_spill] sm:$0xff] }
 0x111   : > { %v1799_v22 = vmax.f32 %v1345_v34, %v1346_v27  ;;  %v584_v6 = vsub.f32 %v4349_v46, %v6293_v41  ;;  %v967_v19 = vmul.f32 %v6297_v43, %v583_v21  ;;  %v1354_v34 = vmul.f32 %v970_v59, %v970_v59  ;;  %6299 = vst [vmem:[#allocation26_spill] sm:$0xff] %v4462_v55  ;;  %v6302_v21 = vld [vmem:[#allocation52_spill] sm:$0xff] }
 0x112   : > { %1805 = vmax.xlane.f32.xlu1 %v1804_v18  ;;  %v1355_v27 = vmul.f32 %v971_v13, %v971_v13  ;;  %v6298_v18 = vld [vmem:[#allocation48_spill] sm:$0xff]  ;;  %v1356_v30 = vmul.f32 %v972_v29, %v972_v29  ;;  %v969_v20 = vmul.f32 %v6300_v23, %v585_v39  ;;  %v592_v33 = vsub.f32 %v4345_v52, %v6301_v40  ;;  %v4469_v13 = vpop.xlane.xlu0 %1601  ;;  %v6305_v29 = vld [vmem:[#allocation54_spill] sm:$0xff] }
 0x113   : > { %v1800_v51 = vmax.f32 %v1799_v22, %v1347_v36  ;;  %v968_v2 = vmul.f32 %v6298_v18, %v584_v6  ;;  %v1351_v12 = vmul.f32 %v967_v19, %v967_v19  ;;  %v593_v59 = vsub.f32 %v4349_v46, %v6302_v21  ;;  %6303 = vst [vmem:[#allocation25_spill] sm:$0xff] %v4469_v13  ;;  %v6304_v6 = vld [vmem:[#allocation53_spill] sm:$0xff]  ;;  %v6306_v39 = vld [vmem:[#allocation56_spill] sm:$0xff]  ;;  %v6308_v18 = vld [vmem:[#allocation58_spill] sm:$0xff] }
 0x114   : > { %v1811_v26 = vmax.f32 %v1354_v34, %v1355_v27  ;;  %v1353_v22 = vmul.f32 %v969_v20, %v969_v20  ;;  %v976_v61 = vmul.f32 %v6305_v29, %v592_v33  ;;  %v589_v43 = vsub.f32 %v4345_v52, %v6306_v39  ;;  %v6307_v34 = vld [vmem:[#allocation55_spill] sm:$0xff]  ;;  %v4481_v20 = vpop.xlane.xlu1 %1605  ;;  %v6312_v40 = vld [vmem:[#allocation60_spill] sm:$0xff] }
 0x115   : > { %1801 = vmax.xlane.f32.xlu0 %v1800_v51  ;;  %v1352_v36 = vmul.f32 %v968_v2, %v968_v2  ;;  %v594_v51 = vsub.f32 %v4353_v3, %v6304_v6  ;;  %v977_v27 = vmul.f32 %v6307_v34, %v593_v59  ;;  %v590_v2 = vsub.f32 %v4349_v46, %v6308_v18  ;;  %v6313_v6 = vld [vmem:[#allocation64_spill] sm:$0xff] }
 0x116   : > { %v1812_v41 = vmax.f32 %v1811_v26, %v1356_v30  ;;  %v6309_v30 = vld [vmem:[#allocation59_spill] sm:$0xff]  ;;  %6310 = vst [vmem:[#allocation28_spill] sm:$0xff] %v4481_v20  ;;  %v973_v33 = vmul.f32 %v6312_v40, %v589_v43  ;;  %v4487_v8 = vpop.xlane.xlu0 %1609  ;;  %v6355_v20 = vld [vmem:[#allocation16_spill] sm:$0xff] }
 0x117   : > { %v1807_v54 = vmax.f32 %v1351_v12, %v1352_v36  ;;  %v591_v23 = vsub.f32 %v4353_v3, %v6309_v30  ;;  %v6311_v12 = vld [vmem:[#allocation57_spill] sm:$0xff]  ;;  %v1360_v36 = vmul.f32 %v976_v61, %v976_v61  ;;  %v1361_v21 = vmul.f32 %v977_v27, %v977_v27  ;;  %6315 = vst [vmem:[#allocation27_spill] sm:$0xff] %v4487_v8  ;;  %v6319_v27 = vld [vmem:[#allocation68_spill] sm:$0xff]  ;;  %v6354_v8 = vld [vmem:[#allocation78_spill] sm:$0xff] }
 0x118   : > { %1813 = vmax.xlane.f32.xlu1 %v1812_v41  ;;  %v978_v26 = vmul.f32 %v6311_v12, %v594_v51  ;;  %v974_v41 = vmul.f32 %v6313_v6, %v590_v2  ;;  %v1357_v29 = vmul.f32 %v973_v33, %v973_v33  ;;  %v6316_v30 = vld [vmem:[#allocation61_spill] sm:$0xff]  ;;  %v600_v2 = vsub.f32 %v4353_v3, %v6319_v27  ;;  %v6327_v27 = vld [vmem:[#allocation15_spill] sm:$0xff] }
 0x119   : > { %v1808_v19 = vmax.f32 %v1807_v54, %v1353_v22  ;;  %v6314_v22 = vld [vmem:[#allocation66_spill] sm:$0xff]  ;;  %v1819_v39 = vmax.f32 %v1360_v36, %v1361_v21  ;;  %v598_v9 = vsub.f32 %v4345_v52, %v6316_v30  ;;  %v6317_v12 = vld [vmem:[#allocation65_spill] sm:$0xff]  ;;  %v6321_v36 = vld [vmem:[#allocation71_spill] sm:$0xff] }
 0x11a   : > { %v975_v54 = vmul.f32 %v6314_v22, %v591_v23  ;;  %v1362_v59 = vmul.f32 %v978_v26, %v978_v26  ;;  %v1358_v34 = vmul.f32 %v974_v41, %v974_v41  ;;  %v599_v43 = vsub.f32 %v4349_v46, %v6317_v12  ;;  %v6320_v23 = vld [vmem:[#allocation70_spill] sm:$0xff]  ;;  %v6322_v21 = vld [vmem:[#allocation69_spill] sm:$0xff] }
 0x11b   : > { %1809 = vmax.xlane.f32.xlu0 %v1808_v19  ;;  %v4493_v19 = vpop.xlane.xlu1 %1613  ;;  %v982_v26 = vmul.f32 %v6320_v23, %v598_v9  ;;  %v595_v40 = vsub.f32 %v4345_v52, %v6321_v36  ;;  %v6323_v41 = vld [vmem:[#allocation73_spill] sm:$0xff]  ;;  %v6326_v30 = vld [vmem:[#allocation14_spill] sm:$0xff] }
 0x11c   : > { %v1359_v18 = vmul.f32 %v975_v54, %v975_v54  ;;  %v1820_v51 = vmax.f32 %v1819_v39, %v1362_v59  ;;  %v1815_v61 = vmax.f32 %v1357_v29, %v1358_v34  ;;  %6318 = vst [vmem:[#allocation29_spill] sm:$0xff] %v4493_v19  ;;  %v983_v6 = vmul.f32 %v6322_v21, %v599_v43  ;;  %v6324_v54 = vld [vmem:[#allocation19_spill] sm:$0xff]  ;;  %v6325_v29 = vld [vmem:[#allocation72_spill] sm:$0xff]  ;;  %v6328_v36 = vld [vmem:[#allocation81_spill] sm:$0xff] }
 0x11d   : > { %v596_v22 = vsub.f32 %v4349_v46, %v6323_v41  ;;  %v597_v59 = vsub.f32 %v4353_v3, %v6324_v54  ;;  %v984_v39 = vmul.f32 %v6325_v29, %v600_v2  ;;  %v1366_v34 = vmul.f32 %v982_v26, %v982_v26  ;;  %v6331_v54 = vld [vmem:[#allocation79_spill] sm:$0xff]  ;;  %v6334_v29 = vld [vmem:[#allocation84_spill] sm:$0xff] }
 0x11e   : > { %1821 = vmax.xlane.f32.xlu1 %v1820_v51  ;;  %v1816_v33 = vmax.f32 %v1815_v61, %v1359_v18  ;;  %v979_v12 = vmul.f32 %v6326_v30, %v595_v40  ;;  %v1367_v9 = vmul.f32 %v983_v6, %v983_v6  ;;  %v4509_v18 = vpop.xlane.xlu0 %1617  ;;  %v604_v2 = vsub.f32 %v4345_v52, %v6331_v54 }
 0x11f   : > { %v980_v23 = vmul.f32 %v6327_v27, %v596_v22  ;;  %v981_v51 = vmul.f32 %v6328_v36, %v597_v59  ;;  %6329 = vst [vmem:[#allocation30_spill] sm:$0xff] %v4509_v18  ;;  %v1368_v61 = vmul.f32 %v984_v39, %v984_v39  ;;  %v4511_v0 = vpop.xlane.xlu1 %1621  ;;  %v6333_v22 = vld [vmem:[#allocation83_spill] sm:$0xff]  ;;  %v601_v39 = vsub.f32 %v4345_v52, %v4310_v24 }
 0x120   : > { %1817 = vmax.xlane.f32.xlu0 %v1816_v33  ;;  %v1363_v43 = vmul.f32 %v979_v12, %v979_v12  ;;  %v1827_v21 = vmax.f32 %v1366_v34, %v1367_v9  ;;  %6330 = vst [vmem:[#allocation32_spill] sm:$0xff] %v4511_v0  ;;  %v6332_v33 = vld [vmem:[#allocation82_spill] sm:$0xff]  ;;  %v606_v59 = vsub.f32 %v4353_v3, %v6333_v22  ;;  %v6335_v27 = vld [vmem:[#allocation87_spill] sm:$0xff] }
 0x121   : > { %v1364_v41 = vmul.f32 %v980_v23, %v980_v23  ;;  %v1365_v7 = vmul.f32 %v981_v51, %v981_v51  ;;  %v605_v6 = vsub.f32 %v4349_v46, %v6332_v33  ;;  %v988_v30 = vmul.f32 %v6334_v29, %v604_v2  ;;  %v6337_v51 = vld [vmem:[#allocation86_spill] sm:$0xff]  ;;  %v6339_v2 = vld [vmem:[#allocation21_spill] sm:$0xff] }
 0x122   : > { %v1828_v26 = vmax.f32 %v1827_v21, %v1368_v61  ;;  %v602_v9 = vsub.f32 %v4349_v46, %v4317_v58  ;;  %v603_v23 = vsub.f32 %v4353_v3, %v6335_v27  ;;  %v4527_v36 = vpop.xlane.xlu0 %1625  ;;  %v990_v61 = vmul.f32 %v6337_v51, %v606_v59  ;;  %v6344_v51 = vld [vmem:[#allocation63_spill] sm:$0xff] }
 0x123   : > { %v1823_v40 = vmax.f32 %v1363_v43, %v1364_v41  ;;  %v989_v12 = vmul.f32 %v4307_v16, %v605_v6  ;;  %6336 = vst [vmem:[#allocation33_spill] sm:$0xff] %v4527_v36  ;;  %v1372_v43 = vmul.f32 %v988_v30, %v988_v30  ;;  %v985_v21 = vmul.f32 %v4325_v47, %v601_v39  ;;  %v4533_v16 = vpop.xlane.xlu1 %1629  ;;  %v4618_v36 = vld [vmem:[#allocation8 + $0x40] sm:$0xff] }
 0x124   : > { %1829 = vmax.xlane.f32.xlu1 %v1828_v26  ;;  %v986_v24 = vmul.f32 %v4330_v53, %v602_v9  ;;  %v987_v52 = vmul.f32 %v4335_v63, %v603_v23  ;;  %6338 = vst [vmem:[#allocation34_spill] sm:$0xff] %v4533_v16  ;;  %v214_v26 = vcombine.high %v6339_v2, %v3992_v44 }
 0x125   : > { %v1824_v34 = vmax.f32 %v1823_v40, %v1365_v7  ;;  %v1373_v41 = vmul.f32 %v989_v12, %v989_v12  ;;  %v1374_v7 = vmul.f32 %v990_v61, %v990_v61  ;;  %v1369_v58 = vmul.f32 %v985_v21, %v985_v21  ;;  %v6342_v12 = vld [vmem:[#allocation22_spill] sm:$0xff] }
 0x126   : > { %v1370_v54 = vmul.f32 %v986_v24, %v986_v24  ;;  %v1371_v3 = vmul.f32 %v987_v52, %v987_v52  ;;  %v4537_v6 = vpop.xlane.xlu0 %1633  ;;  %v4540_v47 = vrot.slane %v214_v26, %v6187_v31  ;;  %v244_v63 = vcombine.high %v4339_v1, %v4339_v1  ;;  %v6346_v52 = vld [vmem:[#allocation75_spill] sm:$0xff] }
 0x127   : > { %1825 = vmax.xlane.f32.xlu0 %v1824_v34  ;;  %v1835_v46 = vmax.f32 %v1372_v43, %v1373_v41  ;;  %6340 = vst [vmem:[#allocation38_spill] sm:$0xff] %v4537_v6  ;;  %v4544_v22 = vpop.xlane.xlu1 %1637  ;;  %v6345_v43 = vld [vmem:[#allocation74_spill] sm:$0xff]  ;;  %v4615_v6 = vld [vmem:[#allocation8 + $0x38] sm:$0xff] }
 0x128   : > { %v1831_v33 = vmax.f32 %v1369_v58, %v1370_v54  ;;  %6341 = vst [vmem:[#allocation35_spill] sm:$0xff] %v4544_v22  ;;  %v4548_v59 = vrot.slane %v4540_v47, %v6133_v35  ;;  %v4552_v44 = vrot.slane %v4540_v47, %v6135_v38  ;;  %v4556_v29 = vrot.slane %v4540_v47, %v6136_v25  ;;  %v6347_v58 = vld [vmem:[#allocation76_spill] sm:$0xff]  ;;  %v6348_v54 = vld [vmem:[#allocation77_spill] sm:$0xff] }
 0x129   : > { %v1836_v40 = vmax.f32 %v1835_v46, %v1374_v7  ;;  %v4571_v27 = vrot.slane %v244_v63, %v6133_v35  ;;  %v4579_v24 = vrot.slane %v244_v63, %v6135_v38  ;;  %v4585_v2 = vrot.slane %v244_v63, %v6136_v25  ;;  %v4595_v63 = vld [vmem:[#allocation6 + $0x30] sm:$0xff] }
 0x12a   : > { %v1832_v53 = vmax.f32 %v1831_v33, %v1371_v3  ;;  %v610_v31 = vsub.f32 %v4548_v59, %v3994_v57  ;;  %v611_v1 = vsub.f32 %v4552_v44, %v3998_v45  ;;  %v612_v30 = vsub.f32 %v4556_v29, %v4002_v4  ;;  %v4573_v23 = vpop.xlane.xlu0 %1641 }
 0x12b   : > { %1837 = vmax.xlane.f32.xlu1 %v1836_v40  ;;  %v607_v39 = vsub.f32 %v4548_v59, %v4006_v28  ;;  %v608_v34 = vsub.f32 %v4552_v44, %v4010_v60  ;;  %v609_v9 = vsub.f32 %v4556_v29, %v6342_v12  ;;  %6343 = vst [vmem:[#allocation36_spill] sm:$0xff] %v4573_v23  ;;  %v4587_v26 = vpop.xlane.xlu1 %1645 }
 0x12c   : > { %1833 = vmax.xlane.f32.xlu0 %v1832_v53  ;;  %v994_v61 = vmul.f32 %v6344_v51, %v610_v31  ;;  %v995_v21 = vmul.f32 %v6345_v43, %v611_v1  ;;  %v996_v41 = vmul.f32 %v4028_v15, %v612_v30  ;;  %6349 = vst [vmem:[#allocation39_spill] sm:$0xff] %v4587_v26 }
 0x12d   : > { %v991_v7 = vmul.f32 %v6346_v52, %v607_v39  ;;  %v992_v46 = vmul.f32 %v6347_v58, %v608_v34  ;;  %v993_v3 = vmul.f32 %v6348_v54, %v609_v9  ;;  %v655_v23 = vsub.f32 %v4571_v27, %v4006_v28 }
 0x12e   : > { %v1378_v40 = vmul.f32 %v994_v61, %v994_v61  ;;  %v1379_v33 = vmul.f32 %v995_v21, %v995_v21  ;;  %v1380_v53 = vmul.f32 %v996_v41, %v996_v41  ;;  %v656_v39 = vsub.f32 %v4579_v24, %v4010_v60  ;;  %v4600_v41 = vld [vmem:[#allocation6 + $0x38] sm:$0xff] }
 0x12f   : > { %v1375_v31 = vmul.f32 %v991_v7, %v991_v7  ;;  %v1376_v1 = vmul.f32 %v992_v46, %v992_v46  ;;  %v1377_v30 = vmul.f32 %v993_v3, %v993_v3  ;;  %v657_v34 = vsub.f32 %v4585_v2, %v6342_v12  ;;  %v4604_v46 = vld [vmem:[#allocation6 + $0x40] sm:$0xff]  ;;  %v4621_v18 = vpop.xlane.xlu1 %1653 }
 0x130   : > { %v1843_v22 = vmax.f32 %v1378_v40, %v1379_v33  ;;  %v613_v9 = vsub.f32 %v4548_v59, %v4595_v63  ;;  %v1039_v21 = vmul.f32 %v6346_v52, %v655_v23  ;;  %v614_v7 = vsub.f32 %v4552_v44, %v4600_v41  ;;  %v4608_v40 = vpop.xlane.xlu0 %1649  ;;  %6351 = vst [vmem:[#allocation40_spill] sm:$0xff] %v4621_v18 }
 0x131   : > { %v1839_v61 = vmax.f32 %v1375_v31, %v1376_v1  ;;  %v615_v3 = vsub.f32 %v4556_v29, %v4604_v46  ;;  %6350 = vst [vmem:[#allocation42_spill] sm:$0xff] %v4608_v40  ;;  %v1040_v33 = vmul.f32 %v6347_v58, %v656_v39  ;;  %v1041_v26 = vmul.f32 %v6348_v54, %v657_v34  ;;  %v4612_v31 = vld [vmem:[#allocation8 + $0x30] sm:$0xff] }
 0x132   : > { %v1844_v12 = vmax.f32 %v1843_v22, %v1380_v53  ;;  %v997_v23 = vmul.f32 %v4612_v31, %v613_v9  ;;  %v1423_v11 = vmul.f32 %v1039_v21, %v1039_v21  ;;  %v998_v16 = vmul.f32 %v4615_v6, %v614_v7 }
 0x133   : > { %v1840_v1 = vmax.f32 %v1839_v61, %v1377_v30  ;;  %v999_v0 = vmul.f32 %v4618_v36, %v615_v3  ;;  %v1424_v22 = vmul.f32 %v1040_v33, %v1040_v33  ;;  %v1425_v53 = vmul.f32 %v1041_v26, %v1041_v26  ;;  %v6352_v61 = vld [vmem:[#allocation23_spill] sm:$0xff] }
 0x134   : > { %1845 = vmax.xlane.f32.xlu1 %v1844_v12  ;;  %v1381_v54 = vmul.f32 %v997_v23, %v997_v23  ;;  %v1382_v39 = vmul.f32 %v998_v16, %v998_v16  ;;  %v616_v21 = vsub.f32 %v4548_v59, %v6352_v61  ;;  %v4625_v19 = vpop.xlane.xlu0 %1657  ;;  %v617_v3 = vsub.f32 %v4552_v44, %v6354_v8 }
 0x135   : > { %1841 = vmax.xlane.f32.xlu0 %v1840_v1  ;;  %v1383_v34 = vmul.f32 %v999_v0, %v999_v0  ;;  %v1903_v9 = vmax.f32 %v1423_v11, %v1424_v22  ;;  %6353 = vst [vmem:[#allocation41_spill] sm:$0xff] %v4625_v19  ;;  %v618_v12 = vsub.f32 %v4556_v29, %v6355_v20  ;;  %v4634_v11 = vpop.xlane.xlu1 %1661 }
 0x136   : > { %v1847_v30 = vmax.f32 %v1381_v54, %v1382_v39  ;;  %v1000_v26 = vmul.f32 %v4048_v10, %v616_v21  ;;  %v658_v0 = vsub.f32 %v4571_v27, %v3994_v57  ;;  %6356 = vst [vmem:[#allocation44_spill] sm:$0xff] %v4634_v11  ;;  %v1001_v16 = vmul.f32 %v4051_v48, %v617_v3 }
 0x137   : > { %v1904_v7 = vmax.f32 %v1903_v9, %v1425_v53  ;;  %v1002_v23 = vmul.f32 %v4054_v49, %v618_v12  ;;  %v659_v1 = vsub.f32 %v4579_v24, %v3998_v45  ;;  %v660_v8 = vsub.f32 %v4585_v2, %v4002_v4 }
 0x138   : > { %v1848_v33 = vmax.f32 %v1847_v30, %v1383_v34  ;;  %v1384_v20 = vmul.f32 %v1000_v26, %v1000_v26  ;;  %v1042_v10 = vmul.f32 %v6344_v51, %v658_v0  ;;  %v1385_v22 = vmul.f32 %v1001_v16, %v1001_v16  ;;  %v4647_v49 = vpop.xlane.xlu0 %1665  ;;  %v3034_v26 = vld [vmem:[#allocation6 + $0x10] sm:$0xff] }
 0x139   : > { %1905 = vmax.xlane.f32.xlu1 %v1904_v7  ;;  %v1386_v53 = vmul.f32 %v1002_v23, %v1002_v23  ;;  %v1043_v57 = vmul.f32 %v6345_v43, %v659_v1  ;;  %v1044_v54 = vmul.f32 %v4028_v15, %v660_v8  ;;  %v246_v48 = vcombine.high %v4540_v47, %v4540_v47  ;;  %v4659_v43 = vpop.xlane.xlu1 %1669 }
 0x13a   : > { %1849 = vmax.xlane.f32.xlu0 %v1848_v33  ;;  %v1426_v39 = vmul.f32 %v1042_v10, %v1042_v10  ;;  %6357 = vst [vmem:[#allocation43_spill] sm:$0xff] %v4647_v49  ;;  %v1851_v45 = vmax.f32 %v1384_v20, %v1385_v22  ;;  %v661_v4 = vsub.f32 %v4571_v27, %v4595_v63  ;;  %6358 = vst [vmem:[#allocation46_spill] sm:$0xff] %v4659_v43 }
 0x13b   : > { %v1427_v34 = vmul.f32 %v1043_v57, %v1043_v57  ;;  %v662_v51 = vsub.f32 %v4579_v24, %v4600_v41  ;;  %v1428_v9 = vmul.f32 %v1044_v54, %v1044_v54  ;;  %v4654_v30 = vrot.slane %v246_v48, %v6133_v35 }
 0x13c   : > { %v4657_v15 = vrot.slane %v246_v48, %v6135_v38  ;;  %v1852_v47 = vmax.f32 %v1851_v45, %v1386_v53  ;;  %v4662_v21 = vrot.slane %v246_v48, %v6136_v25  ;;  %v663_v7 = vsub.f32 %v4585_v2, %v4604_v46  ;;  %v4676_v8 = vpop.xlane.xlu0 %1673 }
 0x13d   : > { %v1907_v61 = vmax.f32 %v1426_v39, %v1427_v34  ;;  %v703_v3 = vsub.f32 %v4654_v30, %v4006_v28  ;;  %v1045_v12 = vmul.f32 %v4612_v31, %v661_v4  ;;  %v1046_v38 = vmul.f32 %v4615_v6, %v662_v51  ;;  %6359 = vst [vmem:[#allocation47_spill] sm:$0xff] %v4676_v8 }
 0x13e   : > { %v704_v35 = vsub.f32 %v4657_v15, %v4010_v60  ;;  %1853 = vmax.xlane.f32.xlu1 %v1852_v47  ;;  %v705_v0 = vsub.f32 %v4662_v21, %v3034_v26  ;;  %v1047_v25 = vmul.f32 %v4618_v36, %v663_v7  ;;  %v3035_v60 = vld [vmem:[#allocation8 + $0x10] sm:$0xff]  ;;  %v619_v22 = vsub.f32 %v4548_v59, %v4081_v62  ;;  %v3037_v7 = vld [vmem:[#allocation6 + $0x20] sm:$0xff] }
 0x13f   : > { %v1908_v33 = vmax.f32 %v1907_v61, %v1428_v9  ;;  %v1087_v16 = vmul.f32 %v6346_v52, %v703_v3  ;;  %v1429_v1 = vmul.f32 %v1045_v12, %v1045_v12  ;;  %v1430_v28 = vmul.f32 %v1046_v38, %v1046_v38  ;;  %v4682_v52 = vpop.xlane.xlu1 %1677  ;;  %v3036_v9 = vld [vmem:[#allocation6 + $0x18] sm:$0xff]  ;;  %v3038_v3 = vld [vmem:[#allocation6 + $0x28] sm:$0xff]  ;;  %v3040_v26 = vld [vmem:[#allocation8 + $0x20] sm:$0xff] }
 0x140   : > { %v1088_v23 = vmul.f32 %v6347_v58, %v704_v35  ;;  %v1089_v20 = vmul.f32 %v3035_v60, %v705_v0  ;;  %v1431_v10 = vmul.f32 %v1047_v25, %v1047_v25  ;;  %v620_v39 = vsub.f32 %v4552_v44, %v4091_v5  ;;  %6360 = vst [vmem:[#allocation48_spill] sm:$0xff] %v4682_v52  ;;  %v3041_v25 = vld [vmem:[#allocation8 + $0x28] sm:$0xff] }
 0x141   : > { %1909 = vmax.xlane.f32.xlu0 %v1908_v33  ;;  %v1471_v53 = vmul.f32 %v1087_v16, %v1087_v16  ;;  %v1911_v54 = vmax.f32 %v1429_v1, %v1430_v28  ;;  %v621_v48 = vsub.f32 %v4556_v29, %v4095_v32  ;;  %v1003_v45 = vmul.f32 %v6272_v50, %v619_v22  ;;  %v3039_v50 = vld [vmem:[#allocation8 + $0x18] sm:$0xff]  ;;  %v4692_v33 = vpop.xlane.xlu0 %1681 }
 0x142   : > { %v1472_v57 = vmul.f32 %v1088_v23, %v1088_v23  ;;  %v1473_v58 = vmul.f32 %v1089_v20, %v1089_v20  ;;  %v1004_v51 = vmul.f32 %v6273_v56, %v620_v39  ;;  %v706_v62 = vsub.f32 %v4654_v30, %v3036_v9  ;;  %6361 = vst [vmem:[#allocation49_spill] sm:$0xff] %v4692_v33 }
 0x143   : > { %v1912_v4 = vmax.f32 %v1911_v54, %v1431_v10  ;;  %v1005_v47 = vmul.f32 %v6274_v17, %v621_v48  ;;  %v1387_v61 = vmul.f32 %v1003_v45, %v1003_v45  ;;  %v707_v5 = vsub.f32 %v4657_v15, %v3037_v7  ;;  %v4696_v28 = vpop.xlane.xlu1 %1685  ;;  %v4703_v54 = vld [vmem:[#allocation6 + $0x48] sm:$0xff]  ;;  %v4709_v45 = vld [vmem:[#allocation6 + $0x50] sm:$0xff]  ;;  %v4725_v7 = vld [vmem:[#allocation8 + $0x58] sm:$0xff] }
 0x144   : > { %v1967_v34 = vmax.f32 %v1471_v53, %v1472_v57  ;;  %v708_v35 = vsub.f32 %v4662_v21, %v3038_v3  ;;  %v1388_v32 = vmul.f32 %v1004_v51, %v1004_v51  ;;  %v1090_v38 = vmul.f32 %v3039_v50, %v706_v62  ;;  %6362 = vst [vmem:[#allocation50_spill] sm:$0xff] %v4696_v28  ;;  %v4730_v50 = vld [vmem:[#allocation6 + $0x60] sm:$0xff] }
 0x145   : > { %1913 = vmax.xlane.f32.xlu0 %v1912_v4  ;;  %v1389_v56 = vmul.f32 %v1005_v47, %v1005_v47  ;;  %v1091_v0 = vmul.f32 %v3040_v26, %v707_v5  ;;  %v709_v1 = vsub.f32 %v4654_v30, %v4595_v63  ;;  %v710_v10 = vsub.f32 %v4657_v15, %v4600_v41  ;;  %v4717_v4 = vld [vmem:[#allocation8 + $0x48] sm:$0xff]  ;;  %v4720_v9 = vpop.xlane.xlu0 %1689  ;;  %v4722_v47 = vld [vmem:[#allocation8 + $0x50] sm:$0xff] }
 0x146   : > { %v1968_v12 = vmax.f32 %v1967_v34, %v1473_v58  ;;  %v1092_v16 = vmul.f32 %v3041_v25, %v708_v35  ;;  %v1855_v17 = vmax.f32 %v1387_v61, %v1388_v32  ;;  %v1474_v23 = vmul.f32 %v1090_v38, %v1090_v38  ;;  %v4713_v34 = vld [vmem:[#allocation6 + $0x58] sm:$0xff]  ;;  %6363 = vst [vmem:[#allocation52_spill] sm:$0xff] %v4720_v9  ;;  %v4738_v25 = vld [vmem:[#allocation6 + $0x70] sm:$0xff] }
 0x147   : > { %v1475_v60 = vmul.f32 %v1091_v0, %v1091_v0  ;;  %v711_v22 = vsub.f32 %v4662_v21, %v4604_v46  ;;  %v1093_v57 = vmul.f32 %v4612_v31, %v709_v1  ;;  %v664_v39 = vsub.f32 %v4571_v27, %v4703_v54  ;;  %v4728_v35 = vpop.xlane.xlu1 %1693 }
 0x148   : > { %1969 = vmax.xlane.f32.xlu1 %v1968_v12  ;;  %v1476_v20 = vmul.f32 %v1092_v16, %v1092_v16  ;;  %v1856_v53 = vmax.f32 %v1855_v17, %v1389_v56  ;;  %v1094_v63 = vmul.f32 %v4615_v6, %v710_v10  ;;  %v665_v41 = vsub.f32 %v4579_v24, %v4709_v45  ;;  %v4734_v56 = vld [vmem:[#allocation6 + $0x68] sm:$0xff]  ;;  %v4742_v17 = vld [vmem:[#allocation6 + $0x78] sm:$0xff] }
 0x149   : > { %v1971_v58 = vmax.f32 %v1474_v23, %v1475_v60  ;;  %v1095_v48 = vmul.f32 %v4618_v36, %v711_v22  ;;  %v1477_v46 = vmul.f32 %v1093_v57, %v1093_v57  ;;  %v666_v31 = vsub.f32 %v4585_v2, %v4713_v34  ;;  %6364 = vst [vmem:[#allocation53_spill] sm:$0xff] %v4728_v35  ;;  %v4749_v22 = vld [vmem:[#allocation8 + $0x68] sm:$0xff]  ;;  %v4752_v57 = vld [vmem:[#allocation8 + $0x70] sm:$0xff] }
 0x14a   : > { %v1048_v51 = vmul.f32 %v4717_v4, %v664_v39  ;;  %v1478_v36 = vmul.f32 %v1094_v63, %v1094_v63  ;;  %v1049_v61 = vmul.f32 %v4722_v47, %v665_v41  ;;  %v667_v38 = vsub.f32 %v4571_v27, %v4730_v50 }
 0x14b   : > { %v1972_v6 = vmax.f32 %v1971_v58, %v1476_v20  ;;  %v1479_v62 = vmul.f32 %v1095_v48, %v1095_v48  ;;  %v1050_v5 = vmul.f32 %v4725_v7, %v666_v31  ;;  %v668_v26 = vsub.f32 %v4579_v24, %v4734_v56  ;;  %v4746_v20 = vld [vmem:[#allocation8 + $0x60] sm:$0xff]  ;;  %v4759_v48 = vld [vmem:[#allocation6 + $0x88] sm:$0xff] }
 0x14c   : > { %1857 = vmax.xlane.f32.xlu1 %v1856_v53  ;;  %v1432_v3 = vmul.f32 %v1048_v51, %v1048_v51  ;;  %v1975_v12 = vmax.f32 %v1477_v46, %v1478_v36  ;;  %v1433_v32 = vmul.f32 %v1049_v61, %v1049_v61  ;;  %v669_v16 = vsub.f32 %v4585_v2, %v4738_v25  ;;  %v4755_v58 = vld [vmem:[#allocation6 + $0x80] sm:$0xff]  ;;  %v4763_v46 = vld [vmem:[#allocation8 + $0x78] sm:$0xff]  ;;  %v4766_v51 = vpop.xlane.xlu0 %1697 }
 0x14d   : > { %1973 = vmax.xlane.f32.xlu0 %v1972_v6  ;;  %v1434_v0 = vmul.f32 %v1050_v5, %v1050_v5  ;;  %v622_v23 = vsub.f32 %v4548_v59, %v4742_v17  ;;  %v1051_v10 = vmul.f32 %v4746_v20, %v667_v38  ;;  %v1052_v53 = vmul.f32 %v4749_v22, %v668_v26  ;;  %v4768_v5 = vld [vmem:[#allocation8 + $0x80] sm:$0xff]  ;;  %v4774_v26 = vpop.xlane.xlu1 %1701 }
 0x14e   : > { %v1976_v1 = vmax.f32 %v1975_v12, %v1479_v62  ;;  %v1915_v60 = vmax.f32 %v1432_v3, %v1433_v32  ;;  %v1053_v39 = vmul.f32 %v4752_v57, %v669_v16  ;;  %v623_v63 = vsub.f32 %v4552_v44, %v4755_v58  ;;  %6365 = vst [vmem:[#allocation54_spill] sm:$0xff] %v4766_v51  ;;  %v4771_v12 = vld [vmem:[#allocation8 + $0x88] sm:$0xff] }
 0x14f   : > { %v624_v41 = vsub.f32 %v4556_v29, %v4759_v48  ;;  %v1006_v31 = vmul.f32 %v4763_v46, %v622_v23  ;;  %v1435_v36 = vmul.f32 %v1051_v10, %v1051_v10  ;;  %v1436_v62 = vmul.f32 %v1052_v53, %v1052_v53  ;;  %6366 = vst [vmem:[#allocation56_spill] sm:$0xff] %v4774_v26  ;;  %v4776_v23 = vld [vmem:[#allocation6 + $0x90] sm:$0xff]  ;;  %v4780_v10 = vld [vmem:[#allocation6 + $0x98] sm:$0xff]  ;;  %v4796_v26 = vld [vmem:[#allocation8 + $0xa0] sm:$0xff] }
 0x150   : > { %1977 = vmax.xlane.f32.xlu1 %v1976_v1  ;;  %v1916_v6 = vmax.f32 %v1915_v60, %v1434_v0  ;;  %v1437_v61 = vmul.f32 %v1053_v39, %v1053_v39  ;;  %v1007_v3 = vmul.f32 %v4768_v5, %v623_v63  ;;  %v625_v0 = vsub.f32 %v4548_v59, %v4776_v23  ;;  %v4784_v39 = vld [vmem:[#allocation6 + $0xa0] sm:$0xff] }
 0x151   : > { %v1008_v32 = vmul.f32 %v4771_v12, %v624_v41  ;;  %v1390_v38 = vmul.f32 %v1006_v31, %v1006_v31  ;;  %v1919_v16 = vmax.f32 %v1435_v36, %v1436_v62  ;;  %v626_v53 = vsub.f32 %v4552_v44, %v4780_v10  ;;  %v4788_v31 = vld [vmem:[#allocation8 + $0x90] sm:$0xff]  ;;  %v4807_v28 = vpop.xlane.xlu1 %1709 }
 0x152   : > { %1917 = vmax.xlane.f32.xlu0 %v1916_v6  ;;  %v1391_v1 = vmul.f32 %v1007_v3, %v1007_v3  ;;  %v627_v63 = vsub.f32 %v4556_v29, %v4784_v39  ;;  %v1009_v6 = vmul.f32 %v4788_v31, %v625_v0  ;;  %v712_v36 = vsub.f32 %v4654_v30, %v4703_v54  ;;  %v4793_v3 = vld [vmem:[#allocation8 + $0x98] sm:$0xff] }
 0x153   : > { %v1392_v60 = vmul.f32 %v1008_v32, %v1008_v32  ;;  %v1920_v41 = vmax.f32 %v1919_v16, %v1437_v61  ;;  %v1010_v32 = vmul.f32 %v4793_v3, %v626_v53  ;;  %v713_v35 = vsub.f32 %v4657_v15, %v4709_v45  ;;  %v4801_v61 = vpop.xlane.xlu0 %1705  ;;  %6368 = vst [vmem:[#allocation58_spill] sm:$0xff] %v4807_v28  ;;  %v4888_v28 = vld [vmem:[#allocation8 + $0xd0] sm:$0xff] }
 0x154   : > { %v1859_v62 = vmax.f32 %v1390_v38, %v1391_v1  ;;  %v1011_v51 = vmul.f32 %v4796_v26, %v627_v63  ;;  %6367 = vst [vmem:[#allocation55_spill] sm:$0xff] %v4801_v61  ;;  %v1393_v16 = vmul.f32 %v1009_v6, %v1009_v6  ;;  %v714_v0 = vsub.f32 %v4662_v21, %v4713_v34 }
 0x155   : > { %1921 = vmax.xlane.f32.xlu1 %v1920_v41  ;;  %v1096_v54 = vmul.f32 %v4717_v4, %v712_v36  ;;  %v1394_v1 = vmul.f32 %v1010_v32, %v1010_v32  ;;  %v1097_v53 = vmul.f32 %v4722_v47, %v713_v35  ;;  %v715_v41 = vsub.f32 %v4654_v30, %v4730_v50 }
 0x156   : > { %v1860_v38 = vmax.f32 %v1859_v62, %v1392_v60  ;;  %v1395_v9 = vmul.f32 %v1011_v51, %v1011_v51  ;;  %v1098_v63 = vmul.f32 %v4725_v7, %v714_v0  ;;  %v716_v34 = vsub.f32 %v4657_v15, %v4734_v56 }
 0x157   : > { %v1480_v33 = vmul.f32 %v1096_v54, %v1096_v54  ;;  %v1863_v45 = vmax.f32 %v1393_v16, %v1394_v1  ;;  %v1481_v61 = vmul.f32 %v1097_v53, %v1097_v53  ;;  %v717_v51 = vsub.f32 %v4662_v21, %v4738_v25  ;;  %v4820_v36 = vpop.xlane.xlu0 %1713 }
 0x158   : > { %1861 = vmax.xlane.f32.xlu0 %v1860_v38  ;;  %v1482_v4 = vmul.f32 %v1098_v63, %v1098_v63  ;;  %v670_v47 = vsub.f32 %v4571_v27, %v4742_v17  ;;  %v1099_v7 = vmul.f32 %v4746_v20, %v715_v41  ;;  %v1100_v6 = vmul.f32 %v4749_v22, %v716_v34  ;;  %v4839_v34 = vld [vmem:[#allocation6 + $0xa8] sm:$0xff] }
 0x159   : > { %v1864_v35 = vmax.f32 %v1863_v45, %v1395_v9  ;;  %v1979_v60 = vmax.f32 %v1480_v33, %v1481_v61  ;;  %6369 = vst [vmem:[#allocation59_spill] sm:$0xff] %v4820_v36  ;;  %v1101_v50 = vmul.f32 %v4752_v57, %v717_v51  ;;  %v671_v56 = vsub.f32 %v4579_v24, %v4755_v58  ;;  %v4828_v61 = vpop.xlane.xlu1 %1717 }
 0x15a   : > { %v672_v62 = vsub.f32 %v4585_v2, %v4759_v48  ;;  %v1054_v25 = vmul.f32 %v4763_v46, %v670_v47  ;;  %v1483_v9 = vmul.f32 %v1099_v7, %v1099_v7  ;;  %v1484_v33 = vmul.f32 %v1100_v6, %v1100_v6  ;;  %6370 = vst [vmem:[#allocation57_spill] sm:$0xff] %v4828_v61  ;;  %v4847_v7 = vld [vmem:[#allocation6 + $0xb0] sm:$0xff] }
 0x15b   : > { %1865 = vmax.xlane.f32.xlu1 %v1864_v35  ;;  %v1980_v32 = vmax.f32 %v1979_v60, %v1482_v4  ;;  %v1485_v20 = vmul.f32 %v1101_v50, %v1101_v50  ;;  %v1055_v22 = vmul.f32 %v4768_v5, %v671_v56  ;;  %v673_v54 = vsub.f32 %v4571_v27, %v4776_v23  ;;  %v4851_v56 = vld [vmem:[#allocation6 + $0xb8] sm:$0xff] }
 0x15c   : > { %v1056_v16 = vmul.f32 %v4771_v12, %v672_v62  ;;  %v1438_v57 = vmul.f32 %v1054_v25, %v1054_v25  ;;  %v1983_v0 = vmax.f32 %v1483_v9, %v1484_v33  ;;  %v674_v53 = vsub.f32 %v4579_v24, %v4780_v10  ;;  %v4843_v51 = vpop.xlane.xlu0 %1721  ;;  %v4855_v25 = vld [vmem:[#allocation8 + $0xa8] sm:$0xff] }
 0x15d   : > { %1981 = vmax.xlane.f32.xlu0 %v1980_v32  ;;  %v1439_v38 = vmul.f32 %v1055_v22, %v1055_v22  ;;  %v675_v63 = vsub.f32 %v4585_v2, %v4784_v39  ;;  %v1057_v41 = vmul.f32 %v4788_v31, %v673_v54  ;;  %v628_v4 = vsub.f32 %v4548_v59, %v4839_v34  ;;  %v4858_v9 = vpop.xlane.xlu1 %1725 }
 0x15e   : > { %v1440_v1 = vmul.f32 %v1056_v16, %v1056_v16  ;;  %v1984_v45 = vmax.f32 %v1983_v0, %v1485_v20  ;;  %6371 = vst [vmem:[#allocation60_spill] sm:$0xff] %v4843_v51  ;;  %v1058_v35 = vmul.f32 %v4793_v3, %v674_v53  ;;  %v629_v6 = vsub.f32 %v4552_v44, %v4847_v7  ;;  %v4860_v16 = vld [vmem:[#allocation8 + $0xb0] sm:$0xff]  ;;  %v4863_v0 = vld [vmem:[#allocation8 + $0xb8] sm:$0xff] }
 0x15f   : > { %v1923_v47 = vmax.f32 %v1438_v57, %v1439_v38  ;;  %v1059_v60 = vmul.f32 %v4796_v26, %v675_v63  ;;  %v1441_v50 = vmul.f32 %v1057_v41, %v1057_v41  ;;  %v630_v62 = vsub.f32 %v4556_v29, %v4851_v56  ;;  %6372 = vst [vmem:[#allocation64_spill] sm:$0xff] %v4858_v9 }
 0x160   : > { %1985 = vmax.xlane.f32.xlu1 %v1984_v45  ;;  %v1012_v32 = vmul.f32 %v4855_v25, %v628_v4  ;;  %v1442_v20 = vmul.f32 %v1058_v35, %v1058_v35  ;;  %v1013_v57 = vmul.f32 %v4860_v16, %v629_v6  ;;  %v4866_v45 = vld [vmem:[#allocation6 + $0xc0] sm:$0xff]  ;;  %v4870_v4 = vld [vmem:[#allocation6 + $0xc8] sm:$0xff]  ;;  %v4874_v35 = vld [vmem:[#allocation6 + $0xd0] sm:$0xff]  ;;  %v718_v6 = vsub.f32 %v4654_v30, %v4742_v17 }
 0x161   : > { %v1924_v33 = vmax.f32 %v1923_v47, %v1440_v1  ;;  %v1443_v22 = vmul.f32 %v1059_v60, %v1059_v60  ;;  %v1014_v54 = vmul.f32 %v4863_v0, %v630_v62  ;;  %v631_v41 = vsub.f32 %v4548_v59, %v4866_v45  ;;  %v4893_v17 = vpop.xlane.xlu1 %1733 }
 0x162   : > { %v1396_v38 = vmul.f32 %v1012_v32, %v1012_v32  ;;  %v1927_v53 = vmax.f32 %v1441_v50, %v1442_v20  ;;  %v1397_v63 = vmul.f32 %v1013_v57, %v1013_v57  ;;  %v632_v47 = vsub.f32 %v4552_v44, %v4870_v4  ;;  %v4885_v57 = vld [vmem:[#allocation8 + $0xc8] sm:$0xff]  ;;  %6374 = vst [vmem:[#allocation61_spill] sm:$0xff] %v4893_v17 }
 0x163   : > { %1925 = vmax.xlane.f32.xlu0 %v1924_v33  ;;  %v1398_v1 = vmul.f32 %v1014_v54, %v1014_v54  ;;  %v633_v60 = vsub.f32 %v4556_v29, %v4874_v35  ;;  %v4880_v50 = vpop.xlane.xlu0 %1729  ;;  %v4882_v33 = vld [vmem:[#allocation8 + $0xc0] sm:$0xff]  ;;  %v719_v8 = vsub.f32 %v4657_v15, %v4755_v58  ;;  %v1102_v43 = vmul.f32 %v4763_v46, %v718_v6 }
 0x164   : > { %6373 = vst [vmem:[#allocation66_spill] sm:$0xff] %v4880_v50  ;;  %v1928_v62 = vmax.f32 %v1927_v53, %v1443_v22  ;;  %v1867_v32 = vmax.f32 %v1396_v38, %v1397_v63  ;;  %v1015_v20 = vmul.f32 %v4882_v33, %v631_v41  ;;  %v1016_v54 = vmul.f32 %v4885_v57, %v632_v47 }
 0x165   : > { %v1017_v52 = vmul.f32 %v4888_v28, %v633_v60  ;;  %v720_v53 = vsub.f32 %v4662_v21, %v4759_v48  ;;  %v1103_v47 = vmul.f32 %v4768_v5, %v719_v8  ;;  %v721_v58 = vsub.f32 %v4654_v30, %v4776_v23 }
 0x166   : > { %1929 = vmax.xlane.f32.xlu1 %v1928_v62  ;;  %v1868_v22 = vmax.f32 %v1867_v32, %v1398_v1  ;;  %v1399_v38 = vmul.f32 %v1015_v20, %v1015_v20  ;;  %v1400_v63 = vmul.f32 %v1016_v54, %v1016_v54  ;;  %v1486_v17 = vmul.f32 %v1102_v43, %v1102_v43 }
 0x167   : > { %v1401_v41 = vmul.f32 %v1017_v52, %v1017_v52  ;;  %v1104_v60 = vmul.f32 %v4771_v12, %v720_v53  ;;  %v1487_v62 = vmul.f32 %v1103_v47, %v1103_v47  ;;  %v722_v1 = vsub.f32 %v4657_v15, %v4780_v10  ;;  %v4912_v43 = vpop.xlane.xlu1 %1741 }
 0x168   : > { %1869 = vmax.xlane.f32.xlu0 %v1868_v22  ;;  %v1871_v50 = vmax.f32 %v1399_v38, %v1400_v63  ;;  %v723_v52 = vsub.f32 %v4662_v21, %v4784_v39  ;;  %v1105_v8 = vmul.f32 %v4788_v31, %v721_v58  ;;  %v676_v23 = vsub.f32 %v4571_v27, %v4839_v34 }
 0x169   : > { %v4904_v32 = vpop.xlane.xlu0 %1737  ;;  %v1488_v48 = vmul.f32 %v1104_v60, %v1104_v60  ;;  %v1987_v5 = vmax.f32 %v1486_v17, %v1487_v62  ;;  %v1106_v12 = vmul.f32 %v4793_v3, %v722_v1  ;;  %6376 = vst [vmem:[#allocation68_spill] sm:$0xff] %v4912_v43  ;;  %v677_v20 = vsub.f32 %v4579_v24, %v4847_v7 }
 0x16a   : > { %6375 = vst [vmem:[#allocation65_spill] sm:$0xff] %v4904_v32  ;;  %v1872_v46 = vmax.f32 %v1871_v50, %v1401_v41  ;;  %v1107_v6 = vmul.f32 %v4796_v26, %v723_v52  ;;  %v1489_v10 = vmul.f32 %v1105_v8, %v1105_v8  ;;  %v678_v39 = vsub.f32 %v4585_v2, %v4851_v56  ;;  %v4932_v52 = vld [vmem:[#allocation6 + $0xd8] sm:$0xff] }
 0x16b   : > { %v1988_v31 = vmax.f32 %v1987_v5, %v1488_v48  ;;  %v1490_v50 = vmul.f32 %v1106_v12, %v1106_v12  ;;  %v1060_v54 = vmul.f32 %v4855_v25, %v676_v23  ;;  %v1061_v17 = vmul.f32 %v4860_v16, %v677_v20  ;;  %v4939_v23 = vld [vmem:[#allocation6 + $0xe0] sm:$0xff] }
 0x16c   : > { %1873 = vmax.xlane.f32.xlu1 %v1872_v46  ;;  %v1491_v3 = vmul.f32 %v1107_v6, %v1107_v6  ;;  %v1062_v22 = vmul.f32 %v4863_v0, %v678_v39  ;;  %v679_v53 = vsub.f32 %v4571_v27, %v4866_v45  ;;  %v680_v63 = vsub.f32 %v4579_v24, %v4870_v4 }
 0x16d   : > { %1989 = vmax.xlane.f32.xlu0 %v1988_v31  ;;  %v1991_v38 = vmax.f32 %v1489_v10, %v1490_v50  ;;  %v1444_v26 = vmul.f32 %v1060_v54, %v1060_v54  ;;  %v1445_v47 = vmul.f32 %v1061_v17, %v1061_v17  ;;  %v681_v58 = vsub.f32 %v4585_v2, %v4874_v35  ;;  %v4936_v46 = vpop.xlane.xlu1 %1749  ;;  %v4943_v10 = vld [vmem:[#allocation6 + $0xe8] sm:$0xff]  ;;  %v4947_v50 = vld [vmem:[#allocation8 + $0xd8] sm:$0xff] }
 0x16e   : > { %v1446_v60 = vmul.f32 %v1062_v22, %v1062_v22  ;;  %v1063_v1 = vmul.f32 %v4882_v33, %v679_v53  ;;  %v1064_v48 = vmul.f32 %v4885_v57, %v680_v63  ;;  %v634_v8 = vsub.f32 %v4548_v59, %v4932_v52  ;;  %6378 = vst [vmem:[#allocation71_spill] sm:$0xff] %v4936_v46  ;;  %v4950_v22 = vld [vmem:[#allocation8 + $0xe0] sm:$0xff] }
 0x16f   : > { %v1992_v62 = vmax.f32 %v1991_v38, %v1491_v3  ;;  %v1931_v5 = vmax.f32 %v1444_v26, %v1445_v47  ;;  %v1065_v12 = vmul.f32 %v4888_v28, %v681_v58  ;;  %v635_v6 = vsub.f32 %v4552_v44, %v4939_v23  ;;  %v4953_v26 = vld [vmem:[#allocation8 + $0xe8] sm:$0xff] }
 0x170   : > { %v636_v20 = vsub.f32 %v4556_v29, %v4943_v10  ;;  %v1447_v39 = vmul.f32 %v1063_v1, %v1063_v1  ;;  %v1448_v31 = vmul.f32 %v1064_v48, %v1064_v48  ;;  %v1018_v54 = vmul.f32 %v4947_v50, %v634_v8  ;;  %v4958_v48 = vld [vmem:[#allocation6 + $0xf0] sm:$0xff]  ;;  %v4962_v8 = vld [vmem:[#allocation6 + $0xf8] sm:$0xff] }
 0x171   : > { %v4926_v41 = vpop.xlane.xlu0 %1745  ;;  %1993 = vmax.xlane.f32.xlu1 %v1992_v62  ;;  %v1932_v3 = vmax.f32 %v1931_v5, %v1446_v60  ;;  %v1449_v17 = vmul.f32 %v1065_v12, %v1065_v12  ;;  %v1019_v38 = vmul.f32 %v4950_v22, %v635_v6  ;;  %v637_v60 = vsub.f32 %v4548_v59, %v4958_v48  ;;  %v4966_v6 = vld [vmem:[#allocation6 + $0x100] sm:$0xff] }
 0x172   : > { %6377 = vst [vmem:[#allocation70_spill] sm:$0xff] %v4926_v41  ;;  %v1020_v53 = vmul.f32 %v4953_v26, %v636_v20  ;;  %v1935_v63 = vmax.f32 %v1447_v39, %v1448_v31  ;;  %v1402_v47 = vmul.f32 %v1018_v54, %v1018_v54  ;;  %v638_v5 = vsub.f32 %v4552_v44, %v4962_v8 }
 0x173   : > { %1933 = vmax.xlane.f32.xlu0 %v1932_v3  ;;  %v1403_v62 = vmul.f32 %v1019_v38, %v1019_v38  ;;  %v639_v20 = vsub.f32 %v4556_v29, %v4966_v6  ;;  %v724_v39 = vsub.f32 %v4654_v30, %v4839_v34  ;;  %v4974_v3 = vld [vmem:[#allocation8 + $0xf0] sm:$0xff]  ;;  %v726_v34 = vsub.f32 %v4662_v21, %v4851_v56 }
 0x174   : > { %v1404_v1 = vmul.f32 %v1020_v53, %v1020_v53  ;;  %v1936_v12 = vmax.f32 %v1935_v63, %v1449_v17  ;;  %v1021_v38 = vmul.f32 %v4974_v3, %v637_v60  ;;  %v4977_v53 = vld [vmem:[#allocation8 + $0xf8] sm:$0xff]  ;;  %v725_v17 = vsub.f32 %v4657_v15, %v4847_v7  ;;  %v4982_v63 = vld [vmem:[#allocation8 + $0x100] sm:$0xff] }
 0x175   : > { %v4972_v31 = vpop.xlane.xlu1 %1757  ;;  %v1875_v54 = vmax.f32 %v1402_v47, %v1403_v62  ;;  %v1023_v46 = vmul.f32 %v4982_v63, %v639_v20  ;;  %v1108_v47 = vmul.f32 %v4855_v25, %v724_v39  ;;  %v727_v20 = vsub.f32 %v4654_v30, %v4866_v45 }
 0x176   : > { %6380 = vst [vmem:[#allocation73_spill] sm:$0xff] %v4972_v31  ;;  %1937 = vmax.xlane.f32.xlu1 %v1936_v12  ;;  %v1405_v31 = vmul.f32 %v1021_v38, %v1021_v38  ;;  %v1109_v41 = vmul.f32 %v4860_v16, %v725_v17  ;;  %v728_v25 = vsub.f32 %v4657_v15, %v4870_v4 }
 0x177   : > { %v1876_v62 = vmax.f32 %v1875_v54, %v1404_v1  ;;  %v1407_v43 = vmul.f32 %v1023_v46, %v1023_v46  ;;  %v1492_v32 = vmul.f32 %v1108_v47, %v1108_v47  ;;  %v682_v16 = vsub.f32 %v4571_v27, %v4932_v52 }
 0x178   : > { %v1493_v9 = vmul.f32 %v1109_v41, %v1109_v41  ;;  %v1111_v39 = vmul.f32 %v4882_v33, %v727_v20  ;;  %v1112_v41 = vmul.f32 %v4885_v57, %v728_v25  ;;  %v684_v4 = vsub.f32 %v4585_v2, %v4943_v10 }
 0x179   : > { %v4956_v58 = vpop.xlane.xlu0 %1753  ;;  %1877 = vmax.xlane.f32.xlu0 %v1876_v62  ;;  %v1066_v38 = vmul.f32 %v4947_v50, %v682_v16 }
 0x17a   : > { %6379 = vst [vmem:[#allocation69_spill] sm:$0xff] %v4956_v58  ;;  %v1022_v58 = vmul.f32 %v4977_v53, %v638_v5  ;;  %v1110_v5 = vmul.f32 %v4863_v0, %v726_v34  ;;  %v1995_v1 = vmax.f32 %v1492_v32, %v1493_v9  ;;  %v1495_v54 = vmul.f32 %v1111_v39, %v1111_v39 }
 0x17b   : > { %v5000_v0 = vpop.xlane.xlu1 %1765  ;;  %v1496_v17 = vmul.f32 %v1112_v41, %v1112_v41  ;;  %v1068_v33 = vmul.f32 %v4953_v26, %v684_v4  ;;  %v685_v32 = vsub.f32 %v4571_v27, %v4958_v48 }
 0x17c   : > { %v1406_v60 = vmul.f32 %v1022_v58, %v1022_v58  ;;  %v1494_v56 = vmul.f32 %v1110_v5, %v1110_v5  ;;  %v729_v58 = vsub.f32 %v4662_v21, %v4874_v35  ;;  %6382 = vst [vmem:[#allocation72_spill] sm:$0xff] %v5000_v0  ;;  %v731_v0 = vsub.f32 %v4657_v15, %v4939_v23 }
 0x17d   : > { %v1999_v34 = vmax.f32 %v1495_v54, %v1496_v17  ;;  %v1452_v62 = vmul.f32 %v1068_v33, %v1068_v33  ;;  %v1069_v20 = vmul.f32 %v4974_v3, %v685_v32  ;;  %v5045_v32 = vld [vmem:[#allocation8 + $0x118] sm:$0xff] }
 0x17e   : > { %v1879_v12 = vmax.f32 %v1405_v31, %v1406_v60  ;;  %v1113_v45 = vmul.f32 %v4888_v28, %v729_v58  ;;  %v683_v31 = vsub.f32 %v4579_v24, %v4939_v23  ;;  %v1996_v35 = vmax.f32 %v1995_v1, %v1494_v56  ;;  %v5023_v56 = vld [vmem:[#allocation6 + $0x108] sm:$0xff]  ;;  %v5028_v1 = vld [vmem:[#allocation6 + $0x110] sm:$0xff] }
 0x17f   : > { %v4990_v7 = vpop.xlane.xlu0 %1761  ;;  %v1450_v28 = vmul.f32 %v1066_v38, %v1066_v38  ;;  %v686_v60 = vsub.f32 %v4579_v24, %v4962_v8  ;;  %v640_v25 = vsub.f32 %v4548_v59, %v5023_v56  ;;  %v641_v39 = vsub.f32 %v4552_v44, %v5028_v1 }
 0x180   : > { %6381 = vst [vmem:[#allocation19_spill] sm:$0xff] %v4990_v7  ;;  %v1880_v46 = vmax.f32 %v1879_v12, %v1407_v43  ;;  %v1497_v43 = vmul.f32 %v1113_v45, %v1113_v45  ;;  %v1067_v9 = vmul.f32 %v4950_v22, %v683_v31  ;;  %1997 = vmax.xlane.f32.xlu0 %v1996_v35  ;;  %v5033_v31 = vld [vmem:[#allocation6 + $0x118] sm:$0xff]  ;;  %v5037_v35 = vld [vmem:[#allocation8 + $0x108] sm:$0xff] }
 0x181   : > { %v687_v12 = vsub.f32 %v4585_v2, %v4966_v6  ;;  %v1453_v45 = vmul.f32 %v1069_v20, %v1069_v20  ;;  %v642_v4 = vsub.f32 %v4556_v29, %v5033_v31  ;;  %v1024_v54 = vmul.f32 %v5037_v35, %v640_v25  ;;  %v5048_v20 = vld [vmem:[#allocation6 + $0x120] sm:$0xff] }
 0x182   : > { %1881 = vmax.xlane.f32.xlu1 %v1880_v46  ;;  %v1451_v47 = vmul.f32 %v1067_v9, %v1067_v9  ;;  %v5018_v5 = vpop.xlane.xlu1 %1773  ;;  %v2000_v58 = vmax.f32 %v1999_v34, %v1497_v43  ;;  %v1070_v46 = vmul.f32 %v4977_v53, %v686_v60  ;;  %v5040_v43 = vld [vmem:[#allocation8 + $0x110] sm:$0xff]  ;;  %v733_v23 = vsub.f32 %v4654_v30, %v4958_v48 }
 0x183   : > { %6384 = vst [vmem:[#allocation15_spill] sm:$0xff] %v5018_v5  ;;  %v1071_v41 = vmul.f32 %v4982_v63, %v687_v12  ;;  %v1025_v9 = vmul.f32 %v5040_v43, %v641_v39  ;;  %v1026_v34 = vmul.f32 %v5045_v32, %v642_v4  ;;  %v5058_v39 = vld [vmem:[#allocation6 + $0x130] sm:$0xff]  ;;  %v736_v36 = vsub.f32 %v4654_v30, %v5023_v56 }
 0x184   : > { %v1939_v16 = vmax.f32 %v1450_v28, %v1451_v47  ;;  %v1454_v17 = vmul.f32 %v1070_v46, %v1070_v46  ;;  %v1408_v47 = vmul.f32 %v1024_v54, %v1024_v54  ;;  %v5070_v5 = vld [vmem:[#allocation8 + $0x130] sm:$0xff] }
 0x185   : > { %v5012_v57 = vpop.xlane.xlu0 %1769  ;;  %v1455_v28 = vmul.f32 %v1071_v41, %v1071_v41  ;;  %v1409_v12 = vmul.f32 %v1025_v9, %v1025_v9  ;;  %v645_v41 = vsub.f32 %v4556_v29, %v5058_v39  ;;  %v5067_v9 = vld [vmem:[#allocation8 + $0x128] sm:$0xff] }
 0x186   : > { %6383 = vst [vmem:[#allocation14_spill] sm:$0xff] %v5012_v57  ;;  %2001 = vmax.xlane.f32.xlu1 %v2000_v58  ;;  %v1940_v38 = vmax.f32 %v1939_v16, %v1452_v62  ;;  %v1943_v60 = vmax.f32 %v1453_v45, %v1454_v17  ;;  %v643_v62 = vsub.f32 %v4548_v59, %v5048_v20  ;;  %v5054_v16 = vld [vmem:[#allocation6 + $0x128] sm:$0xff] }
 0x187   : > { %v1410_v58 = vmul.f32 %v1026_v34, %v1026_v34  ;;  %v644_v46 = vsub.f32 %v4552_v44, %v5054_v16  ;;  %v730_v45 = vsub.f32 %v4654_v30, %v4932_v52  ;;  %v1883_v54 = vmax.f32 %v1408_v47, %v1409_v12 }
 0x188   : > { %1941 = vmax.xlane.f32.xlu0 %v1940_v38  ;;  %v1944_v4 = vmax.f32 %v1943_v60, %v1455_v28  ;;  %v5064_v38 = vld [vmem:[#allocation8 + $0x120] sm:$0xff]  ;;  %v1029_v57 = vmul.f32 %v5070_v5, %v645_v41  ;;  %v732_v52 = vsub.f32 %v4662_v21, %v4943_v10 }
 0x189   : > { %v1027_v17 = vmul.f32 %v5064_v38, %v643_v62  ;;  %v1028_v34 = vmul.f32 %v5067_v9, %v644_v46  ;;  %v1884_v28 = vmax.f32 %v1883_v54, %v1410_v58  ;;  %v1114_v60 = vmul.f32 %v4947_v50, %v730_v45 }
 0x18a   : > { %1945 = vmax.xlane.f32.xlu1 %v1944_v4  ;;  %v1413_v7 = vmul.f32 %v1029_v57, %v1029_v57  ;;  %v1115_v46 = vmul.f32 %v4950_v22, %v731_v0  ;;  %v1116_v49 = vmul.f32 %v4953_v26, %v732_v52  ;;  %v734_v50 = vsub.f32 %v4657_v15, %v4962_v8 }
 0x18b   : > { %v1411_v47 = vmul.f32 %v1027_v17, %v1027_v17  ;;  %v1412_v62 = vmul.f32 %v1028_v34, %v1028_v34  ;;  %v1498_v41 = vmul.f32 %v1114_v60, %v1114_v60  ;;  %v735_v57 = vsub.f32 %v4662_v21, %v4966_v6 }
 0x18c   : > { %v5043_v33 = vpop.xlane.xlu0 %1777  ;;  %v5052_v25 = vpop.xlane.xlu1 %1781  ;;  %1885 = vmax.xlane.f32.xlu0 %v1884_v28  ;;  %v1499_v58 = vmul.f32 %v1115_v46, %v1115_v46  ;;  %v1500_v4 = vmul.f32 %v1116_v49, %v1116_v49  ;;  %v1117_v22 = vmul.f32 %v4974_v3, %v733_v23  ;;  %v688_v26 = vsub.f32 %v4571_v27, %v5023_v56 }
 0x18d   : > { %v1887_v10 = vmax.f32 %v1411_v47, %v1412_v62  ;;  %v1118_v48 = vmul.f32 %v4977_v53, %v734_v50  ;;  %v689_v54 = vsub.f32 %v4579_v24, %v5028_v1  ;;  %v1119_v49 = vmul.f32 %v4982_v63, %v735_v57  ;;  %v5112_v50 = vld [vmem:[#allocation6 + $0x138] sm:$0xff] }
 0x18e   : > { %v2003_v45 = vmax.f32 %v1498_v41, %v1499_v58  ;;  %v1501_v17 = vmul.f32 %v1117_v22, %v1117_v22  ;;  %v690_v8 = vsub.f32 %v4585_v2, %v5033_v31  ;;  %v1072_v6 = vmul.f32 %v5037_v35, %v688_v26 }
 0x18f   : > { %v1888_v0 = vmax.f32 %v1887_v10, %v1413_v7  ;;  %v1502_v52 = vmul.f32 %v1118_v48, %v1118_v48  ;;  %v1073_v7 = vmul.f32 %v5040_v43, %v689_v54  ;;  %v1503_v28 = vmul.f32 %v1119_v49, %v1119_v49  ;;  %v5121_v54 = vld [vmem:[#allocation6 + $0x140] sm:$0xff] }
 0x190   : > { %v5084_v11 = vpop.xlane.xlu1 %1789  ;;  %v2004_v3 = vmax.f32 %v2003_v45, %v1500_v4  ;;  %v1074_v53 = vmul.f32 %v5045_v32, %v690_v8  ;;  %v1456_v47 = vmul.f32 %v1072_v6, %v1072_v6  ;;  %v691_v41 = vsub.f32 %v4571_v27, %v5048_v20 }
 0x191   : > { %1889 = vmax.xlane.f32.xlu1 %v1888_v0  ;;  %v2007_v63 = vmax.f32 %v1501_v17, %v1502_v52  ;;  %v1457_v62 = vmul.f32 %v1073_v7, %v1073_v7  ;;  %v692_v23 = vsub.f32 %v4579_v24, %v5054_v16  ;;  %v693_v10 = vsub.f32 %v4585_v2, %v5058_v39  ;;  %v5125_v17 = vld [vmem:[#allocation6 + $0x148] sm:$0xff]  ;;  %v5129_v7 = vld [vmem:[#allocation8 + $0x138] sm:$0xff] }
 0x192   : > { %2005 = vmax.xlane.f32.xlu0 %v2004_v3  ;;  %v1458_v46 = vmul.f32 %v1074_v53, %v1074_v53  ;;  %v646_v57 = vsub.f32 %v4548_v59, %v5112_v50  ;;  %v1075_v22 = vmul.f32 %v5064_v38, %v691_v41  ;;  %v647_v49 = vsub.f32 %v4552_v44, %v5121_v54  ;;  %v5140_v41 = vld [vmem:[#allocation8 + $0x148] sm:$0xff] }
 0x193   : > { %v5078_v12 = vpop.xlane.xlu0 %1785  ;;  %v2008_v58 = vmax.f32 %v2007_v63, %v1503_v28  ;;  %v1947_v4 = vmax.f32 %v1456_v47, %v1457_v62  ;;  %v1076_v26 = vmul.f32 %v5067_v9, %v692_v23  ;;  %v1077_v0 = vmul.f32 %v5070_v5, %v693_v10  ;;  %v5137_v62 = vld [vmem:[#allocation8 + $0x140] sm:$0xff] }
 0x194   : > { %v648_v8 = vsub.f32 %v4556_v29, %v5125_v17  ;;  %v1459_v6 = vmul.f32 %v1075_v22, %v1075_v22  ;;  %v1030_v28 = vmul.f32 %v5129_v7, %v646_v57  ;;  %v6385_v47 = vlaneseq  ;;  %v5147_v22 = vld [vmem:[#allocation6 + $0x158] sm:$0xff] }
 0x195   : > { %2009 = vmax.xlane.f32.xlu1 %v2008_v58  ;;  %v1948_v48 = vmax.f32 %v1947_v4, %v1458_v46  ;;  %v1460_v3 = vmul.f32 %v1076_v26, %v1076_v26  ;;  %v1461_v52 = vmul.f32 %v1077_v0, %v1077_v0  ;;  %v1031_v46 = vmul.f32 %v5137_v62, %v647_v49  ;;  %v5143_v4 = vld [vmem:[#allocation6 + $0x150] sm:$0xff] }
 0x196   : > { %v5104_v60 = vpop.xlane.xlu1 %1797  ;;  %v5135_v63 = vand.u32 127, %v6385_v47  ;;  %v1032_v23 = vmul.f32 %v5140_v41, %v648_v8  ;;  %v1414_v58 = vmul.f32 %v1030_v28, %v1030_v28  ;;  %v649_v57 = vsub.f32 %v4548_v59, %v5143_v4  ;;  %v5151_v47 = vld [vmem:[#allocation6 + $0x160] sm:$0xff]  ;;  %v5158_v28 = vld [vmem:[#allocation8 + $0x158] sm:$0xff] }
 0x197   : > { %1949 = vmax.xlane.f32.xlu0 %v1948_v48  ;;  %v1951_v10 = vmax.f32 %v1459_v6, %v1460_v3  ;;  %v650_v26 = vsub.f32 %v4552_v44, %v5147_v22  ;;  %v1415_v0 = vmul.f32 %v1031_v46, %v1031_v46  ;;  %v651_v49 = vsub.f32 %v4556_v29, %v5151_v47  ;;  %v5155_v6 = vld [vmem:[#allocation8 + $0x150] sm:$0xff] }
 0x198   : > { %v5100_v34 = vpop.xlane.xlu0 %1793  ;;  %v1416_v48 = vmul.f32 %v1032_v23, %v1032_v23  ;;  %v1033_v3 = vmul.f32 %v5155_v6, %v649_v57  ;;  %v5165_v23 = vld [vmem:[#allocation8 + $0x160] sm:$0xff]  ;;  %v2174_v57 = vadd.s32 4294967280, %v5135_v63  ;;  %v1120_v56 = vmul.f32 %v5037_v35, %v736_v36  ;;  %v6386_v35 = vld [vmem:[#allocation13_spill] sm:$0xff] }
 0x199   : > { %v1952_v8 = vmax.f32 %v1951_v10, %v1461_v52  ;;  %v1034_v51 = vmul.f32 %v5158_v28, %v650_v26  ;;  %v1891_v46 = vmax.f32 %v1414_v58, %v1415_v0  ;;  %v1035_v19 = vmul.f32 %v5165_v23, %v651_v49 }
 0x19a   : > { %v737_v52 = vsub.f32 %v4657_v15, %v5028_v1  ;;  %v738_v10 = vsub.f32 %v4662_v21, %v5033_v31  ;;  %v1417_v26 = vmul.f32 %v1033_v3, %v1033_v3  ;;  %v1504_v1 = vmul.f32 %v1120_v56, %v1120_v56 }
 0x19b   : > { %v5132_v53 = vpop.xlane.xlu1 %1805  ;;  %1953 = vmax.xlane.f32.xlu1 %v1952_v8  ;;  %v1418_v40 = vmul.f32 %v1034_v51, %v1034_v51  ;;  %v1892_v58 = vmax.f32 %v1891_v46, %v1416_v48  ;;  %v1419_v0 = vmul.f32 %v1035_v19, %v1035_v19  ;;  %v739_v31 = vsub.f32 %v4654_v30, %v5048_v20 }
 0x19c   : > { %v1121_v13 = vmul.f32 %v5040_v43, %v737_v52  ;;  %v1122_v49 = vmul.f32 %v5045_v32, %v738_v10  ;;  %v740_v51 = vsub.f32 %v4657_v15, %v5054_v16  ;;  %v741_v36 = vsub.f32 %v4662_v21, %v5058_v39 }
 0x19d   : > { %v1895_v55 = vmax.f32 %v1417_v26, %v1418_v40  ;;  %1893 = vmax.xlane.f32.xlu0 %v1892_v58  ;;  %v5185_v19 = vsub.s32 %v2174_v57, %v6386_v35  ;;  %v1123_v32 = vmul.f32 %v5064_v38, %v739_v31  ;;  %v694_v40 = vsub.f32 %v4571_v27, %v5112_v50 }
 0x19e   : > { %v5119_v45 = vpop.xlane.xlu0 %1801  ;;  %v1505_v14 = vmul.f32 %v1121_v13, %v1121_v13  ;;  %v1506_v8 = vmul.f32 %v1122_v49, %v1122_v49  ;;  %v1124_v13 = vmul.f32 %v5067_v9, %v740_v51  ;;  %v1125_v3 = vmul.f32 %v5070_v5, %v741_v36 }
 0x19f   : > { %v1896_v43 = vmax.f32 %v1895_v55, %v1419_v0  ;;  %v695_v16 = vsub.f32 %v4579_v24, %v5121_v54  ;;  %v2181_v39 = vadd.s32 4294967272, %v5135_v63  ;;  %v1507_v46 = vmul.f32 %v1123_v32, %v1123_v32 }
 0x1a0   : > { %v2011_v20 = vmax.f32 %v1504_v1, %v1505_v14  ;;  %v696_v55 = vsub.f32 %v4585_v2, %v5125_v17  ;;  %v1078_v38 = vmul.f32 %v5129_v7, %v694_v40  ;;  %v1508_v14 = vmul.f32 %v1124_v13, %v1124_v13 }
 0x1a1   : > { %v5174_v18 = vpop.xlane.xlu1 %1813  ;;  %1897 = vmax.xlane.f32.xlu1 %v1896_v43  ;;  %v1509_v57 = vmul.f32 %v1125_v3, %v1125_v3  ;;  %v1079_v9 = vmul.f32 %v5137_v62, %v695_v16  ;;  %v5205_v5 = vsub.s32 %v5135_v63, %v6386_v35  ;;  %v2167_v26 = vadd.s32 4294967288, %v5135_v63  ;;  %v5218_v43 = vld [vmem:[#allocation6 + $0x168] sm:$0xff] }
 0x1a2   : > { %v2012_v10 = vmax.f32 %v2011_v20, %v1506_v8  ;;  %v1080_v56 = vmul.f32 %v5140_v41, %v696_v55  ;;  %v1462_v58 = vmul.f32 %v1078_v38, %v1078_v38  ;;  %v2015_v0 = vmax.f32 %v1507_v46, %v1508_v14  ;;  %v5227_v46 = vld [vmem:[#allocation6 + $0x170] sm:$0xff]  ;;  %v5231_v38 = vld [vmem:[#allocation6 + $0x178] sm:$0xff] }
 0x1a3   : > { %v1463_v49 = vmul.f32 %v1079_v9, %v1079_v9  ;;  %v697_v1 = vsub.f32 %v4571_v27, %v5143_v4  ;;  %v698_v31 = vsub.f32 %v4579_v24, %v5147_v22  ;;  %v5214_v8 = vsub.s32 %v2181_v39, %v6386_v35 }
 0x1a4   : > { %v5163_v61 = vpop.xlane.xlu0 %1809  ;;  %2013 = vmax.xlane.f32.xlu0 %v2012_v10  ;;  %v1464_v51 = vmul.f32 %v1080_v56, %v1080_v56  ;;  %v699_v36 = vsub.f32 %v4585_v2, %v5151_v47  ;;  %v652_v32 = vsub.f32 %v4548_v59, %v5218_v43  ;;  %v2016_v20 = vmax.f32 %v2015_v0, %v1509_v57  ;;  %v5235_v10 = vld [vmem:[#allocation8 + $0x168] sm:$0xff] }
 0x1a5   : > { %v1955_v13 = vmax.f32 %v1462_v58, %v1463_v49  ;;  %v1081_v3 = vmul.f32 %v5155_v6, %v697_v1  ;;  %v1082_v16 = vmul.f32 %v5158_v28, %v698_v31  ;;  %v653_v55 = vsub.f32 %v4552_v44, %v5227_v46  ;;  %v5241_v1 = vld [vmem:[#allocation8 + $0x170] sm:$0xff]  ;;  %v5244_v31 = vld [vmem:[#allocation8 + $0x178] sm:$0xff] }
 0x1a6   : > { %v1083_v39 = vmul.f32 %v5165_v23, %v699_v36  ;;  %v654_v59 = vsub.f32 %v4556_v29, %v5231_v38  ;;  %v1036_v14 = vmul.f32 %v5235_v10, %v652_v32  ;;  %v2195_v9 = vadd.s32 4294967256, %v5135_v63  ;;  %2017 = vmax.xlane.f32.xlu1 %v2016_v20 }
 0x1a7   : > { %v5200_v52 = vpop.xlane.xlu1 %1821  ;;  %v1956_v56 = vmax.f32 %v1955_v13, %v1464_v51  ;;  %v1465_v58 = vmul.f32 %v1081_v3, %v1081_v3  ;;  %v1466_v0 = vmul.f32 %v1082_v16, %v1082_v16  ;;  %v1037_v44 = vmul.f32 %v5241_v1, %v653_v55 }
 0x1a8   : > { %v1467_v49 = vmul.f32 %v1083_v39, %v1083_v39  ;;  %v1038_v29 = vmul.f32 %v5244_v31, %v654_v59  ;;  %v1420_v36 = vmul.f32 %v1036_v14, %v1036_v14  ;;  %v5248_v32 = vsub.s32 %v2167_v26, %v6386_v35 }
 0x1a9   : > { %v5190_v48 = vpop.xlane.xlu0 %1817  ;;  %v2188_v42 = vadd.s32 4294967264, %v5135_v63  ;;  %1957 = vmax.xlane.f32.xlu0 %v1956_v56  ;;  %v1959_v20 = vmax.f32 %v1465_v58, %v1466_v0  ;;  %v700_v51 = vsub.f32 %v4571_v27, %v5218_v43  ;;  %v1421_v13 = vmul.f32 %v1037_v44, %v1037_v44 }
 0x1aa   : > { %v1422_v3 = vmul.f32 %v1038_v29, %v1038_v29  ;;  %v701_v16 = vsub.f32 %v4579_v24, %v5227_v46  ;;  %v702_v39 = vsub.f32 %v4585_v2, %v5231_v38  ;;  %v5260_v26 = vsub.s32 %v2195_v9, %v6386_v35 }
 0x1ab   : > { %v1960_v59 = vmax.f32 %v1959_v20, %v1467_v49  ;;  %v1084_v14 = vmul.f32 %v5235_v10, %v700_v51  ;;  %v742_v56 = vsub.f32 %v4654_v30, %v5112_v50  ;;  %v1899_v27 = vmax.f32 %v1420_v36, %v1421_v13 }
 0x1ac   : > { %v1085_v58 = vmul.f32 %v5241_v1, %v701_v16  ;;  %v1086_v0 = vmul.f32 %v5244_v31, %v702_v39  ;;  %v743_v24 = vsub.f32 %v4657_v15, %v5121_v54  ;;  %v5272_v44 = vsub.s32 %v2188_v42, %v6386_v35 }
 0x1ad   : > { %v5238_v57 = vpop.xlane.xlu1 %1829  ;;  %1961 = vmax.xlane.f32.xlu1 %v1960_v59  ;;  %v1468_v9 = vmul.f32 %v1084_v14, %v1084_v14  ;;  %v744_v49 = vsub.f32 %v4662_v21, %v5125_v17  ;;  %v1126_v50 = vmul.f32 %v5129_v7, %v742_v56  ;;  %v1900_v29 = vmax.f32 %v1899_v27, %v1422_v3 }
 0x1ae   : > { %v1469_v36 = vmul.f32 %v1085_v58, %v1085_v58  ;;  %v1470_v20 = vmul.f32 %v1086_v0, %v1086_v0  ;;  %v1127_v51 = vmul.f32 %v5137_v62, %v743_v24  ;;  %v2209_v13 = vadd.s32 4294967240, %v5135_v63 }
 0x1af   : > { %v2202_v54 = vadd.s32 4294967248, %v5135_v63  ;;  %v1128_v16 = vmul.f32 %v5140_v41, %v744_v49  ;;  %v1510_v42 = vmul.f32 %v1126_v50, %v1126_v50  ;;  %1901 = vmax.xlane.f32.xlu0 %v1900_v29  ;;  %v745_v17 = vsub.f32 %v4654_v30, %v5143_v4 }
 0x1b0   : > { %v5222_v40 = vpop.xlane.xlu0 %1825  ;;  %v1963_v39 = vmax.f32 %v1468_v9, %v1469_v36  ;;  %v1511_v59 = vmul.f32 %v1127_v51, %v1127_v51  ;;  %v746_v7 = vsub.f32 %v4657_v15, %v5147_v22  ;;  %v2223_v62 = vadd.s32 4294967224, %v5135_v63 }
 0x1b1   : > { %v1512_v14 = vmul.f32 %v1128_v16, %v1128_v16  ;;  %v747_v56 = vsub.f32 %v4662_v21, %v5151_v47  ;;  %v748_v41 = vsub.f32 %v4654_v30, %v5218_v43  ;;  %v1129_v0 = vmul.f32 %v5155_v6, %v745_v17 }
 0x1b2   : > { %v1964_v27 = vmax.f32 %v1963_v39, %v1470_v20  ;;  %v2019_v58 = vmax.f32 %v1510_v42, %v1511_v59  ;;  %v1130_v4 = vmul.f32 %v5158_v28, %v746_v7  ;;  %v749_v9 = vsub.f32 %v4657_v15, %v5227_v46 }
 0x1b3   : > { %v1131_v22 = vmul.f32 %v5165_v23, %v747_v56  ;;  %v750_v47 = vsub.f32 %v4662_v21, %v5231_v38  ;;  %v1132_v30 = vmul.f32 %v5235_v10, %v748_v41  ;;  %v2216_v43 = vadd.s32 4294967232, %v5135_v63 }
 0x1b4   : > { %v5269_v2 = vpop.xlane.xlu1 %1837  ;;  %1965 = vmax.xlane.f32.xlu1 %v1964_v27  ;;  %v2020_v6 = vmax.f32 %v2019_v58, %v1512_v14  ;;  %v1513_v49 = vmul.f32 %v1129_v0, %v1129_v0  ;;  %v1514_v28 = vmul.f32 %v1130_v4, %v1130_v4  ;;  %v1133_v29 = vmul.f32 %v5241_v1, %v749_v9 }
 0x1b5   : > { %v5257_v55 = vpop.xlane.xlu0 %1833  ;;  %v1515_v50 = vmul.f32 %v1131_v22, %v1131_v22  ;;  %v1134_v23 = vmul.f32 %v5244_v31, %v750_v47  ;;  %v1516_v36 = vmul.f32 %v1132_v30, %v1132_v30  ;;  %v5306_v15 = vsub.s32 %v2209_v13, %v6386_v35 }
 0x1b6   : > { %v2237_v21 = vadd.s32 4294967208, %v5135_v63  ;;  %2021 = vmax.xlane.f32.xlu0 %v2020_v6  ;;  %v2023_v46 = vmax.f32 %v1513_v49, %v1514_v28  ;;  %v5312_v10 = vsub.s32 %v2202_v54, %v6386_v35  ;;  %v5315_v20 = vsub.s32 %v2223_v62, %v6386_v35 }
 0x1b7   : > { %v1517_v1 = vmul.f32 %v1133_v29, %v1133_v29  ;;  %v1518_v31 = vmul.f32 %v1134_v23, %v1134_v23  ;;  %v5318_v51 = vsub.s32 %v2216_v43, %v6386_v35  ;;  %v2230_v13 = vadd.s32 4294967216, %v5135_v63 }
 0x1b8   : > { %v2251_v16 = vadd.s32 4294967192, %v5135_v63  ;;  %v2024_v42 = vmax.f32 %v2023_v46, %v1515_v50  ;;  %v2244_v54 = vadd.s32 4294967200, %v5135_v63  ;;  %v2516_v17 = vrot.slane %v5052_v25, %v5248_v32 }
 0x1b9   : > { %v2027_v59 = vmax.f32 %v1516_v36, %v1517_v1  ;;  %v2512_v7 = vrot.slane %v5043_v33, %v5205_v5  ;;  %v5328_v62 = vsub.s32 %v2237_v21, %v6386_v35  ;;  %v2258_v14 = vadd.s32 4294967184, %v5135_v63 }
 0x1ba   : > { %2025 = vmax.xlane.f32.xlu0 %v2024_v42  ;;  %v2526_v56 = vrot.slane %v5084_v11, %v5214_v8  ;;  %v2521_v41 = vrot.slane %v5078_v12, %v5185_v19  ;;  %v2536_v33 = vrot.slane %v5104_v60, %v5260_v26  ;;  %v2531_v58 = vrot.slane %v5100_v34, %v5272_v44 }
 0x1bb   : > { %v2028_v27 = vmax.f32 %v2027_v59, %v1518_v31  ;;  %v2517_v25 = vsel %vm2172_vm0, %v2516_v17, %v2512_v7  ;;  %v5341_v0 = vsub.s32 %v2230_v13, %v6386_v35  ;;  %v2541_v11 = vrot.slane %v5119_v45, %v5312_v10 }
 0x1bc   : > { %v2522_v4 = vsel %vm2179_vm1, %v2521_v41, %v2517_v25  ;;  %v5347_v22 = vsub.s32 %v2251_v16, %v6386_v35  ;;  %v5350_v9 = vsub.s32 %v2244_v54, %v6386_v35  ;;  %v2546_v34 = vrot.slane %v5132_v53, %v5306_v15 }
 0x1bd   : > { %v5294_v24 = vpop.xlane.xlu1 %1845  ;;  %2029 = vmax.xlane.f32.xlu1 %v2028_v27  ;;  %v2527_v60 = vsel %vm2186_vm2, %v2526_v56, %v2522_v4  ;;  %v2265_v47 = vadd.s32 4294967176, %v5135_v63  ;;  %v5357_v30 = vsub.s32 %v2258_v14, %v6386_v35  ;;  %v2551_v43 = vrot.slane %v5163_v61, %v5318_v51 }
 0x1be   : > { %v5285_v3 = vpop.xlane.xlu0 %1841  ;;  %v2532_v45 = vsel %vm2193_vm3, %v2531_v58, %v2527_v60  ;;  %v2556_v28 = vrot.slane %v5174_v18, %v5315_v20  ;;  %v2566_v50 = vrot.slane %v5200_v52, %v5328_v62  ;;  %v2561_v53 = vrot.slane %v5190_v48, %v5341_v0 }
 0x1bf   : > { %v2537_v49 = vsel %vm2200_vm4, %v2536_v33, %v2532_v45  ;;  %v2571_v29 = vrot.slane %v5222_v40, %v5350_v9  ;;  %v2595_v61 = vrot.slane %v5294_v24, %v5248_v32  ;;  %v2591_v23 = vrot.slane %v5285_v3, %v5205_v5 }
 0x1c0   : > { %v2542_v63 = vsel %vm2207_vm5, %v2541_v11, %v2537_v49  ;;  %v5386_v3 = vsub.s32 %v2265_v47, %v6386_v35  ;;  %v2576_v13 = vrot.slane %v5238_v57, %v5347_v22  ;;  %v2581_v42 = vrot.slane %v5257_v55, %v5357_v30 }
 0x1c1   : > { %v2547_v36 = vsel %vm2214_vm6, %v2546_v34, %v2542_v63  ;;  %v2596_v40 = vsel %vm2172_vm0, %v2595_v61, %v2591_v23  ;;  %v2279_v23 = vrot.slane %v4441_v37, %v5248_v32 }
 0x1c2   : > { %v1906_v39 = vpop.xlane.xlu1 %1905  ;;  %v2552_v46 = vsel %vm2221_vm7, %v2551_v43, %v2547_v36  ;;  %v2586_v59 = vrot.slane %v5269_v2, %v5386_v3  ;;  %v6391_v36 = vld [vmem:[#allocation17_spill] sm:$0xff] }
 0x1c3   : > { %v5309_v38 = vpop.xlane.xlu0 %1849  ;;  %v2670_v18 = vrot.slane %v1906_v39, %v5205_v5  ;;  %v2557_v31 = vsel %vm2228_vm8, %v2556_v28, %v2552_v46 }
 0x1c4   : > { %v2600_v52 = vrot.slane %v5309_v38, %v5185_v19  ;;  %v2562_v16 = vsel %vm2235_vm9, %v2561_v53, %v2557_v31  ;;  %v6389_v53 = vld [vmem:[#allocation45_spill] sm:$0xff]  ;;  %v6395_v31 = vld [vmem:[#allocation51_spill] sm:$0xff] }
 0x1c5   : > { %v2567_v35 = vsel %vm6009_vm10, %v2566_v50, %v2562_v16  ;;  %v2171_v63 = vrot.slane %v6389_v53, %v5248_v32  ;;  %v6396_v16 = vld [vmem:[#allocation26_spill] sm:$0xff] }
 0x1c6   : > { %v2601_v38 = vsel %vm2179_vm1, %v2600_v52, %v2596_v40  ;;  %v2572_v17 = vsel %vm6008_vm11, %v2571_v29, %v2567_v35  ;;  %v6390_v29 = vld [vmem:[#allocation31_spill] sm:$0xff]  ;;  %v6393_v40 = vld [vmem:[#allocation37_spill] sm:$0xff] }
 0x1c7   : > { %v1854_v6 = vpop.xlane.xlu1 %1853  ;;  %v2577_v55 = vsel %vm2256_vm12, %v2576_v13, %v2572_v17  ;;  %v2166_v61 = vrot.slane %v6390_v29, %v5205_v5  ;;  %v2185_v13 = vrot.slane %v6395_v31, %v5214_v8  ;;  %v6397_v35 = vld [vmem:[#allocation25_spill] sm:$0xff]  ;;  %v6398_v17 = vld [vmem:[#allocation40_spill] sm:$0xff] }
 0x1c8   : > { %v2605_v48 = vrot.slane %v1854_v6, %v5214_v8  ;;  %v2582_v7 = vsel %vm2263_vm13, %v2581_v42, %v2577_v55  ;;  %v2289_v42 = vrot.slane %v6396_v16, %v5214_v8  ;;  %v2358_v55 = vrot.slane %v6398_v17, %v5248_v32 }
 0x1c9   : > { %v5409_v14 = vsel %vm2270_vm14, %v2586_v59, %v2582_v7  ;;  %v2294_v59 = vrot.slane %v6397_v35, %v5272_v44  ;;  %v6399_v7 = vld [vmem:[#allocation42_spill] sm:$0xff] }
 0x1ca   : > { %v1910_v12 = vpop.xlane.xlu0 %1909  ;;  %v5396_v39 = vsel %vm2186_vm2, %v2605_v48, %v2601_v38  ;;  %v2173_v48 = vsel %vm2172_vm0, %v2171_v63, %v2166_v61  ;;  %v2354_v53 = vrot.slane %v6399_v7, %v5205_v5  ;;  %v6400_v63 = vld [vmem:[#allocation41_spill] sm:$0xff] }
 0x1cb   : > { %v2674_v1 = vrot.slane %v1910_v12, %v5248_v32  ;;  %v2363_v29 = vrot.slane %v6400_v63, %v5185_v19  ;;  %v6401_v61 = vld [vmem:[#allocation57_spill] sm:$0xff]  ;;  %v6408_v63 = vld [vmem:[#allocation27_spill] sm:$0xff] }
 0x1cd   : > { %v2675_v54 = vsel %vm2172_vm0, %v2674_v1, %v2670_v18  ;;  %v2275_v18 = vrot.slane %v6391_v36, %v5205_v5  ;;  %v2178_v1 = vrot.slane %v6393_v40, %v5185_v19  ;;  %v6402_v36 = vld [vmem:[#allocation59_spill] sm:$0xff] }
 0x1ce   : > { %v1914_v21 = vpop.xlane.xlu0 %1913 }
 0x1cf   : > { %v2679_v24 = vrot.slane %v1914_v21, %v5185_v19  ;;  %v6392_v21 = vld [vmem:[#allocation24_spill] sm:$0xff]  ;;  %v2180_v37 = vsel %vm2179_vm1, %v2178_v1, %v2173_v48  ;;  %v2280_v38 = vsel %vm2172_vm0, %v2279_v23, %v2275_v18  ;;  %v2437_v23 = vrot.slane %v6401_v61, %v5248_v32  ;;  %v6405_v1 = vld [vmem:[#allocation62_spill] sm:$0xff] }
 0x1d0   : > { %v2284_v46 = vrot.slane %v6392_v21, %v5185_v19  ;;  %v2433_v18 = vrot.slane %v6402_v36, %v5205_v5  ;;  %v6404_v21 = vld [vmem:[#allocation60_spill] sm:$0xff]  ;;  %v2187_v40 = vsel %vm2186_vm2, %v2185_v13, %v2180_v37  ;;  %v2192_v31 = vrot.slane %v6405_v1, %v5272_v44  ;;  %v6410_v1 = vld [vmem:[#allocation43_spill] sm:$0xff] }
 0x1d1   : > { %v5403_v57 = vsel %vm2179_vm1, %v2679_v24, %v2675_v54  ;;  %v5411_v56 = vpop.xlane.xlu1 %1969  ;;  %v2304_v61 = vrot.slane %v6408_v63, %v5312_v10  ;;  %v2359_v36 = vsel %vm2172_vm0, %v2358_v55, %v2354_v53  ;;  %v6413_v55 = vld [vmem:[#allocation66_spill] sm:$0xff] }
 0x1d2   : > { %v2285_v54 = vsel %vm2179_vm1, %v2284_v46, %v2280_v38  ;;  %v2442_v46 = vrot.slane %v6404_v21, %v5185_v19  ;;  %v6406_v38 = vld [vmem:[#allocation28_spill] sm:$0xff]  ;;  %v2364_v37 = vsel %vm2179_vm1, %v2363_v29, %v2359_v36  ;;  %v2452_v53 = vrot.slane %v6413_v55, %v5272_v44 }
 0x1d3   : > { %v2299_v16 = vrot.slane %v6406_v38, %v5260_v26  ;;  %v2290_v35 = vsel %vm2186_vm2, %v2289_v42, %v2285_v54  ;;  %v6409_v21 = vld [vmem:[#allocation44_spill] sm:$0xff]  ;;  %v2438_v38 = vsel %vm2172_vm0, %v2437_v23, %v2433_v18 }
 0x1d4   : > { %v2295_v7 = vsel %vm2193_vm3, %v2294_v59, %v2290_v35  ;;  %v2368_v13 = vrot.slane %v6409_v21, %v5214_v8  ;;  %v6411_v42 = vld [vmem:[#allocation64_spill] sm:$0xff]  ;;  %v6412_v59 = vld [vmem:[#allocation67_spill] sm:$0xff]  ;;  %v2443_v63 = vsel %vm2179_vm1, %v2442_v46, %v2438_v38  ;;  %v2194_v21 = vsel %vm2193_vm3, %v2192_v31, %v2187_v40  ;;  %v6418_v38 = vld [vmem:[#allocation46_spill] sm:$0xff] }
 0x1d5   : > { %v5413_v41 = vpop.xlane.xlu1 %1857  ;;  %v2447_v54 = vrot.slane %v6411_v42, %v5214_v8  ;;  %v2199_v35 = vrot.slane %v6412_v59, %v5260_v26  ;;  %v6414_v29 = vld [vmem:[#allocation80_spill] sm:$0xff]  ;;  %v2300_v23 = vsel %vm2200_vm4, %v2299_v16, %v2295_v7  ;;  %v6417_v59 = vld [vmem:[#allocation30_spill] sm:$0xff]  ;;  %v2378_v55 = vrot.slane %v6418_v38, %v5260_v26 }
 0x1d6   : > { %v5415_v2 = vpop.xlane.xlu0 %1973  ;;  %v2206_v36 = vrot.slane %v6414_v29, %v5312_v10  ;;  %v2305_v42 = vsel %vm2207_vm5, %v2304_v61, %v2300_v23  ;;  %v2314_v46 = vrot.slane %v6417_v59, %v5318_v51  ;;  %v2369_v40 = vsel %vm2186_vm2, %v2368_v13, %v2364_v37  ;;  %v6419_v29 = vld [vmem:[#allocation47_spill] sm:$0xff]  ;;  %v6421_v61 = vld [vmem:[#allocation85_spill] sm:$0xff] }
 0x1d7   : > { %v2448_v7 = vsel %vm2186_vm2, %v2447_v54, %v2443_v63  ;;  %v2213_v23 = vrot.slane %v6421_v61, %v5306_v15  ;;  %v2201_v59 = vsel %vm2200_vm4, %v2199_v35, %v2194_v21  ;;  %v6422_v13 = vld [vmem:[#allocation65_spill] sm:$0xff] }
 0x1d8   : > { %v2453_v38 = vsel %vm2193_vm3, %v2452_v53, %v2448_v7  ;;  %v2208_v37 = vsel %vm2207_vm5, %v2206_v36, %v2201_v59  ;;  %v6425_v61 = vld [vmem:[#allocation33_spill] sm:$0xff]  ;;  %v6426_v53 = vld [vmem:[#allocation48_spill] sm:$0xff] }
 0x1d9   : > { %v5417_v27 = vpop.xlane.xlu1 %1977  ;;  %v2324_v35 = vrot.slane %v6425_v61, %v5341_v0  ;;  %v2388_v21 = vrot.slane %v6426_v53, %v5306_v15  ;;  %v6427_v59 = vld [vmem:[#allocation49_spill] sm:$0xff]  ;;  %v2215_v61 = vsel %vm2214_vm6, %v2213_v23, %v2208_v37  ;;  %v6434_v23 = vld [vmem:[#allocation38_spill] sm:$0xff] }
 0x1da   : > { %v6435_v37 = vld [vmem:[#allocation50_spill] sm:$0xff] }
 0x1db   : > { %v5419_v25 = vpop.xlane.xlu0 %1917 }
 0x1de   : > { %v5421_v33 = vpop.xlane.xlu1 %1921 }
 0x1e1   : > { %v5423_v58 = vpop.xlane.xlu0 %1861 }
 0x1e4   : > { %v5425_v4 = vpop.xlane.xlu1 %1865 }
 0x1e6   : > { %v5427_v11 = vpop.xlane.xlu0 %1981 }
 0x1e9   : > { %v5429_v12 = vpop.xlane.xlu1 %1985 }
 0x1ec   : > { %v5431_v60 = vpop.xlane.xlu0 %1925 }
 0x1ef   : > { %v5433_v34 = vpop.xlane.xlu1 %1929 }
 0x1f1   : > { %v5435_v47 = vpop.xlane.xlu0 %1869 }
 0x1f5   : > { %v5437_v45 = vpop.xlane.xlu1 %1873 }
 0x1f6   : > { %v5439_v43 = vpop.xlane.xlu0 %1989 }
 0x1f7   : > { %6387 = vst [vmem:[#allocation81_spill] sm:$0xff] %v5439_v43 }
 0x1fa   : > { %v5441_v6 = vpop.xlane.xlu1 %1993 }
 0x1fb   : > { %6388 = vst [vmem:[#allocation79_spill] sm:$0xff] %v5441_v6  ;;  %v2383_v6 = vrot.slane %v6419_v29, %v5312_v10 }
 0x1fc   : > { %v5443_v49 = vpop.xlane.xlu0 %1933 }
 0x1ff   : > { %v5445_v28 = vpop.xlane.xlu1 %1937 }
 0x202   : > { %v5447_v50 = vpop.xlane.xlu0 %1877 }
 0x209   : > { %v5464_v24 = vpop.xlane.xlu0 %1997 }
 0x20a   : > { %6394 = vst [vmem:[#allocation82_spill] sm:$0xff] %v5464_v24 }
 0x20b   : > { %v5457_v52 = vpop.xlane.xlu1 %1881 }
 0x20f   : > { %v5485_v48 = vpop.xlane.xlu1 %2001 }
 0x210   : > { %6403 = vst [vmem:[#allocation83_spill] sm:$0xff] %v5485_v48  ;;  %v2373_v48 = vrot.slane %v6410_v1, %v5272_v44  ;;  %v6415_v1 = vld [vmem:[#allocation29_spill] sm:$0xff] }
 0x211   : > { %v5495_v17 = vpop.xlane.xlu0 %1941  ;;  %v2309_v24 = vrot.slane %v6415_v1, %v5306_v15  ;;  %v6420_v1 = vld [vmem:[#allocation61_spill] sm:$0xff] }
 0x212   : > { %6407 = vst [vmem:[#allocation84_spill] sm:$0xff] %v5495_v17  ;;  %v2374_v31 = vsel %vm2193_vm3, %v2373_v48, %v2369_v40  ;;  %v2457_v16 = vrot.slane %v6420_v1, %v5260_v26  ;;  %v2462_v48 = vrot.slane %v6422_v13, %v5312_v10  ;;  %v6423_v40 = vld [vmem:[#allocation88_spill] sm:$0xff]  ;;  %v2393_v13 = vrot.slane %v6427_v59, %v5318_v51 }
 0x213   : > { %v5520_v18 = vpop.xlane.xlu1 %1945  ;;  %v2220_v29 = vrot.slane %v6423_v40, %v5318_v51  ;;  %v6424_v1 = vld [vmem:[#allocation32_spill] sm:$0xff]  ;;  %v2310_v63 = vsel %vm2214_vm6, %v2309_v24, %v2305_v42  ;;  %v2379_v7 = vsel %vm2200_vm4, %v2378_v55, %v2374_v31  ;;  %v6430_v55 = vld [vmem:[#allocation70_spill] sm:$0xff] }
 0x214   : > { %6416 = vst [vmem:[#allocation87_spill] sm:$0xff] %v5520_v18  ;;  %v2319_v54 = vrot.slane %v6424_v1, %v5315_v20  ;;  %v2315_v18 = vsel %vm2221_vm7, %v2314_v46, %v2310_v63  ;;  %v2384_v36 = vsel %vm2207_vm5, %v2383_v6, %v2379_v7  ;;  %v6428_v40 = vld [vmem:[#allocation68_spill] sm:$0xff]  ;;  %v2458_v24 = vsel %vm2200_vm4, %v2457_v16, %v2453_v38  ;;  %v6429_v46 = vld [vmem:[#allocation89_spill] sm:$0xff]  ;;  %v6431_v7 = vld [vmem:[#allocation90_spill] sm:$0xff] }
 0x215   : > { %v5534_v43 = vpop.xlane.xlu0 %1885  ;;  %v2467_v1 = vrot.slane %v6428_v40, %v5306_v15  ;;  %v2227_v63 = vrot.slane %v6429_v46, %v5315_v20  ;;  %v2463_v53 = vsel %vm2207_vm5, %v2462_v48, %v2458_v24  ;;  %v2472_v6 = vrot.slane %v6430_v55, %v5318_v51  ;;  %v6432_v40 = vld [vmem:[#allocation34_spill] sm:$0xff]  ;;  %v6436_v55 = vld [vmem:[#allocation52_spill] sm:$0xff] }
 0x216   : > { %v2222_v31 = vsel %vm2221_vm7, %v2220_v29, %v2215_v61  ;;  %v2234_v59 = vrot.slane %v6431_v7, %v5341_v0  ;;  %v2329_v16 = vrot.slane %v6432_v40, %v5328_v62  ;;  %v2320_v38 = vsel %vm2228_vm8, %v2319_v54, %v2315_v18  ;;  %v6437_v40 = vld [vmem:[#allocation71_spill] sm:$0xff] }
 0x217   : > { %v2325_v46 = vsel %vm2235_vm9, %v2324_v35, %v2320_v38  ;;  %v2334_v48 = vrot.slane %v6434_v23, %v5350_v9  ;;  %v2398_v24 = vrot.slane %v6435_v37, %v5315_v20  ;;  %v2389_v29 = vsel %vm2214_vm6, %v2388_v21, %v2384_v36  ;;  %v6438_v35 = vld [vmem:[#allocation91_spill] sm:$0xff]  ;;  %v6439_v37 = vld [vmem:[#allocation69_spill] sm:$0xff] }
 0x218   : > { %v2394_v61 = vsel %vm2221_vm7, %v2393_v13, %v2389_v29  ;;  %v2403_v7 = vrot.slane %v6436_v55, %v5341_v0  ;;  %v2477_v18 = vrot.slane %v6437_v40, %v5315_v20  ;;  %v2468_v54 = vsel %vm2214_vm6, %v2467_v1, %v2463_v53  ;;  %v6440_v13 = vld [vmem:[#allocation92_spill] sm:$0xff]  ;;  %v6442_v1 = vld [vmem:[#allocation35_spill] sm:$0xff] }
 0x219   : > { %v2241_v38 = vrot.slane %v6438_v35, %v5328_v62  ;;  %v2229_v23 = vsel %vm2228_vm8, %v2227_v63, %v2222_v31  ;;  %v2482_v21 = vrot.slane %v6439_v37, %v5341_v0  ;;  %v2248_v29 = vrot.slane %v6440_v13, %v5350_v9  ;;  %v6443_v63 = vld [vmem:[#allocation53_spill] sm:$0xff] }
 0x21a   : > { %v5560_v42 = vpop.xlane.xlu1 %1889  ;;  %v2236_v36 = vsel %vm2235_vm9, %v2234_v59, %v2229_v23  ;;  %v2330_v55 = vsel %vm6009_vm10, %v2329_v16, %v2325_v46  ;;  %v2339_v53 = vrot.slane %v6442_v1, %v5347_v22  ;;  %v2399_v31 = vsel %vm2228_vm8, %v2398_v24, %v2394_v61  ;;  %v6444_v59 = vld [vmem:[#allocation54_spill] sm:$0xff]  ;;  %v6445_v37 = vld [vmem:[#allocation73_spill] sm:$0xff]  ;;  %v6448_v24 = vld [vmem:[#allocation19_spill] sm:$0xff] }
 0x21b   : > { %v5574_v17 = vpop.xlane.xlu0 %2005  ;;  %v2335_v35 = vsel %vm6008_vm11, %v2334_v48, %v2330_v55  ;;  %v2413_v23 = vrot.slane %v6444_v59, %v5350_v9  ;;  %v2487_v16 = vrot.slane %v6445_v37, %v5328_v62  ;;  %v2243_v1 = vsel %vm6009_vm10, %v2241_v38, %v2236_v36  ;;  %v6447_v48 = vld [vmem:[#allocation36_spill] sm:$0xff]  ;;  %v6450_v37 = vld [vmem:[#allocation18_spill] sm:$0xff] }
 0x21c   : > { %6433 = vst [vmem:[#allocation86_spill] sm:$0xff] %v5574_v17  ;;  %v2473_v17 = vsel %vm2221_vm7, %v2472_v6, %v2468_v54  ;;  %v2408_v6 = vrot.slane %v6443_v63, %v5328_v62  ;;  %v2404_v54 = vsel %vm2235_vm9, %v2403_v7, %v2399_v31  ;;  %v2344_v55 = vrot.slane %v6447_v48, %v5357_v30  ;;  %v6449_v7 = vld [vmem:[#allocation93_spill] sm:$0xff]  ;;  %v6452_v36 = vld [vmem:[#allocation56_spill] sm:$0xff] }
 0x21d   : > { %v2478_v46 = vsel %vm2228_vm8, %v2477_v18, %v2473_v17  ;;  %v2492_v61 = vrot.slane %v6448_v24, %v5350_v9  ;;  %v2255_v31 = vrot.slane %v6449_v7, %v5347_v22  ;;  %v2250_v59 = vsel %vm6008_vm11, %v2248_v29, %v2243_v1  ;;  %v6451_v18 = vld [vmem:[#allocation39_spill] sm:$0xff]  ;;  %v6454_v29 = vld [vmem:[#allocation72_spill] sm:$0xff] }
 0x21e   : > { %v5598_v40 = vpop.xlane.xlu1 %2009  ;;  %v2483_v63 = vsel %vm2235_vm9, %v2482_v21, %v2478_v46  ;;  %v2262_v17 = vrot.slane %v6450_v37, %v5357_v30  ;;  %v2340_v38 = vsel %vm2256_vm12, %v2339_v53, %v2335_v35  ;;  %v2418_v48 = vrot.slane %v6452_v36, %v5347_v22  ;;  %v6453_v24 = vld [vmem:[#allocation55_spill] sm:$0xff]  ;;  %v6455_v35 = vld [vmem:[#allocation14_spill] sm:$0xff] }
 0x21f   : > { %6441 = vst [vmem:[#allocation21_spill] sm:$0xff] %v5598_v40  ;;  %v2349_v40 = vrot.slane %v6451_v18, %v5386_v3  ;;  %v2409_v21 = vsel %vm6009_vm10, %v2408_v6, %v2404_v54  ;;  %v2423_v7 = vrot.slane %v6453_v24, %v5357_v30  ;;  %v2497_v1 = vrot.slane %v6454_v29, %v5347_v22  ;;  %v6456_v6 = vld [vmem:[#allocation20_spill] sm:$0xff]  ;;  %v6458_v29 = vld [vmem:[#allocation15_spill] sm:$0xff] }
 0x220   : > { %v5612_v13 = vpop.xlane.xlu0 %1949  ;;  %v2414_v46 = vsel %vm6008_vm11, %v2413_v23, %v2409_v21  ;;  %v2488_v37 = vsel %vm6009_vm10, %v2487_v16, %v2483_v63  ;;  %v2345_v18 = vsel %vm2263_vm13, %v2344_v55, %v2340_v38  ;;  %v2502_v36 = vrot.slane %v6455_v35, %v5357_v30  ;;  %v6457_v16 = vld [vmem:[#allocation58_spill] sm:$0xff] }
 0x221   : > { %6446 = vst [vmem:[#allocation22_spill] sm:$0xff] %v5612_v13  ;;  %v2493_v53 = vsel %vm6008_vm11, %v2492_v61, %v2488_v37  ;;  %v2269_v54 = vrot.slane %v6456_v6, %v5386_v3  ;;  %v2257_v23 = vsel %vm2256_vm12, %v2255_v31, %v2250_v59  ;;  %v2428_v63 = vrot.slane %v6457_v16, %v5386_v3 }
 0x222   : > { %v2264_v24 = vsel %vm2263_vm13, %v2262_v17, %v2257_v23  ;;  %v2419_v55 = vsel %vm2256_vm12, %v2418_v48, %v2414_v46  ;;  %v2350_v61 = vsel %vm2270_vm14, %v2349_v40, %v2345_v18  ;;  %v2507_v37 = vrot.slane %v6458_v29, %v5386_v3 }
 0x223   : > { %v2424_v38 = vsel %vm2263_vm13, %v2423_v7, %v2419_v55  ;;  %v2498_v35 = vsel %vm2256_vm12, %v2497_v1, %v2493_v53  ;;  %v2271_v59 = vsel %vm2270_vm14, %v2269_v54, %v2264_v24  ;;  %vm2827_vm11 = vcmask 1042434  }
 0x224   : > { %v5637_v13 = vpop.xlane.xlu1 %1953  ;;  %v2503_v31 = vsel %vm2263_vm13, %v2502_v36, %v2498_v35  ;;  %v2826_v6 = vsel %vm2825_vm15, %v2350_v61, %v2271_v59  ;;  %v2429_v23 = vsel %vm2270_vm14, %v2428_v63, %v2424_v38  ;;  %v2753_v40 = vrot.slane %v5415_v2, %v5248_v32 }
 0x225   : > { %vm2829_vm10 = vcmask 1043459   ;;  %v2508_v48 = vsel %vm2270_vm14, %v2507_v37, %v2503_v31  ;;  %v2610_v46 = vrot.slane %v5413_v41, %v5272_v44  ;;  %v2758_v7 = vrot.slane %v5417_v27, %v5185_v19 }
 0x226   : > { %v5646_v21 = vpop.xlane.xlu0 %1893  ;;  %v2749_v18 = vrot.slane %v5411_v56, %v5205_v5  ;;  %v2684_v53 = vrot.slane %v5419_v25, %v5214_v8  ;;  %v2615_v32 = vrot.slane %v5423_v58, %v5260_v26  ;;  %vm2831_vm15 = vcmask 1044484  }
 0x227   : > { %v2828_v2 = vsel %vm2827_vm11, %v2429_v23, %v2826_v6  ;;  %v2689_v36 = vrot.slane %v5421_v33, %v5272_v44  ;;  %v2620_v41 = vrot.slane %v5425_v4, %v5312_v10  ;;  %v2763_v5 = vrot.slane %v5427_v11, %v5214_v8  ;;  %v6461_v6 = vld [vmem:[#allocation81_spill] sm:$0xff] }
 0x228   : > { %v2830_v19 = vsel %vm2829_vm10, %v2508_v48, %v2828_v2  ;;  %v2754_v27 = vsel %vm2172_vm0, %v2753_v40, %v2749_v18  ;;  %v2625_v56 = vrot.slane %v5435_v47, %v5306_v15  ;;  %v2611_v25 = vsel %vm2193_vm3, %v2610_v46, %v5396_v39 }
 0x229   : > { %v2759_v58 = vsel %vm2179_vm1, %v2758_v7, %v2754_v27  ;;  %v2630_v33 = vrot.slane %v5437_v45, %v5318_v51  ;;  %v2832_v4 = vsel %vm2831_vm15, %v5409_v14, %v2830_v19  ;;  %v2685_v24 = vsel %vm2186_vm2, %v2684_v53, %v5403_v57  ;;  %v6464_v7 = vld [vmem:[#allocation79_spill] sm:$0xff]  ;;  %v6466_v27 = vld [vmem:[#allocation82_spill] sm:$0xff] }
 0x22a   : > { %v5659_v17 = vpop.xlane.xlu1 %1897  ;;  %v2616_v8 = vsel %vm2200_vm4, %v2615_v32, %v2611_v25  ;;  %v2694_v11 = vrot.slane %v5431_v60, %v5260_v26  ;;  %v2635_v39 = vrot.slane %v5447_v50, %v5315_v20  ;;  %vm2833_vm0 = vcmask 1045509  }
 0x22b   : > { %v2690_v47 = vsel %vm2193_vm3, %v2689_v36, %v2685_v24  ;;  %v2621_v45 = vsel %vm2207_vm5, %v2620_v41, %v2616_v8  ;;  %v2699_v16 = vrot.slane %v5433_v34, %v5312_v10  ;;  %v2640_v14 = vrot.slane %v5457_v52, %v5341_v0 }
 0x22c   : > { %v2764_v63 = vsel %vm2186_vm2, %v2763_v5, %v2759_v58  ;;  %v2626_v55 = vsel %vm2214_vm6, %v2625_v56, %v2621_v45  ;;  %v2704_v60 = vrot.slane %v5443_v49, %v5306_v15  ;;  %v2645_v50 = vrot.slane %v5534_v43, %v5328_v62  ;;  %v6459_v49 = vld [vmem:[#allocation84_spill] sm:$0xff]  ;;  %v6467_v58 = vld [vmem:[#allocation83_spill] sm:$0xff] }
 0x22d   : > { %v5669_v1 = vpop.xlane.xlu0 %2013  ;;  %v2768_v61 = vrot.slane %v5429_v12, %v5272_v44  ;;  %v2631_v38 = vsel %vm2221_vm7, %v2630_v33, %v2626_v55  ;;  %v2709_v34 = vrot.slane %v5445_v28, %v5318_v51  ;;  %v2650_v52 = vrot.slane %v5560_v42, %v5350_v9  ;;  %v6460_v28 = vld [vmem:[#allocation87_spill] sm:$0xff] }
 0x22e   : > { %v2695_v29 = vsel %vm2200_vm4, %v2694_v11, %v2690_v47  ;;  %v2636_v37 = vsel %vm2228_vm8, %v2635_v39, %v2631_v38  ;;  %v2714_v35 = vrot.slane %v6459_v49, %v5315_v20  ;;  %v2655_v43 = vrot.slane %v5646_v21, %v5347_v22  ;;  %v6463_v21 = vld [vmem:[#allocation22_spill] sm:$0xff] }
 0x22f   : > { %v5691_v54 = vpop.xlane.xlu1 %2017  ;;  %vm2835_vm1 = vcmask 1046534   ;;  %v2700_v44 = vsel %vm2207_vm5, %v2699_v16, %v2695_v29  ;;  %v2641_v12 = vsel %vm2235_vm9, %v2640_v14, %v2636_v37  ;;  %v2719_v31 = vrot.slane %v6460_v28, %v5341_v0  ;;  %v6469_v39 = vld [vmem:[#allocation86_spill] sm:$0xff] }
 0x230   : > { %v2660_v42 = vrot.slane %v5659_v17, %v5357_v30  ;;  %v2773_v23 = vrot.slane %v6461_v6, %v5260_v26  ;;  %v2705_v40 = vsel %vm2214_vm6, %v2704_v60, %v2700_v44  ;;  %vm6462_vm2 = vcmask 786112  }
 0x231   : > { %v2646_v48 = vsel %vm6462_vm2, %v2645_v50, %v2641_v12  ;;  %v2724_v46 = vrot.slane %v6463_v21, %v5328_v62  ;;  %v2778_v18 = vrot.slane %v6464_v7, %v5312_v10  ;;  %v2710_v53 = vsel %vm2221_vm7, %v2709_v34, %v2705_v40  ;;  %vm6468_vm11 = vmmov %vm6462_vm2 }
 0x232   : > { %v1958_v57 = vpop.xlane.xlu0 %1957  ;;  %vm6465_vm10 = vcmask 851712   ;;  %v2729_v17 = vrot.slane %v5637_v13, %v5350_v9  ;;  %v2715_v26 = vsel %vm2228_vm8, %v2714_v35, %v2710_v53  ;;  %v2783_v5 = vrot.slane %v6466_v27, %v5306_v15 }
 0x233   : > { %v2651_v32 = vsel %vm6465_vm10, %v2650_v52, %v2646_v48  ;;  %v2734_v41 = vrot.slane %v1958_v57, %v5347_v22  ;;  %v2720_v10 = vsel %vm2235_vm9, %v2719_v31, %v2715_v26  ;;  %v2769_v13 = vsel %vm2193_vm3, %v2768_v61, %v2764_v63  ;;  %vm6470_vm15 = vmmov %vm6465_vm10  ;;  %v6471_v57 = vld [vmem:[#allocation21_spill] sm:$0xff] }
 0x234   : > { %v2656_v36 = vsel %vm2256_vm12, %v2655_v43, %v2651_v32  ;;  %v2788_v33 = vrot.slane %v6467_v58, %v5318_v51  ;;  %v2725_v24 = vsel %vm6468_vm11, %v2724_v46, %v2720_v10  ;;  %v2774_v11 = vsel %vm2200_vm4, %v2773_v23, %v2769_v13  ;;  %vm6472_vm3 = vmmov %vm6462_vm2  ;;  %v2908_v32 = vld [vmem:[%s5801_s3] ss:$0 sm:$0xff] (%p68_p1) }
 0x235   : > { %v2661_v56 = vsel %vm2263_vm13, %v2660_v42, %v2656_v36  ;;  %v2793_v15 = vrot.slane %v6469_v39, %v5315_v20  ;;  %v2730_v47 = vsel %vm6470_vm15, %v2729_v17, %v2725_v24  ;;  %v2779_v14 = vsel %vm2207_vm5, %v2778_v18, %v2774_v11  ;;  %vm6473_vm4 = vmmov %vm6465_vm10 }
 0x236   : > { %v1962_v59 = vpop.xlane.xlu1 %1961  ;;  %v2798_v63 = vrot.slane %v6471_v57, %v5341_v0  ;;  %v2735_v51 = vsel %vm2256_vm12, %v2734_v41, %v2730_v47  ;;  %v2784_v60 = vsel %vm2214_vm6, %v2783_v5, %v2779_v14  ;;  %v2803_v50 = vrot.slane %v5669_v1, %v5328_v62 }
 0x237   : > { %v2739_v25 = vrot.slane %v1962_v59, %v5357_v30  ;;  %v2808_v38 = vrot.slane %v5691_v54, %v5350_v9  ;;  %vm2837_vm5 = vcmask 1047559  }
 0x238   : > { %v1902_v2 = vpop.xlane.xlu0 %1901 }
 0x239   : > { %v2665_v19 = vrot.slane %v1902_v2, %v5386_v3  ;;  %v2740_v20 = vsel %vm2263_vm13, %v2739_v25, %v2735_v51 }
 0x23b   : > { %v2666_v8 = vsel %vm2270_vm14, %v2665_v19, %v2661_v56 }
 0x23c   : > { %v2834_v45 = vsel %vm2833_vm0, %v2666_v8, %v2832_v4  ;;  %v2789_v4 = vsel %vm2221_vm7, %v2788_v33, %v2784_v60 }
 0x23d   : > { %v1966_v16 = vpop.xlane.xlu1 %1965  ;;  %v2794_v34 = vsel %vm2228_vm8, %v2793_v15, %v2789_v4 }
 0x23e   : > { %v2744_v55 = vrot.slane %v1966_v16, %v5386_v3  ;;  %v2799_v37 = vsel %vm2235_vm9, %v2798_v63, %v2794_v34 }
 0x23f   : > { %v2022_v61 = vpop.xlane.xlu0 %2021  ;;  %v2804_v62 = vsel %vm6472_vm3, %v2803_v50, %v2799_v37 }
 0x240   : > { %v2745_v0 = vsel %vm2270_vm14, %v2744_v55, %v2740_v20  ;;  %v2813_v29 = vrot.slane %v2022_v61, %v5347_v22  ;;  %v2809_v49 = vsel %vm6473_vm4, %v2808_v38, %v2804_v62  ;;  %v2032_v22 = vld [vmem:[%s2031_s8] sm:$0xff] }
 0x241   : > { %v2836_v52 = vsel %vm2835_vm1, %v2745_v0, %v2834_v45 }
 0x242   : > { %v2814_v43 = vsel %vm2256_vm12, %v2813_v29, %v2809_v49 }
 0x243   : > { %v2026_v1 = vpop.xlane.xlu0 %2025 }
 0x244   : > { %v2818_v35 = vrot.slane %v2026_v1, %v5357_v30 }
 0x246   : > { %v2819_v9 = vsel %vm2263_vm13, %v2818_v35, %v2814_v43  ;;  %v2030_v54 = vpop.xlane.xlu1 %2029 }
 0x247   : > { %v2823_v44 = vrot.slane %v2030_v54, %v5386_v3 }
 0x249   : > { %v2824_v12 = vsel %vm2270_vm14, %v2823_v44, %v2819_v9  ;;  %70 = sbr.rel (!%p68_p1) target bundleno = 40 (0x28), region = 65 }
 0x24a   : > { %v2838_v28 = vsel %vm2837_vm5, %v2824_v12, %v2836_v52 }
 0x24b   : > { %v2840_v31 = vmax.f32 %v2032_v22, %v2838_v28 }
 0x24d   : > { %2841 = vst [vmem:[%s2031_s8] sm:$0xff] %v2840_v31 }
 0x254   :  { %v2845_v30 = vld [vmem:[#allocation2] sm:$0xff]  ;;  %v2846_v42 = vld [vmem:[#allocation2 + $0x8] sm:$0xff]  ;;  %v2847_v23 = vld [vmem:[#allocation2 + $0x10] sm:$0xff] }
 0x255   :  { %v2848_v59 = vsub.f32 0.0, %v2845_v30  ;;  %v2849_v6 = vsub.f32 0.0, %v2846_v42  ;;  %v2850_v3 = vsub.f32 0.0, %v2847_v23 }
 0x257   :  { %v2851_v40 = vmul.f32 1.442695, %v2848_v59  ;;  %v2853_v48 = vmul.f32 1.442695, %v2849_v6  ;;  %v2855_v21 = vmul.f32 1.442695, %v2850_v3 }
 0x259   :  { %3120 = vpow2.f32 %v2851_v40 }
 0x25a   :  { %3122 = vpow2.f32 %v2853_v48 }
 0x25b   :  { %3124 = vpow2.f32 %v2855_v21 }
 0x266   :  { %v3121_v46 = vpop.eup %3120 }
 0x267   :  { %v3123_v7 = vpop.eup %3122  ;;  %v2858_v18 = vmul.f32 2.0, %v3121_v46 }
 0x268   :  { %v3125_v53 = vpop.eup %3124  ;;  %v2859_v17 = vmul.f32 2.0, %v3123_v7 }
 0x269   :  { %v2861_v2 = vsub.f32 1.0, %v2858_v18  ;;  %v2860_v26 = vmul.f32 2.0, %v3125_v53 }
 0x26a   :  { %v2862_v36 = vsub.f32 1.0, %v2859_v17 }
 0x26b   :  { %v2870_v41 = vmul.f32 %v2908_v32, %v2861_v2  ;;  %v2863_v19 = vsub.f32 1.0, %v2860_v26 }
 0x26c   :  { %v2871_v27 = vmul.f32 %v2908_v32, %v2862_v36 }
 0x26d   :  { %v2873_v5 = vadd.f32 %v3121_v46, %v2870_v41  ;;  %v2872_v10 = vmul.f32 %v2908_v32, %v2863_v19 }
 0x26e   :  { %v2874_v56 = vadd.f32 %v3123_v7, %v2871_v27 }
 0x26f   :  { %2876 = vst [vmem:[#allocation9] sm:$0xff] %v2873_v5  ;;  %v2875_v25 = vadd.f32 %v3125_v53, %v2872_v10 }
 0x270   :  { %2877 = vst [vmem:[#allocation9 + $0x8] sm:$0xff] %v2874_v56 }
 0x271   :  { %2878 = vst [vmem:[#allocation9 + $0x10] sm:$0xff] %v2875_v25 }
 0x272   :  { %3197 = shalt.err (!%p3194_p6)
}
 0x273   :  { %s3228_s3 = smov 128   ;;  %s3229_s14 = smov 8  }
 0x274   :  { %2890 = dma.vmem_to_hbm [thread:$0]  %s2885_s12, 384, %s5802_s4, [#allocation5], %s3228_s3, %s3228_s3, %s3229_s14  }
 0x275   :  { %3214 = dma.done.wait [#allocation5], 384  }
 0x276   :  { %3215 = vsyncadd [#allocation5], 4294966912 }
 0x277   :  { %2894 = vsyncpa [#allocation4], 1 }
 0x278   :  { %2895 = vsyncpa [#allocation7], 1 }
 0x279   :  { %2896 = vsyncpa [#allocation5], 1 }

</bundles_post_ra>
